<compile_context>
chip_gen: v6e
topology: v6e:2x2x1
jax: 0.10.0
libtpu: 0.0.40
codegen_flags: <defaults>
</compile_context>

<pallas_src>
import functools

import jax
import jax.numpy as jnp
from jax.experimental import pallas as pl
from jax.experimental.pallas import tpu as pltpu

BN_EPS = 1e-5

# Row indices inside the packed f32 vector slab (one parameter vector per row).
(R_B1, R_G1, R_BE1,
 R_B2, R_G2, R_BE2,
 R_B3, R_G3, R_BE3,
 R_PIN_B, R_C2H, R_SCORE_B, R_POUT_B,
 R_B4, R_G4, R_BE4,
 R_B5, R_G5, R_BE5,
 R_B6) = range(20)
N_VEC_ROWS = 20

# Order of matrices inside the packed bf16 weight slab.
WEIGHT_ORDER = ("w1", "w2", "w3", "er_a", "er_b", "pin_w", "cb", "score_w",
                "cb_out", "dr_a", "dr_b", "w4", "w5", "w6")


def _bn_train(h, gamma, beta):
    # nn.BatchNorm1d in training mode: normalize with (biased) batch statistics. f32.
    mu = jnp.mean(h, axis=0, keepdims=True)
    var = jnp.mean((h - mu) ** 2, axis=0, keepdims=True)
    return (h - mu) * jax.lax.rsqrt(var + BN_EPS) * gamma + beta


def samm_kernel(
    layout,                                    # dict name -> (row_off, rows, cols), static
    cls_ref,                                   # (B, Din) f32 cls_vectors
    wslab_ref,                                 # (ROWS, PADC) bf16 packed weight matrices
    vec_ref,                                   # (20, PADV) f32 packed biases / BN params / folds
    base_loss_ref,                             # (1, 1) SMEM: recons_loss + mlm_loss from Mining
    idx_ref,                                   # out: (1, B) int32 cluster indices (lane-dense)
    loss_ref,                                  # out: (1, 1) SMEM f32 all_loss
):
    x = cls_ref[...]                           # (B, Din) f32

    def wmat(name):
        off, r, c = layout[name]               # static Python ints -> static ref slice
        return wslab_ref[off:off + r, 0:c]

    W = layout["w1"][2]
    W2 = layout["w2"][2]
    W4 = layout["w3"][2]
    C = layout["cb"][2]
    Din = layout["w6"][2]

    def vrow(i, d):
        # Static slice of the packed f32 vector slab -> (1, d) row.
        return vec_ref[i:i + 1, 0:d]

    def linear(h, name, brow):
        y = jnp.dot(h.astype(jnp.bfloat16), wmat(name),
                    preferred_element_type=jnp.float32)
        return y + brow

    def res_stack(h, name_a, name_b):
        # ResidualStack(in_dim, h_dim, res_h_dim, n_res_layers=1), linear variant:
        #   x = x + W_b(relu(W_a(relu(x))));  x = relu(x)      (no biases)
        r = jnp.maximum(h, 0.0)
        r = jnp.dot(r.astype(jnp.bfloat16), wmat(name_a),
                    preferred_element_type=jnp.float32)
        r = jnp.maximum(r, 0.0)
        r = jnp.dot(r.astype(jnp.bfloat16), wmat(name_b),
                    preferred_element_type=jnp.float32)
        return jnp.maximum(h + r, 0.0)

    # ---------------- encoder ----------------
    h = linear(x, "w1", vrow(R_B1, W))
    h = jnp.tanh(_bn_train(h, vrow(R_G1, W), vrow(R_BE1, W)))
    h = linear(h, "w2", vrow(R_B2, W2))
    h = jnp.tanh(_bn_train(h, vrow(R_G2, W2), vrow(R_BE2, W2)))
    h = linear(h, "w3", vrow(R_B3, W4))
    h = _bn_train(h, vrow(R_G3, W4), vrow(R_BE3, W4))
    enc = res_stack(h, "er_a", "er_b")                            # (B, W/4) f32
    enc_bf = enc.astype(jnp.bfloat16)

    # ---------------- vector quantize ----------------
    # Argmin path straight from enc (project_in folded into the codebook):
    #   scores[b, c] = <z_b, cb_c> = enc_b @ (pin_w @ cb^T) + pin_b @ cb^T
    scores = jnp.dot(enc_bf, wmat("score_w"),
                     preferred_element_type=jnp.float32) + vrow(R_SCORE_B, C)
    # d = 0.5*|cb_c|^2 - <z_b, cb_c>   (|z|^2 per-row constant and the 2x scale are
    # irrelevant for the argmin)
    d = vrow(R_C2H, C) - scores                                   # (B, C)

    iota1 = jax.lax.broadcasted_iota(jnp.int32, d.shape, 1)
    min_d = jnp.min(d, axis=1, keepdims=True)
    ids_col = jnp.min(jnp.where(d <= min_d, iota1, C), axis=1, keepdims=True)  # (B,1) i32
    onehot_bf = (iota1 == ids_col).astype(jnp.bfloat16)           # exact 0/1 bf16

    # Commit-loss path (independent of the argmin path until the final subtract).
    z = jnp.dot(enc_bf, wmat("pin_w"),
                preferred_element_type=jnp.float32) + vrow(R_PIN_B, C)          # (B, Cd)
    q = jnp.dot(onehot_bf, wmat("cb"), preferred_element_type=jnp.float32)      # (B, Cd)
    # Forward value of lucidrains' commit loss with commitment_weight=1:
    #   mse(quantize.detach(), z).  (Straight-through only changes gradients.)
    commit_loss = jnp.sum((q - z) ** 2) * (1.0 / float(q.shape[0] * q.shape[1]))

    # project_out folded into the codebook: qo = onehot @ (cb @ pout_w) + pout_b
    qo = jnp.dot(onehot_bf, wmat("cb_out"),
                 preferred_element_type=jnp.float32) + vrow(R_POUT_B, W4)        # (B, W/4)

    # Lane-dense (1, B) index output: ids_row[0, b] = sum_c c * onehot[b, c]
    # (exact in bf16 for C <= 256; fall back to f32 operands for bigger codebooks)
    idx_dtype = jnp.bfloat16 if C <= 256 else jnp.float32
    code_iota = jax.lax.broadcasted_iota(jnp.int32, (1, C), 1).astype(idx_dtype)
    ids_row = jax.lax.dot_general(
        code_iota, onehot_bf.astype(idx_dtype),
        (((1,), (1,)), ((), ())), preferred_element_type=jnp.float32)            # (1, B)
    idx_ref[...] = ids_row.astype(jnp.int32)

    # ---------------- decoder ----------------
    h = res_stack(qo, "dr_a", "dr_b")
    h = linear(h, "w4", vrow(R_B4, W2))
    h = jnp.tanh(_bn_train(h, vrow(R_G4, W2), vrow(R_BE4, W2)))
    h = linear(h, "w5", vrow(R_B5, W))
    h = jnp.tanh(_bn_train(h, vrow(R_G5, W), vrow(R_BE5, W)))
    dec = linear(h, "w6", vrow(R_B6, Din))                        # (B, Din)

    recons_loss_2 = jnp.sum((dec - x) ** 2) * (1.0 / float(dec.shape[0] * dec.shape[1]))

    loss_ref[0, 0] = base_loss_ref[0, 0] + recons_loss_2 + commit_loss


def samm_forward(cls_vectors, weight_slab, layout, vec_slab, base_loss):
    """Runs encoder -> VQ -> decoder -> losses inside one Pallas kernel."""
    B, _ = cls_vectors.shape
    inputs = (cls_vectors, weight_slab, vec_slab, base_loss)
    in_specs = [
        pl.BlockSpec(memory_space=pltpu.MemorySpace.VMEM),        # cls_vectors
        pl.BlockSpec(memory_space=pltpu.MemorySpace.VMEM),        # packed bf16 weights
        pl.BlockSpec(memory_space=pltpu.MemorySpace.VMEM),        # packed f32 vectors
        pl.BlockSpec(memory_space=pltpu.MemorySpace.SMEM),        # scalar base loss
    ]
    out_shape = (
        jax.ShapeDtypeStruct((1, B), jnp.int32),                  # cluster indices, lane-dense
        jax.ShapeDtypeStruct((1, 1), jnp.float32),                # all_loss
    )
    out_specs = (
        pl.BlockSpec(memory_space=pltpu.MemorySpace.VMEM),
        pl.BlockSpec(memory_space=pltpu.MemorySpace.SMEM),
    )

    # Size the scoped VMEM limit from the actual footprint (tiny kernel; generous slack).
    footprint = sum(int(a.size) * a.dtype.itemsize for a in inputs)
    vmem_limit = int(max(8 * 1024 * 1024, 8 * footprint))

    clusters, all_loss = pl.pallas_call(
        functools.partial(samm_kernel, layout),
        out_shape=out_shape,
        in_specs=in_specs,
        out_specs=out_specs,
        compiler_params=pltpu.CompilerParams(vmem_limit_bytes=vmem_limit),
    )(*inputs)
    return clusters[0, :], all_loss[0, 0]


# ------------------------- parameter construction (glue) -------------------------

def pack_weight_slab(mats):
    """Pack {name: f32 matrix} into one bf16 slab.

    Rows of each matrix are stacked vertically; each matrix's row count is padded up to
    a multiple of 16 (bf16 sublane tile) so every in-kernel slice starts sublane-aligned.
    All matrices share one lane-padded column width (multiple of 128).
    Returns (slab_bf16, layout) with layout[name] = (row_offset, rows, cols).
    """
    max_cols = max(int(m.shape[1]) for m in mats.values())
    pad_cols = max(128, ((max_cols + 127) // 128) * 128)
    layout = {}
    blocks = []
    off = 0
    for name in WEIGHT_ORDER:
        m = jnp.asarray(mats[name], jnp.float32)
        r, c = int(m.shape[0]), int(m.shape[1])
        rp = ((r + 15) // 16) * 16
        layout[name] = (off, r, c)
        blk = jnp.zeros((rp, pad_cols), jnp.float32).at[:r, :c].set(m)
        blocks.append(blk)
        off += rp
    slab = jnp.concatenate(blocks, axis=0).astype(jnp.bfloat16)
    return slab, layout


def make_samm_params(key, word_emb_dim, fea_num, cluster_num):
    W = word_emb_dim
    W2, W4 = W // 2, W // 4
    Din = W * (fea_num + 2)
    Cd = C = cluster_num
    ks = jax.random.split(key, 13)

    def lin(k, fan_in, fan_out):
        kw, kb = jax.random.split(k)
        bound = 1.0 / float(fan_in) ** 0.5
        w = jax.random.uniform(kw, (fan_in, fan_out), jnp.float32, -bound, bound)
        b = jax.random.uniform(kb, (fan_out,), jnp.float32, -bound, bound)
        return w, b

    w1, b1 = lin(ks[0], Din, W)
    w2, b2 = lin(ks[1], W, W2)
    w3, b3 = lin(ks[2], W2, W4)
    er_a = jax.random.uniform(ks[3], (W4, W), jnp.float32, -1.0 / W4 ** 0.5, 1.0 / W4 ** 0.5)
    er_b = jax.random.uniform(ks[4], (W, W4), jnp.float32, -1.0 / W ** 0.5, 1.0 / W ** 0.5)
    pin_w, pin_b = lin(ks[5], W4, Cd)
    cb = 0.1 * jax.random.normal(ks[6], (C, Cd), jnp.float32)
    pout_w, pout_b = lin(ks[7], Cd, W4)
    dr_a = jax.random.uniform(ks[8], (W4, W), jnp.float32, -1.0 / W4 ** 0.5, 1.0 / W4 ** 0.5)
    dr_b = jax.random.uniform(ks[9], (W, W4), jnp.float32, -1.0 / W ** 0.5, 1.0 / W ** 0.5)
    w4, b4 = lin(ks[10], W4, W2)
    w5, b5 = lin(ks[11], W2, W)
    w6, b6 = lin(ks[12], W, Din)

    # Fold project_in / project_out into the codebook; use the bf16-rounded codebook
    # (what the MXU will see) so the fold stays consistent with the in-kernel math.
    cb_r = cb.astype(jnp.bfloat16).astype(jnp.float32)            # (C, Cd)
    score_w = pin_w @ cb_r.T                                      # (W4, C)
    score_b = pin_b @ cb_r.T                                      # (C,)
    cb_out = cb_r @ pout_w                                        # (C, W4)
    c2_half = 0.5 * jnp.sum(cb_r ** 2, axis=1)                    # (C,)

    weight_slab, layout = pack_weight_slab({
        "w1": w1, "w2": w2, "w3": w3, "er_a": er_a, "er_b": er_b,
        "pin_w": pin_w, "cb": cb, "score_w": score_w, "cb_out": cb_out,
        "dr_a": dr_a, "dr_b": dr_b, "w4": w4, "w5": w5, "w6": w6,
    })

    # Pack all (1, dim) parameter vectors into one f32 slab: one row per vector,
    # lane-padded so every in-kernel slice starts at lane 0.
    ones, zeros = jnp.ones, jnp.zeros
    vec_rows = [
        b1, ones(W), zeros(W),            # R_B1,  R_G1,  R_BE1
        b2, ones(W2), zeros(W2),          # R_B2,  R_G2,  R_BE2
        b3, ones(W4), zeros(W4),          # R_B3,  R_G3,  R_BE3
        pin_b,                            # R_PIN_B
        c2_half,                          # R_C2H
        score_b,                          # R_SCORE_B
        pout_b,                           # R_POUT_B
        b4, ones(W2), zeros(W2),          # R_B4,  R_G4,  R_BE4
        b5, ones(W), zeros(W),            # R_B5,  R_G5,  R_BE5
        b6,                               # R_B6
    ]
    assert len(vec_rows) == N_VEC_ROWS
    max_dim = max(Din, W, C)
    pad_to = max(128, ((max_dim + 127) // 128) * 128)

    def padrow(v):
        v = jnp.asarray(v, jnp.float32).reshape(-1)
        return jnp.pad(v, (0, pad_to - v.shape[0]))

    vec_slab = jnp.stack([padrow(v) for v in vec_rows], axis=0)   # (20, pad_to) f32
    return weight_slab, layout, vec_slab


def mining_synthetic(x_tokens, emb_table, cls_id, sep_id):
    # TODO(synk): the real `Mining` module runs a pretrained masked LM loaded from
    # args.lm_path (producing recons/mlm losses and CLS vectors); here we substitute
    # a deterministic embedding lookup of [CLS] + features + [SEP].
    B, F = x_tokens.shape
    cls_col = jnp.full((B, 1), cls_id, jnp.int32)
    sep_col = jnp.full((B, 1), sep_id, jnp.int32)
    sen_ids = jnp.concatenate([cls_col, x_tokens, sep_col], axis=1)   # (B, F+2)
    cls_vectors = emb_table[sen_ids].reshape(B, -1)                   # (B, W*(F+2))
    recons_loss = jnp.float32(0.1)
    mlm_loss = jnp.float32(0.2)
    return sen_ids, cls_vectors, recons_loss, mlm_loss


if __name__ == "__main__":
    # Small feature dims; batch raised to 128 per perf review: BatchNorm couples rows so
    # the whole batch stays in one kernel call, and B=128 makes the (1, B) index store
    # lane-dense while amortizing the per-call fixed cost.  Total inputs are < 1 MB.
    B = 128             # batch per pallas_call
    FEA_NUM = 4         # args.feature_dim
    WORD_EMB = 32       # args.word_emb_dim
    CLUSTER = 16        # args.cluster_space (codebook_size == codebook_dim)
    SYMBOLS = 50        # args.symbol_space

    key = jax.random.PRNGKey(0)
    k_x, k_emb, k_params = jax.random.split(key, 3)

    # raw input: integer symbol ids per feature
    x = jax.random.randint(k_x, (B, FEA_NUM), 0, SYMBOLS - 2, dtype=jnp.int32)
    emb_table = 0.1 * jax.random.normal(k_emb, (SYMBOLS, WORD_EMB), jnp.float32)

    sen_ids, cls_vectors, recons_loss, mlm_loss = mining_synthetic(
        x, emb_table, cls_id=SYMBOLS - 2, sep_id=SYMBOLS - 1)

    weight_slab, layout, vec_slab = make_samm_params(k_params, WORD_EMB, FEA_NUM, CLUSTER)
    base_loss = jnp.reshape(recons_loss + mlm_loss, (1, 1)).astype(jnp.float32)

    clusters, all_loss = samm_forward(cls_vectors, weight_slab, layout, vec_slab, base_loss)
    jax.block_until_ready((sen_ids, clusters, all_loss))

    assert clusters.shape == (B,)
    assert sen_ids.shape == (B, FEA_NUM + 2)
    assert bool(jnp.all((clusters >= 0) & (clusters < CLUSTER)))
    assert bool(jnp.isfinite(all_loss))
    print("KERNEL_OK")
</pallas_src>

<mosaic_0001>
module attributes {stable_mosaic.version = 11 : i64} {
  func.func @samm_kernel(%arg0: memref<128x192xf32, #tpu.memory_space<vmem>>, %arg1: memref<464x256xbf16, #tpu.memory_space<vmem>>, %arg2: memref<20x256xf32, #tpu.memory_space<vmem>>, %arg3: memref<1x1xf32, #tpu.memory_space<smem>>, %arg4: memref<1x128xi32, #tpu.memory_space<vmem>>, %arg5: memref<1x1xf32, #tpu.memory_space<smem>>) attributes {dimension_semantics = [], scalar_prefetch = 0 : i64, scratch_operands = 0 : i64, tpu.core_type = #tpu.core_type<tc>} {
    %c0 = arith.constant 0 : index
    %c0_0 = arith.constant 0 : index
    %0 = vector.load %arg0[%c0, %c0_0] : memref<128x192xf32, #tpu.memory_space<vmem>>, vector<128x192xf32>
    %c0_1 = arith.constant 0 : index
    %c0_2 = arith.constant 0 : index
    %1 = vector.load %arg2[%c0_1, %c0_2] : memref<20x256xf32, #tpu.memory_space<vmem>>, vector<1x32xf32>
    %2 = arith.truncf %0 : vector<128x192xf32> to vector<128x192xbf16>
    %c0_3 = arith.constant 0 : index
    %c0_4 = arith.constant 0 : index
    %3 = vector.load %arg1[%c0_3, %c0_4] : memref<464x256xbf16, #tpu.memory_space<vmem>>, vector<192x32xbf16>
    %cst = arith.constant dense<0.000000e+00> : vector<128x32xf32>
    %4 = tpu.matmul %2, %3, %cst {dimension_numbers = #tpu.dot_dimension_numbers<[1], [0], [0], [1], [0, 0, 1, 1], [], []>} : vector<128x192xbf16>, vector<192x32xbf16>, vector<128x32xf32> -> vector<128x32xf32>
    %5 = vector.broadcast %1 : vector<1x32xf32> to vector<128x32xf32>
    %6 = arith.addf %4, %5 : vector<128x32xf32>
    %c1 = arith.constant 1 : index
    %c0_5 = arith.constant 0 : index
    %7 = vector.load %arg2[%c1, %c0_5] : memref<20x256xf32, #tpu.memory_space<vmem>>, vector<1x32xf32>
    %c2 = arith.constant 2 : index
    %c0_6 = arith.constant 0 : index
    %8 = vector.load %arg2[%c2, %c0_6] : memref<20x256xf32, #tpu.memory_space<vmem>>, vector<1x32xf32>
    %cst_7 = arith.constant dense<0.000000e+00> : vector<32xf32>
    %9 = vector.multi_reduction <add>, %6, %cst_7 [0] : vector<128x32xf32> to vector<32xf32>
    %10 = vector.shape_cast %9 : vector<32xf32> to vector<1x32xf32>
    %cst_8 = arith.constant 1.280000e+02 : f32
    %11 = vector.broadcast %cst_8 : f32 to vector<1x32xf32>
    %12 = arith.divf %10, %11 : vector<1x32xf32>
    %13 = vector.broadcast %12 : vector<1x32xf32> to vector<128x32xf32>
    %14 = arith.subf %6, %13 : vector<128x32xf32>
    %15 = arith.mulf %14, %14 : vector<128x32xf32>
    %cst_9 = arith.constant dense<0.000000e+00> : vector<32xf32>
    %16 = vector.multi_reduction <add>, %15, %cst_9 [0] : vector<128x32xf32> to vector<32xf32>
    %17 = vector.shape_cast %16 : vector<32xf32> to vector<1x32xf32>
    %cst_10 = arith.constant 1.280000e+02 : f32
    %18 = vector.broadcast %cst_10 : f32 to vector<1x32xf32>
    %19 = arith.divf %17, %18 : vector<1x32xf32>
    %20 = vector.broadcast %12 : vector<1x32xf32> to vector<128x32xf32>
    %21 = arith.subf %6, %20 : vector<128x32xf32>
    %cst_11 = arith.constant 9.99999974E-6 : f32
    %22 = vector.broadcast %cst_11 : f32 to vector<1x32xf32>
    %23 = arith.addf %19, %22 : vector<1x32xf32>
    %24 = math.rsqrt %23 : vector<1x32xf32>
    %25 = vector.broadcast %24 : vector<1x32xf32> to vector<128x32xf32>
    %26 = arith.mulf %21, %25 : vector<128x32xf32>
    %27 = vector.broadcast %7 : vector<1x32xf32> to vector<128x32xf32>
    %28 = arith.mulf %26, %27 : vector<128x32xf32>
    %29 = vector.broadcast %8 : vector<1x32xf32> to vector<128x32xf32>
    %30 = arith.addf %28, %29 : vector<128x32xf32>
    %31 = math.tanh %30 : vector<128x32xf32>
    %c3 = arith.constant 3 : index
    %c0_12 = arith.constant 0 : index
    %32 = vector.load %arg2[%c3, %c0_12] : memref<20x256xf32, #tpu.memory_space<vmem>>, vector<1x16xf32>
    %33 = arith.truncf %31 : vector<128x32xf32> to vector<128x32xbf16>
    %c192 = arith.constant 192 : index
    %c0_13 = arith.constant 0 : index
    %34 = vector.load %arg1[%c192, %c0_13] : memref<464x256xbf16, #tpu.memory_space<vmem>>, vector<32x16xbf16>
    %cst_14 = arith.constant dense<0.000000e+00> : vector<128x16xf32>
    %35 = tpu.matmul %33, %34, %cst_14 {dimension_numbers = #tpu.dot_dimension_numbers<[1], [0], [0], [1], [0, 0, 1, 1], [], []>} : vector<128x32xbf16>, vector<32x16xbf16>, vector<128x16xf32> -> vector<128x16xf32>
    %36 = vector.broadcast %32 : vector<1x16xf32> to vector<128x16xf32>
    %37 = arith.addf %35, %36 : vector<128x16xf32>
    %c4 = arith.constant 4 : index
    %c0_15 = arith.constant 0 : index
    %38 = vector.load %arg2[%c4, %c0_15] : memref<20x256xf32, #tpu.memory_space<vmem>>, vector<1x16xf32>
    %c5 = arith.constant 5 : index
    %c0_16 = arith.constant 0 : index
    %39 = vector.load %arg2[%c5, %c0_16] : memref<20x256xf32, #tpu.memory_space<vmem>>, vector<1x16xf32>
    %cst_17 = arith.constant dense<0.000000e+00> : vector<16xf32>
    %40 = vector.multi_reduction <add>, %37, %cst_17 [0] : vector<128x16xf32> to vector<16xf32>
    %41 = vector.shape_cast %40 : vector<16xf32> to vector<1x16xf32>
    %cst_18 = arith.constant 1.280000e+02 : f32
    %42 = vector.broadcast %cst_18 : f32 to vector<1x16xf32>
    %43 = arith.divf %41, %42 : vector<1x16xf32>
    %44 = vector.broadcast %43 : vector<1x16xf32> to vector<128x16xf32>
    %45 = arith.subf %37, %44 : vector<128x16xf32>
    %46 = arith.mulf %45, %45 : vector<128x16xf32>
    %cst_19 = arith.constant dense<0.000000e+00> : vector<16xf32>
    %47 = vector.multi_reduction <add>, %46, %cst_19 [0] : vector<128x16xf32> to vector<16xf32>
    %48 = vector.shape_cast %47 : vector<16xf32> to vector<1x16xf32>
    %cst_20 = arith.constant 1.280000e+02 : f32
    %49 = vector.broadcast %cst_20 : f32 to vector<1x16xf32>
    %50 = arith.divf %48, %49 : vector<1x16xf32>
    %51 = vector.broadcast %43 : vector<1x16xf32> to vector<128x16xf32>
    %52 = arith.subf %37, %51 : vector<128x16xf32>
    %cst_21 = arith.constant 9.99999974E-6 : f32
    %53 = vector.broadcast %cst_21 : f32 to vector<1x16xf32>
    %54 = arith.addf %50, %53 : vector<1x16xf32>
    %55 = math.rsqrt %54 : vector<1x16xf32>
    %56 = vector.broadcast %55 : vector<1x16xf32> to vector<128x16xf32>
    %57 = arith.mulf %52, %56 : vector<128x16xf32>
    %58 = vector.broadcast %38 : vector<1x16xf32> to vector<128x16xf32>
    %59 = arith.mulf %57, %58 : vector<128x16xf32>
    %60 = vector.broadcast %39 : vector<1x16xf32> to vector<128x16xf32>
    %61 = arith.addf %59, %60 : vector<128x16xf32>
    %62 = math.tanh %61 : vector<128x16xf32>
    %c6 = arith.constant 6 : index
    %c0_22 = arith.constant 0 : index
    %63 = vector.load %arg2[%c6, %c0_22] : memref<20x256xf32, #tpu.memory_space<vmem>>, vector<1x8xf32>
    %64 = arith.truncf %62 : vector<128x16xf32> to vector<128x16xbf16>
    %c224 = arith.constant 224 : index
    %c0_23 = arith.constant 0 : index
    %65 = vector.load %arg1[%c224, %c0_23] : memref<464x256xbf16, #tpu.memory_space<vmem>>, vector<16x8xbf16>
    %cst_24 = arith.constant dense<0.000000e+00> : vector<128x8xf32>
    %66 = tpu.matmul %64, %65, %cst_24 {dimension_numbers = #tpu.dot_dimension_numbers<[1], [0], [0], [1], [0, 0, 1, 1], [], []>} : vector<128x16xbf16>, vector<16x8xbf16>, vector<128x8xf32> -> vector<128x8xf32>
    %67 = vector.broadcast %63 : vector<1x8xf32> to vector<128x8xf32>
    %68 = arith.addf %66, %67 : vector<128x8xf32>
    %c7 = arith.constant 7 : index
    %c0_25 = arith.constant 0 : index
    %69 = vector.load %arg2[%c7, %c0_25] : memref<20x256xf32, #tpu.memory_space<vmem>>, vector<1x8xf32>
    %c8 = arith.constant 8 : index
    %c0_26 = arith.constant 0 : index
    %70 = vector.load %arg2[%c8, %c0_26] : memref<20x256xf32, #tpu.memory_space<vmem>>, vector<1x8xf32>
    %cst_27 = arith.constant dense<0.000000e+00> : vector<8xf32>
    %71 = vector.multi_reduction <add>, %68, %cst_27 [0] : vector<128x8xf32> to vector<8xf32>
    %72 = vector.shape_cast %71 : vector<8xf32> to vector<1x8xf32>
    %cst_28 = arith.constant 1.280000e+02 : f32
    %73 = vector.broadcast %cst_28 : f32 to vector<1x8xf32>
    %74 = arith.divf %72, %73 : vector<1x8xf32>
    %75 = vector.broadcast %74 : vector<1x8xf32> to vector<128x8xf32>
    %76 = arith.subf %68, %75 : vector<128x8xf32>
    %77 = arith.mulf %76, %76 : vector<128x8xf32>
    %cst_29 = arith.constant dense<0.000000e+00> : vector<8xf32>
    %78 = vector.multi_reduction <add>, %77, %cst_29 [0] : vector<128x8xf32> to vector<8xf32>
    %79 = vector.shape_cast %78 : vector<8xf32> to vector<1x8xf32>
    %cst_30 = arith.constant 1.280000e+02 : f32
    %80 = vector.broadcast %cst_30 : f32 to vector<1x8xf32>
    %81 = arith.divf %79, %80 : vector<1x8xf32>
    %82 = vector.broadcast %74 : vector<1x8xf32> to vector<128x8xf32>
    %83 = arith.subf %68, %82 : vector<128x8xf32>
    %cst_31 = arith.constant 9.99999974E-6 : f32
    %84 = vector.broadcast %cst_31 : f32 to vector<1x8xf32>
    %85 = arith.addf %81, %84 : vector<1x8xf32>
    %86 = math.rsqrt %85 : vector<1x8xf32>
    %87 = vector.broadcast %86 : vector<1x8xf32> to vector<128x8xf32>
    %88 = arith.mulf %83, %87 : vector<128x8xf32>
    %89 = vector.broadcast %69 : vector<1x8xf32> to vector<128x8xf32>
    %90 = arith.mulf %88, %89 : vector<128x8xf32>
    %91 = vector.broadcast %70 : vector<1x8xf32> to vector<128x8xf32>
    %92 = arith.addf %90, %91 : vector<128x8xf32>
    %cst_32 = arith.constant 0.000000e+00 : f32
    %93 = vector.broadcast %cst_32 : f32 to vector<128x8xf32>
    %94 = arith.maximumf %92, %93 : vector<128x8xf32>
    %95 = arith.truncf %94 : vector<128x8xf32> to vector<128x8xbf16>
    %c240 = arith.constant 240 : index
    %c0_33 = arith.constant 0 : index
    %96 = vector.load %arg1[%c240, %c0_33] : memref<464x256xbf16, #tpu.memory_space<vmem>>, vector<8x32xbf16>
    %cst_34 = arith.constant dense<0.000000e+00> : vector<128x32xf32>
    %97 = tpu.matmul %95, %96, %cst_34 {dimension_numbers = #tpu.dot_dimension_numbers<[1], [0], [0], [1], [0, 0, 1, 1], [], []>} : vector<128x8xbf16>, vector<8x32xbf16>, vector<128x32xf32> -> vector<128x32xf32>
    %cst_35 = arith.constant 0.000000e+00 : f32
    %98 = vector.broadcast %cst_35 : f32 to vector<128x32xf32>
    %99 = arith.maximumf %97, %98 : vector<128x32xf32>
    %100 = arith.truncf %99 : vector<128x32xf32> to vector<128x32xbf16>
    %c256 = arith.constant 256 : index
    %c0_36 = arith.constant 0 : index
    %101 = vector.load %arg1[%c256, %c0_36] : memref<464x256xbf16, #tpu.memory_space<vmem>>, vector<32x8xbf16>
    %cst_37 = arith.constant dense<0.000000e+00> : vector<128x8xf32>
    %102 = tpu.matmul %100, %101, %cst_37 {dimension_numbers = #tpu.dot_dimension_numbers<[1], [0], [0], [1], [0, 0, 1, 1], [], []>} : vector<128x32xbf16>, vector<32x8xbf16>, vector<128x8xf32> -> vector<128x8xf32>
    %103 = arith.addf %92, %102 : vector<128x8xf32>
    %cst_38 = arith.constant 0.000000e+00 : f32
    %104 = vector.broadcast %cst_38 : f32 to vector<128x8xf32>
    %105 = arith.maximumf %103, %104 : vector<128x8xf32>
    %106 = arith.truncf %105 : vector<128x8xf32> to vector<128x8xbf16>
    %c320 = arith.constant 320 : index
    %c0_39 = arith.constant 0 : index
    %107 = vector.load %arg1[%c320, %c0_39] : memref<464x256xbf16, #tpu.memory_space<vmem>>, vector<8x16xbf16>
    %cst_40 = arith.constant dense<0.000000e+00> : vector<128x16xf32>
    %108 = tpu.matmul %106, %107, %cst_40 {dimension_numbers = #tpu.dot_dimension_numbers<[1], [0], [0], [1], [0, 0, 1, 1], [], []>} : vector<128x8xbf16>, vector<8x16xbf16>, vector<128x16xf32> -> vector<128x16xf32>
    %c11 = arith.constant 11 : index
    %c0_41 = arith.constant 0 : index
    %109 = vector.load %arg2[%c11, %c0_41] : memref<20x256xf32, #tpu.memory_space<vmem>>, vector<1x16xf32>
    %110 = vector.broadcast %109 : vector<1x16xf32> to vector<128x16xf32>
    %111 = arith.addf %108, %110 : vector<128x16xf32>
    %c10 = arith.constant 10 : index
    %c0_42 = arith.constant 0 : index
    %112 = vector.load %arg2[%c10, %c0_42] : memref<20x256xf32, #tpu.memory_space<vmem>>, vector<1x16xf32>
    %113 = vector.broadcast %112 : vector<1x16xf32> to vector<128x16xf32>
    %114 = arith.subf %113, %111 : vector<128x16xf32>
    %115 = tpu.iota {dimensions = array<i32: 1>} : vector<128x16xi32>
    %cst_43 = arith.constant dense<0x7F800000> : vector<128xf32>
    %116 = vector.multi_reduction <minimumf>, %114, %cst_43 [1] : vector<128x16xf32> to vector<128xf32>
    %117 = vector.shape_cast %116 : vector<128xf32> to vector<128x1xf32>
    %118 = vector.broadcast %117 : vector<128x1xf32> to vector<128x16xf32>
    %119 = arith.cmpf ole, %114, %118 : vector<128x16xf32>
    %c16_i32 = arith.constant 16 : i32
    %120 = vector.broadcast %c16_i32 : i32 to vector<128x16xi32>
    %121 = arith.select %119, %115, %120 : vector<128x16xi1>, vector<128x16xi32>
    %cst_44 = arith.constant dense<2147483647> : vector<128xi32>
    %122 = vector.multi_reduction <minsi>, %121, %cst_44 [1] : vector<128x16xi32> to vector<128xi32>
    %123 = vector.shape_cast %122 : vector<128xi32> to vector<128x1xi32>
    %124 = vector.broadcast %123 : vector<128x1xi32> to vector<128x16xi32>
    %125 = arith.cmpi eq, %115, %124 : vector<128x16xi32>
    %126 = arith.extui %125 : vector<128x16xi1> to vector<128x16xi32>
    %127 = arith.sitofp %126 : vector<128x16xi32> to vector<128x16xf32>
    %128 = arith.truncf %127 : vector<128x16xf32> to vector<128x16xbf16>
    %c288 = arith.constant 288 : index
    %c0_45 = arith.constant 0 : index
    %129 = vector.load %arg1[%c288, %c0_45] : memref<464x256xbf16, #tpu.memory_space<vmem>>, vector<8x16xbf16>
    %cst_46 = arith.constant dense<0.000000e+00> : vector<128x16xf32>
    %130 = tpu.matmul %106, %129, %cst_46 {dimension_numbers = #tpu.dot_dimension_numbers<[1], [0], [0], [1], [0, 0, 1, 1], [], []>} : vector<128x8xbf16>, vector<8x16xbf16>, vector<128x16xf32> -> vector<128x16xf32>
    %c9 = arith.constant 9 : index
    %c0_47 = arith.constant 0 : index
    %131 = vector.load %arg2[%c9, %c0_47] : memref<20x256xf32, #tpu.memory_space<vmem>>, vector<1x16xf32>
    %132 = vector.broadcast %131 : vector<1x16xf32> to vector<128x16xf32>
    %133 = arith.addf %130, %132 : vector<128x16xf32>
    %c304 = arith.constant 304 : index
    %c0_48 = arith.constant 0 : index
    %134 = vector.load %arg1[%c304, %c0_48] : memref<464x256xbf16, #tpu.memory_space<vmem>>, vector<16x16xbf16>
    %cst_49 = arith.constant dense<0.000000e+00> : vector<128x16xf32>
    %135 = tpu.matmul %128, %134, %cst_49 {dimension_numbers = #tpu.dot_dimension_numbers<[1], [0], [0], [1], [0, 0, 1, 1], [], []>} : vector<128x16xbf16>, vector<16x16xbf16>, vector<128x16xf32> -> vector<128x16xf32>
    %136 = arith.subf %135, %133 : vector<128x16xf32>
    %137 = arith.mulf %136, %136 : vector<128x16xf32>
    %138 = vector.shape_cast %137 : vector<128x16xf32> to vector<1x128x16xf32>
    %cst_50 = arith.constant dense<0.000000e+00> : vector<1xf32>
    %139 = vector.multi_reduction <add>, %138, %cst_50 [1, 2] : vector<1x128x16xf32> to vector<1xf32>
    %140 = vector.shape_cast %139 : vector<1xf32> to vector<1x1x1xf32>
    %141 = vector.extract %140[0, 0, 0] : f32 from vector<1x1x1xf32>
    %cst_51 = arith.constant 4.8828125E-4 : f32
    %142 = arith.mulf %141, %cst_51 : f32
    %c336 = arith.constant 336 : index
    %c0_52 = arith.constant 0 : index
    %143 = vector.load %arg1[%c336, %c0_52] : memref<464x256xbf16, #tpu.memory_space<vmem>>, vector<16x8xbf16>
    %cst_53 = arith.constant dense<0.000000e+00> : vector<128x8xf32>
    %144 = tpu.matmul %128, %143, %cst_53 {dimension_numbers = #tpu.dot_dimension_numbers<[1], [0], [0], [1], [0, 0, 1, 1], [], []>} : vector<128x16xbf16>, vector<16x8xbf16>, vector<128x8xf32> -> vector<128x8xf32>
    %c12 = arith.constant 12 : index
    %c0_54 = arith.constant 0 : index
    %145 = vector.load %arg2[%c12, %c0_54] : memref<20x256xf32, #tpu.memory_space<vmem>>, vector<1x8xf32>
    %146 = vector.broadcast %145 : vector<1x8xf32> to vector<128x8xf32>
    %147 = arith.addf %144, %146 : vector<128x8xf32>
    %148 = tpu.iota {dimensions = array<i32: 1>} : vector<1x16xi32>
    %149 = arith.sitofp %148 : vector<1x16xi32> to vector<1x16xbf16>
    %cst_55 = arith.constant dense<0.000000e+00> : vector<1x128xf32>
    %150 = tpu.matmul %149, %128, %cst_55 {dimension_numbers = #tpu.dot_dimension_numbers<[1], [1], [0], [0], [0, 0, 1, 0], [], []>} : vector<1x16xbf16>, vector<128x16xbf16>, vector<1x128xf32> -> vector<1x128xf32>
    %151 = arith.fptosi %150 : vector<1x128xf32> to vector<1x128xi32>
    %c0_56 = arith.constant 0 : index
    %c0_57 = arith.constant 0 : index
    %152 = vector.load %arg4[%c0_56, %c0_57] : memref<1x128xi32, #tpu.memory_space<vmem>>, vector<1x128xi32>
    tpu.vector_store %arg4[%c0_56, %c0_57], %151 {strides = array<i32>} : memref<1x128xi32, #tpu.memory_space<vmem>>, vector<1x128xi32>,
    %cst_58 = arith.constant 0.000000e+00 : f32
    %153 = vector.broadcast %cst_58 : f32 to vector<128x8xf32>
    %154 = arith.maximumf %147, %153 : vector<128x8xf32>
    %155 = arith.truncf %154 : vector<128x8xf32> to vector<128x8xbf16>
    %c352 = arith.constant 352 : index
    %c0_59 = arith.constant 0 : index
    %156 = vector.load %arg1[%c352, %c0_59] : memref<464x256xbf16, #tpu.memory_space<vmem>>, vector<8x32xbf16>
    %cst_60 = arith.constant dense<0.000000e+00> : vector<128x32xf32>
    %157 = tpu.matmul %155, %156, %cst_60 {dimension_numbers = #tpu.dot_dimension_numbers<[1], [0], [0], [1], [0, 0, 1, 1], [], []>} : vector<128x8xbf16>, vector<8x32xbf16>, vector<128x32xf32> -> vector<128x32xf32>
    %cst_61 = arith.constant 0.000000e+00 : f32
    %158 = vector.broadcast %cst_61 : f32 to vector<128x32xf32>
    %159 = arith.maximumf %157, %158 : vector<128x32xf32>
    %160 = arith.truncf %159 : vector<128x32xf32> to vector<128x32xbf16>
    %c368 = arith.constant 368 : index
    %c0_62 = arith.constant 0 : index
    %161 = vector.load %arg1[%c368, %c0_62] : memref<464x256xbf16, #tpu.memory_space<vmem>>, vector<32x8xbf16>
    %cst_63 = arith.constant dense<0.000000e+00> : vector<128x8xf32>
    %162 = tpu.matmul %160, %161, %cst_63 {dimension_numbers = #tpu.dot_dimension_numbers<[1], [0], [0], [1], [0, 0, 1, 1], [], []>} : vector<128x32xbf16>, vector<32x8xbf16>, vector<128x8xf32> -> vector<128x8xf32>
    %163 = arith.addf %147, %162 : vector<128x8xf32>
    %cst_64 = arith.constant 0.000000e+00 : f32
    %164 = vector.broadcast %cst_64 : f32 to vector<128x8xf32>
    %165 = arith.maximumf %163, %164 : vector<128x8xf32>
    %c13 = arith.constant 13 : index
    %c0_65 = arith.constant 0 : index
    %166 = vector.load %arg2[%c13, %c0_65] : memref<20x256xf32, #tpu.memory_space<vmem>>, vector<1x16xf32>
    %167 = arith.truncf %165 : vector<128x8xf32> to vector<128x8xbf16>
    %c400 = arith.constant 400 : index
    %c0_66 = arith.constant 0 : index
    %168 = vector.load %arg1[%c400, %c0_66] : memref<464x256xbf16, #tpu.memory_space<vmem>>, vector<8x16xbf16>
    %cst_67 = arith.constant dense<0.000000e+00> : vector<128x16xf32>
    %169 = tpu.matmul %167, %168, %cst_67 {dimension_numbers = #tpu.dot_dimension_numbers<[1], [0], [0], [1], [0, 0, 1, 1], [], []>} : vector<128x8xbf16>, vector<8x16xbf16>, vector<128x16xf32> -> vector<128x16xf32>
    %170 = vector.broadcast %166 : vector<1x16xf32> to vector<128x16xf32>
    %171 = arith.addf %169, %170 : vector<128x16xf32>
    %c14 = arith.constant 14 : index
    %c0_68 = arith.constant 0 : index
    %172 = vector.load %arg2[%c14, %c0_68] : memref<20x256xf32, #tpu.memory_space<vmem>>, vector<1x16xf32>
    %c15 = arith.constant 15 : index
    %c0_69 = arith.constant 0 : index
    %173 = vector.load %arg2[%c15, %c0_69] : memref<20x256xf32, #tpu.memory_space<vmem>>, vector<1x16xf32>
    %cst_70 = arith.constant dense<0.000000e+00> : vector<16xf32>
    %174 = vector.multi_reduction <add>, %171, %cst_70 [0] : vector<128x16xf32> to vector<16xf32>
    %175 = vector.shape_cast %174 : vector<16xf32> to vector<1x16xf32>
    %cst_71 = arith.constant 1.280000e+02 : f32
    %176 = vector.broadcast %cst_71 : f32 to vector<1x16xf32>
    %177 = arith.divf %175, %176 : vector<1x16xf32>
    %178 = vector.broadcast %177 : vector<1x16xf32> to vector<128x16xf32>
    %179 = arith.subf %171, %178 : vector<128x16xf32>
    %180 = arith.mulf %179, %179 : vector<128x16xf32>
    %cst_72 = arith.constant dense<0.000000e+00> : vector<16xf32>
    %181 = vector.multi_reduction <add>, %180, %cst_72 [0] : vector<128x16xf32> to vector<16xf32>
    %182 = vector.shape_cast %181 : vector<16xf32> to vector<1x16xf32>
    %cst_73 = arith.constant 1.280000e+02 : f32
    %183 = vector.broadcast %cst_73 : f32 to vector<1x16xf32>
    %184 = arith.divf %182, %183 : vector<1x16xf32>
    %185 = vector.broadcast %177 : vector<1x16xf32> to vector<128x16xf32>
    %186 = arith.subf %171, %185 : vector<128x16xf32>
    %cst_74 = arith.constant 9.99999974E-6 : f32
    %187 = vector.broadcast %cst_74 : f32 to vector<1x16xf32>
    %188 = arith.addf %184, %187 : vector<1x16xf32>
    %189 = math.rsqrt %188 : vector<1x16xf32>
    %190 = vector.broadcast %189 : vector<1x16xf32> to vector<128x16xf32>
    %191 = arith.mulf %186, %190 : vector<128x16xf32>
    %192 = vector.broadcast %172 : vector<1x16xf32> to vector<128x16xf32>
    %193 = arith.mulf %191, %192 : vector<128x16xf32>
    %194 = vector.broadcast %173 : vector<1x16xf32> to vector<128x16xf32>
    %195 = arith.addf %193, %194 : vector<128x16xf32>
    %196 = math.tanh %195 : vector<128x16xf32>
    %c16 = arith.constant 16 : index
    %c0_75 = arith.constant 0 : index
    %197 = vector.load %arg2[%c16, %c0_75] : memref<20x256xf32, #tpu.memory_space<vmem>>, vector<1x32xf32>
    %198 = arith.truncf %196 : vector<128x16xf32> to vector<128x16xbf16>
    %c416 = arith.constant 416 : index
    %c0_76 = arith.constant 0 : index
    %199 = vector.load %arg1[%c416, %c0_76] : memref<464x256xbf16, #tpu.memory_space<vmem>>, vector<16x32xbf16>
    %cst_77 = arith.constant dense<0.000000e+00> : vector<128x32xf32>
    %200 = tpu.matmul %198, %199, %cst_77 {dimension_numbers = #tpu.dot_dimension_numbers<[1], [0], [0], [1], [0, 0, 1, 1], [], []>} : vector<128x16xbf16>, vector<16x32xbf16>, vector<128x32xf32> -> vector<128x32xf32>
    %201 = vector.broadcast %197 : vector<1x32xf32> to vector<128x32xf32>
    %202 = arith.addf %200, %201 : vector<128x32xf32>
    %c17 = arith.constant 17 : index
    %c0_78 = arith.constant 0 : index
    %203 = vector.load %arg2[%c17, %c0_78] : memref<20x256xf32, #tpu.memory_space<vmem>>, vector<1x32xf32>
    %c18 = arith.constant 18 : index
    %c0_79 = arith.constant 0 : index
    %204 = vector.load %arg2[%c18, %c0_79] : memref<20x256xf32, #tpu.memory_space<vmem>>, vector<1x32xf32>
    %cst_80 = arith.constant dense<0.000000e+00> : vector<32xf32>
    %205 = vector.multi_reduction <add>, %202, %cst_80 [0] : vector<128x32xf32> to vector<32xf32>
    %206 = vector.shape_cast %205 : vector<32xf32> to vector<1x32xf32>
    %cst_81 = arith.constant 1.280000e+02 : f32
    %207 = vector.broadcast %cst_81 : f32 to vector<1x32xf32>
    %208 = arith.divf %206, %207 : vector<1x32xf32>
    %209 = vector.broadcast %208 : vector<1x32xf32> to vector<128x32xf32>
    %210 = arith.subf %202, %209 : vector<128x32xf32>
    %211 = arith.mulf %210, %210 : vector<128x32xf32>
    %cst_82 = arith.constant dense<0.000000e+00> : vector<32xf32>
    %212 = vector.multi_reduction <add>, %211, %cst_82 [0] : vector<128x32xf32> to vector<32xf32>
    %213 = vector.shape_cast %212 : vector<32xf32> to vector<1x32xf32>
    %cst_83 = arith.constant 1.280000e+02 : f32
    %214 = vector.broadcast %cst_83 : f32 to vector<1x32xf32>
    %215 = arith.divf %213, %214 : vector<1x32xf32>
    %216 = vector.broadcast %208 : vector<1x32xf32> to vector<128x32xf32>
    %217 = arith.subf %202, %216 : vector<128x32xf32>
    %cst_84 = arith.constant 9.99999974E-6 : f32
    %218 = vector.broadcast %cst_84 : f32 to vector<1x32xf32>
    %219 = arith.addf %215, %218 : vector<1x32xf32>
    %220 = math.rsqrt %219 : vector<1x32xf32>
    %221 = vector.broadcast %220 : vector<1x32xf32> to vector<128x32xf32>
    %222 = arith.mulf %217, %221 : vector<128x32xf32>
    %223 = vector.broadcast %203 : vector<1x32xf32> to vector<128x32xf32>
    %224 = arith.mulf %222, %223 : vector<128x32xf32>
    %225 = vector.broadcast %204 : vector<1x32xf32> to vector<128x32xf32>
    %226 = arith.addf %224, %225 : vector<128x32xf32>
    %227 = math.tanh %226 : vector<128x32xf32>
    %c19 = arith.constant 19 : index
    %c0_85 = arith.constant 0 : index
    %228 = vector.load %arg2[%c19, %c0_85] : memref<20x256xf32, #tpu.memory_space<vmem>>, vector<1x192xf32>
    %229 = arith.truncf %227 : vector<128x32xf32> to vector<128x32xbf16>
    %c432 = arith.constant 432 : index
    %c0_86 = arith.constant 0 : index
    %230 = vector.load %arg1[%c432, %c0_86] : memref<464x256xbf16, #tpu.memory_space<vmem>>, vector<32x192xbf16>
    %cst_87 = arith.constant dense<0.000000e+00> : vector<128x192xf32>
    %231 = tpu.matmul %229, %230, %cst_87 {dimension_numbers = #tpu.dot_dimension_numbers<[1], [0], [0], [1], [0, 0, 1, 1], [], []>} : vector<128x32xbf16>, vector<32x192xbf16>, vector<128x192xf32> -> vector<128x192xf32>
    %232 = vector.broadcast %228 : vector<1x192xf32> to vector<128x192xf32>
    %233 = arith.addf %231, %232 : vector<128x192xf32>
    %234 = arith.subf %233, %0 : vector<128x192xf32>
    %235 = arith.mulf %234, %234 : vector<128x192xf32>
    %236 = vector.shape_cast %235 : vector<128x192xf32> to vector<1x128x192xf32>
    %cst_88 = arith.constant dense<0.000000e+00> : vector<1xf32>
    %237 = vector.multi_reduction <add>, %236, %cst_88 [1, 2] : vector<1x128x192xf32> to vector<1xf32>
    %238 = vector.shape_cast %237 : vector<1xf32> to vector<1x1x1xf32>
    %239 = vector.extract %238[0, 0, 0] : f32 from vector<1x1x1xf32>
    %cst_89 = arith.constant 4.06901054E-5 : f32
    %240 = arith.mulf %239, %cst_89 : f32
    %c0_90 = arith.constant 0 : index
    %c0_91 = arith.constant 0 : index
    %241 = memref.load %arg3[%c0_90, %c0_91] : memref<1x1xf32, #tpu.memory_space<smem>>
    %242 = arith.addf %241, %240 : f32
    %243 = arith.addf %242, %142 : f32
    %c0_92 = arith.constant 0 : index
    %c0_93 = arith.constant 0 : index
    %244 = memref.load %arg5[%c0_92, %c0_93] : memref<1x1xf32, #tpu.memory_space<smem>>
    memref.store %243, %arg5[%c0_92, %c0_93] : memref<1x1xf32, #tpu.memory_space<smem>>
    return
  }
}

</mosaic_0001>

<bundles_post_ra>
// kernel: tpu_custom_call.1
= control target key start
LH: loop header
LB: loop body
LE: loop exit
PB: predicated region body
PF: predicated region fallthrough
CT: control target
= control target key end

     0   :  { %12 = vsyncpa [#allocation4], 0  ;;  %s6513_s0 = inlined_call_operand.vmem [shape: f32[128,192], index: 0, kind: input, shape index: {}]   ;;  %s6514_s1 = inlined_call_operand.hbm [shape: bf16[464,256], index: 1, kind: input, shape index: {}]   ;;  %s6515_s2 = inlined_call_operand.vmem [shape: f32[20,256], index: 2, kind: input, shape index: {}]   ;;  %s6516_s3 = inlined_call_operand.<no memory space> [shape: f32[1,1], index: 3, kind: input, shape index: {}]   ;;  %s6517_s4 = inlined_call_operand.hbm [shape: s32[1,128], index: 4, kind: output, shape index: {0}]   ;;  %s6518_s5 = inlined_call_operand.hbm [shape: f32[1,1], index: 5, kind: output, shape index: {1}]  }
   0x1   :  { %13 = vsyncpa [#allocation5], 0 }
   0x2   :  { %14 = vsyncpa [#allocation6], 0  ;;  %s4528_s18 = smov [#allocation3]  }
   0x3   :  { %s22_s19 = sshll.u32 %s4528_s18, 4  ;;  %s23_s19 = int_to_ptr.vmem [resolvable:$true] %s22_s19 }
   0x4   :  { %s4482_s20 = scalar_lea.vmem %s23_s19, 7424  ;;  %p4487_p1 = scmp.lt.s32.totalorder %s23_s19, %s23_s19 }
   0x5   :  { %p4483_p0 = scmp.ne.s32.totalorder %s23_s19, %s4482_s20  ;;  %p4488_p2 = scmp.lt.s32.totalorder %s4482_s20, %s4482_s20 }
   0x7   :  { %p4489_p3 = por %p4488_p2, %p4487_p1 }
   0x9   :  { %p4490_p4 = pnand %p4489_p3, %p4483_p0 }
   0xb   :  { %4493 = shalt.err (!%p4490_p4)
}
   0xc   :  { %s4529_s21 = smov 128   ;;  %s4530_s22 = smov 8  }
   0xd   :  { %28 = dma.hbm_to_vmem [thread:$0]  %s6514_s1, 7424, %s23_s19, [#allocation4], %s4529_s21, %s4529_s21, %s4530_s22  }
   0xe   :  { %4522 = dma.done.wait [#allocation4], 7424  }
   0xf   :  { %4523 = vsyncadd [#allocation4], 4294959872  ;;  %v4531_v0 = vmov 0   ;;  %v4276_v1 = vld [vmem:[#allocation3 + $0x70] ss:$8 sps:$4 sm:$0xff]   ;;  %v38_v5 = vld [vmem:[%s6513_s0 + $0x8] sm:$0xff] }
  0x10   :  { %207 = vmatprep.subr.bf16.mxu0 %v4531_v0  ;;  %v4277_v2 = vld [vmem:[#allocation3 + $0x60] ss:$8 sps:$4 sm:$0xff]   ;;  %v4278_v3 = vld [vmem:[#allocation3 + $0x50] ss:$8 sps:$4 sm:$0xff]   ;;  %vm182_vm0 = vcmask 523264   ;;  %vm306_vm1 = vcmask 261120  }
  0x11   :  { %208 = vmatpush1.bf16.msra.mxu0 %v4276_v1  ;;  %v4279_v4 = vld [vmem:[#allocation3 + $0x40] ss:$8 sps:$4 sm:$0xff]   ;;  %v40_v6 = vld [vmem:[%s6513_s0 + $0x18] sm:$0xff]  ;;  %v39_v17 = vld [vmem:[%s6513_s0 + $0x10] sm:$0xff]  ;;  %vm630_vm2 = vcmask 130048   ;;  %vm1153_vm3 = vcmask 1043456  }
  0x12   :  { %209 = vmatprep.subr.bf16.mxu0 %v4531_v0  ;;  %v71_v7 = vpack.c.bf16 %v40_v6, %v38_v5  ;;  %v4280_v8 = vld [vmem:[#allocation3 + $0x30] ss:$8 sps:$4 sm:$0xff]   ;;  %v4281_v9 = vld [vmem:[#allocation3 + $0x20] ss:$8 sps:$4 sm:$0xff]   ;;  %vm945_vm4 = vcmask 64512   ;;  %s4534_s8 = smov [#allocation7]  }
  0x13   :  { %v4282_v10 = vld [vmem:[#allocation3 + $0x10] ss:$8 sps:$4 sm:$0xff]   ;;  %v4283_v11 = vld [vmem:[#allocation3] ss:$8 sps:$4 sm:$0xff]   ;;  %s3713_s9 = sshll.u32 %s4534_s8, 4  ;;  %s3714_s9 = int_to_ptr.vmem [resolvable:$true] %s3713_s9 }
  0x14   :  { %3747 = vmatprep.mubr.msk.bf16.mxu0 %vm182_vm0, %v71_v7  ;;  %v4284_v12 = vld [vmem:[#allocation3 + $0xb0] ss:$8 sps:$4 sm:$0xff]   ;;  %v4285_v13 = vld [vmem:[#allocation3 + $0xa0] ss:$8 sps:$4 sm:$0xff]   ;;  %s4494_s10 = scalar_lea.vmem %s3714_s9, 16  ;;  %s4498_s11 = scalar_lea.vmem %s3714_s9, 32 }
  0x15   :  { %210 = vmatpush1.bf16.msra.mxu0 %v4277_v2  ;;  %v4286_v14 = vld [vmem:[#allocation3 + $0x90] ss:$8 sps:$4 sm:$0xff]   ;;  %v4287_v15 = vld [vmem:[#allocation3 + $0x80] ss:$8 sps:$4 sm:$0xff]   ;;  %p4495_p5 = scmp.ne.s32.totalorder %s3714_s9, %s4494_s10  ;;  %p4499_p6 = scmp.lt.s32.totalorder %s3714_s9, %s3714_s9 }
  0x16   :  { %211 = vmatprep.subr.bf16.mxu0 %v4531_v0  ;;  %v37_v16 = vld [vmem:[%s6513_s0] sm:$0xff]  ;;  %v42_v18 = vld [vmem:[%s6513_s0 + $0x28] sm:$0xff]  ;;  %v44_v19 = vld [vmem:[%s6513_s0 + $0x38] sm:$0xff]  ;;  %p4500_p7 = scmp.lt.s32.totalorder %s4498_s11, %s4494_s10 }
  0x17   :  { %v70_v20 = vpack.c.bf16 %v39_v17, %v37_v16  ;;  %v73_v21 = vpack.c.bf16 %v44_v19, %v42_v18  ;;  %v41_v22 = vld [vmem:[%s6513_s0 + $0x20] sm:$0xff]  ;;  %v43_v23 = vld [vmem:[%s6513_s0 + $0x30] sm:$0xff]  ;;  %v46_v24 = vld [vmem:[%s6513_s0 + $0x48] sm:$0xff] }
  0x18   :  { %v48_v25 = vld [vmem:[%s6513_s0 + $0x58] sm:$0xff]  ;;  %v72_v26 = vpack.c.bf16 %v43_v23, %v41_v22  ;;  %v45_v28 = vld [vmem:[%s6513_s0 + $0x40] sm:$0xff]  ;;  %v47_v29 = vld [vmem:[%s6513_s0 + $0x50] sm:$0xff]  ;;  %p4501_p8 = por %p4500_p7, %p4499_p6 }
  0x19   :  { %212 = vmatpush1.bf16.msra.mxu0 %v4278_v3  ;;  %v75_v27 = vpack.c.bf16 %v48_v25, %v46_v24  ;;  %v50_v30 = vld [vmem:[%s6513_s0 + $0x68] sm:$0xff]  ;;  %v52_v31 = vld [vmem:[%s6513_s0 + $0x78] sm:$0xff]  ;;  %v74_v32 = vpack.c.bf16 %v47_v29, %v45_v28  ;;  %v49_v34 = vld [vmem:[%s6513_s0 + $0x60] sm:$0xff] }
  0x1a   :  { %213 = vmatprep.subr.bf16.mxu0 %v4531_v0  ;;  %v77_v33 = vpack.c.bf16 %v52_v31, %v50_v30  ;;  %v51_v35 = vld [vmem:[%s6513_s0 + $0x70] sm:$0xff]  ;;  %v54_v36 = vld [vmem:[%s6513_s0 + $0x88] sm:$0xff]  ;;  %v56_v37 = vld [vmem:[%s6513_s0 + $0x98] sm:$0xff]  ;;  %p4502_p9 = pnand %p4501_p8, %p4495_p5 }
  0x1b   :  { %v76_v38 = vpack.c.bf16 %v51_v35, %v49_v34  ;;  %v79_v39 = vpack.c.bf16 %v56_v37, %v54_v36  ;;  %v53_v40 = vld [vmem:[%s6513_s0 + $0x80] sm:$0xff]  ;;  %v55_v41 = vld [vmem:[%s6513_s0 + $0x90] sm:$0xff]  ;;  %v58_v42 = vld [vmem:[%s6513_s0 + $0xa8] sm:$0xff] }
  0x1c   :  { %v60_v43 = vld [vmem:[%s6513_s0 + $0xb8] sm:$0xff]  ;;  %v78_v44 = vpack.c.bf16 %v55_v41, %v53_v40  ;;  %v57_v46 = vld [vmem:[%s6513_s0 + $0xa0] sm:$0xff]  ;;  %v59_v47 = vld [vmem:[%s6513_s0 + $0xb0] sm:$0xff] }
  0x1d   :  { %214 = vmatpush1.bf16.msra.mxu0 %v4279_v4  ;;  %v81_v45 = vpack.c.bf16 %v60_v43, %v58_v42  ;;  %v62_v48 = vld [vmem:[%s6513_s0 + $0xc8] sm:$0xff]  ;;  %v64_v49 = vld [vmem:[%s6513_s0 + $0xd8] sm:$0xff]  ;;  %v80_v50 = vpack.c.bf16 %v59_v47, %v57_v46  ;;  %v61_v52 = vld [vmem:[%s6513_s0 + $0xc0] sm:$0xff] }
  0x1e   :  { %215 = vmatprep.subr.bf16.mxu0 %v4531_v0  ;;  %v83_v51 = vpack.c.bf16 %v64_v49, %v62_v48  ;;  %v63_v53 = vld [vmem:[%s6513_s0 + $0xd0] sm:$0xff]  ;;  %v66_v54 = vld [vmem:[%s6513_s0 + $0xe8] sm:$0xff]  ;;  %v68_v55 = vld [vmem:[%s6513_s0 + $0xf8] sm:$0xff] }
  0x1f   :  { %v82_v56 = vpack.c.bf16 %v63_v53, %v61_v52  ;;  %v85_v57 = vpack.c.bf16 %v68_v55, %v66_v54  ;;  %v65_v58 = vld [vmem:[%s6513_s0 + $0xe0] sm:$0xff]  ;;  %v67_v59 = vld [vmem:[%s6513_s0 + $0xf0] sm:$0xff] }
  0x20   :  { %v84_v60 = vpack.c.bf16 %v67_v59, %v65_v58 }
  0x21   :  { %216 = vmatpush1.bf16.msra.mxu0 %v4280_v8 }
  0x22   :  { %217 = vmatprep.subr.bf16.mxu0 %v4531_v0 }
  0x25   :  { %218 = vmatpush1.bf16.msra.mxu0 %v4281_v9 }
  0x26   :  { %219 = vmatprep.subr.bf16.mxu0 %v4531_v0 }
  0x29   :  { %220 = vmatpush1.bf16.msra.mxu0 %v4282_v10 }
  0x2a   :  { %221 = vmatprep.subr.bf16.mxu0 %v4531_v0 }
  0x2d   :  { %222 = vmatpush1.bf16.msra.mxu0 %v4283_v11 }
  0x2e   :  { %231 = vmatprep.subr.bf16.mxu0 %v4531_v0 }
  0x31   :  { %232 = vmatpush2.bf16.msra.mxu0 %v4284_v12  ;;  %v4688_v12 = vld [vmem:[%s6515_s2] ss:$0 sm:$0xff] }
  0x32   :  { %233 = vmatprep.subr.bf16.mxu0 %v4531_v0 }
  0x35   :  { %234 = vmatpush2.bf16.msra.mxu0 %v4285_v13 }
  0x36   :  { %235 = vmatprep.subr.bf16.mxu0 %v4531_v0 }
  0x39   :  { %236 = vmatpush2.bf16.msra.mxu0 %v4286_v14  ;;  %v4288_v14 = vld [vmem:[#allocation3 + $0xd0] ss:$8 sps:$4 sm:$0xff]  }
  0x3a   :  { %237 = vmatprep.subr.bf16.mxu0 %v4531_v0  ;;  %4253 = vmatprep.subr.bf16.mxu1 %v4288_v14 }
  0x3b   :  { %4255 = vmatpush3.bf16.msra.mxu1 %v4288_v14 }
  0x3d   :  { %238 = vmatpush2.bf16.msra.mxu0 %v4287_v15  ;;  %v4289_v15 = vld [vmem:[#allocation3 + $0xc0] ss:$8 sps:$4 sm:$0xff]  }
  0x3e   :  { %4011 = vmatprep.subr.bf16.mxu0 %v4288_v14  ;;  %4254 = vmatprep.subr.bf16.mxu1 %v4289_v15 }
  0x3f   :  { %4256 = vmatpush3.bf16.msra.mxu1 %v4289_v15 }
  0x40   :  { %240 = vmatmul.mubr.bf16.vlgmr.msra.gmra.mxu0 %v70_v20 }
  0x41   :  { %3748 = vmatprep.mubr.msk.bf16.mxu0 %vm182_vm0, %v73_v21  ;;  %4012 = vmatpush3.bf16.msra.mxu0 %v4288_v14 }
  0x42   :  { %4013 = vmatprep.subr.bf16.mxu0 %v4289_v15 }
  0x45   :  { %4014 = vmatpush3.bf16.msra.mxu0 %v4289_v15 }
  0x48   :  { %248 = vmatmul.mubr.bf16.gmra.mxu0 %v72_v26 }
  0x49   :  { %3749 = vmatprep.mubr.msk.bf16.mxu0 %vm182_vm0, %v75_v27 }
  0x50   :  { %256 = vmatmul.mubr.bf16.gmra.mxu0 %v74_v32 }
  0x51   :  { %3750 = vmatprep.mubr.msk.bf16.mxu0 %vm182_vm0, %v77_v33 }
  0x58   :  { %264 = vmatmul.mubr.bf16.gmra.mxu0 %v76_v38 }
  0x59   :  { %3751 = vmatprep.mubr.msk.bf16.mxu0 %vm182_vm0, %v79_v39 }
  0x60   :  { %272 = vmatmul.mubr.bf16.gmra.mxu0 %v78_v44 }
  0x61   :  { %3752 = vmatprep.mubr.msk.bf16.mxu0 %vm182_vm0, %v81_v45 }
  0x68   :  { %280 = vmatmul.mubr.bf16.gmra.mxu0 %v80_v50 }
  0x69   :  { %3753 = vmatprep.mubr.msk.bf16.mxu0 %vm182_vm0, %v83_v51 }
  0x70   :  { %288 = vmatmul.mubr.bf16.gmra.mxu0 %v82_v56 }
  0x71   :  { %3754 = vmatprep.mubr.msk.bf16.mxu0 %vm182_vm0, %v85_v57 }
  0x78   :  { %296 = vmatmul.mubr.bf16.gmra.mxu0 %v84_v60 }
 0x100   :  { %v241_v61 = vpop.f32.mrf.mxu0 }
 0x101   :  { %v4694_v18 = vadd.f32 %v241_v61, %v4688_v12 }
 0x102   :  { %v243_v62 = vpop.f32.mrf.mxu0 }
 0x103   :  { %v307_v24 = vsel %vm306_vm1, %v4694_v18, 0.0 }
 0x104   :  { %v244_v63 = vpop.f32.mrf.mxu0 }
 0x105   :  { %v4691_v16 = vadd.f32 %v244_v63, %v4688_v12 }
 0x106   :  { %v246_v1 = vpop.f32.mrf.mxu0 }
 0x107   :  { %v308_v21 = vsel %vm306_vm1, %v4691_v16, 0.0 }
 0x108   :  { %v249_v2 = vpop.f32.mrf.mxu0  ;;  %v309_v27 = vadd.f32 %v308_v21, %v307_v24 }
 0x109   :  { %v4697_v19 = vadd.f32 %v249_v2, %v4688_v12 }
 0x10a   :  { %v251_v3 = vpop.f32.mrf.mxu0 }
 0x10b   :  { %v310_v25 = vsel %vm306_vm1, %v4697_v19, 0.0 }
 0x10c   :  { %v252_v4 = vpop.f32.mrf.mxu0  ;;  %v311_v31 = vadd.f32 %v310_v25, %v309_v27 }
 0x10d   :  { %v4702_v22 = vadd.f32 %v252_v4, %v4688_v12 }
 0x10e   :  { %v254_v5 = vpop.f32.mrf.mxu0 }
 0x10f   :  { %v312_v29 = vsel %vm306_vm1, %v4702_v22, 0.0 }
 0x110   :  { %v257_v6 = vpop.f32.mrf.mxu0  ;;  %v313_v35 = vadd.f32 %v312_v29, %v311_v31 }
 0x111   :  { %v4709_v26 = vadd.f32 %v257_v6, %v4688_v12 }
 0x112   :  { %v259_v7 = vpop.f32.mrf.mxu0 }
 0x113   :  { %v314_v33 = vsel %vm306_vm1, %v4709_v26, 0.0 }
 0x114   :  { %v260_v8 = vpop.f32.mrf.mxu0  ;;  %v315_v39 = vadd.f32 %v314_v33, %v313_v35 }
 0x115   :  { %v4714_v30 = vadd.f32 %v260_v8, %v4688_v12 }
 0x116   :  { %v262_v9 = vpop.f32.mrf.mxu0 }
 0x117   :  { %v316_v37 = vsel %vm306_vm1, %v4714_v30, 0.0 }
 0x118   :  { %v265_v10 = vpop.f32.mrf.mxu0  ;;  %v317_v43 = vadd.f32 %v316_v37, %v315_v39 }
 0x119   :  { %v4719_v34 = vadd.f32 %v265_v10, %v4688_v12 }
 0x11a   :  { %v267_v11 = vpop.f32.mrf.mxu0 }
 0x11b   :  { %v318_v41 = vsel %vm306_vm1, %v4719_v34, 0.0 }
 0x11c   :  { %v268_v13 = vpop.f32.mrf.mxu0  ;;  %v319_v47 = vadd.f32 %v318_v41, %v317_v43 }
 0x11d   :  { %v4724_v38 = vadd.f32 %v268_v13, %v4688_v12 }
 0x11e   :  { %v270_v17 = vpop.f32.mrf.mxu0 }
 0x11f   :  { %v320_v45 = vsel %vm306_vm1, %v4724_v38, 0.0 }
 0x120   :  { %v273_v20 = vpop.f32.mrf.mxu0  ;;  %v321_v51 = vadd.f32 %v320_v45, %v319_v47 }
 0x121   :  { %v4729_v42 = vadd.f32 %v273_v20, %v4688_v12 }
 0x122   :  { %v275_v23 = vpop.f32.mrf.mxu0 }
 0x123   :  { %v322_v49 = vsel %vm306_vm1, %v4729_v42, 0.0 }
 0x124   :  { %v276_v28 = vpop.f32.mrf.mxu0  ;;  %v323_v55 = vadd.f32 %v322_v49, %v321_v51 }
 0x125   :  { %v4734_v46 = vadd.f32 %v276_v28, %v4688_v12 }
 0x126   :  { %v278_v32 = vpop.f32.mrf.mxu0 }
 0x127   :  { %v324_v53 = vsel %vm306_vm1, %v4734_v46, 0.0 }
 0x128   :  { %v281_v36 = vpop.f32.mrf.mxu0  ;;  %v325_v59 = vadd.f32 %v324_v53, %v323_v55 }
 0x129   :  { %v4739_v50 = vadd.f32 %v281_v36, %v4688_v12 }
 0x12a   :  { %v283_v40 = vpop.f32.mrf.mxu0 }
 0x12b   :  { %v326_v57 = vsel %vm306_vm1, %v4739_v50, 0.0 }
 0x12c   :  { %v284_v44 = vpop.f32.mrf.mxu0  ;;  %v327_v63 = vadd.f32 %v326_v57, %v325_v59 }
 0x12d   :  { %v4744_v54 = vadd.f32 %v284_v44, %v4688_v12 }
 0x12e   :  { %v286_v48 = vpop.f32.mrf.mxu0 }
 0x12f   :  { %v328_v61 = vsel %vm306_vm1, %v4744_v54, 0.0 }
 0x130   :  { %v289_v52 = vpop.f32.mrf.mxu0  ;;  %v329_v3 = vadd.f32 %v328_v61, %v327_v63 }
 0x131   :  { %v4749_v58 = vadd.f32 %v289_v52, %v4688_v12 }
 0x132   :  { %v291_v56 = vpop.f32.mrf.mxu0 }
 0x133   :  { %v330_v2 = vsel %vm306_vm1, %v4749_v58, 0.0 }
 0x134   :  { %v292_v60 = vpop.f32.mrf.mxu0  ;;  %v331_v7 = vadd.f32 %v330_v2, %v329_v3 }
 0x135   :  { %v4754_v62 = vadd.f32 %v292_v60, %v4688_v12 }
 0x136   :  { %v294_v1 = vpop.f32.mrf.mxu0 }
 0x137   :  { %v332_v5 = vsel %vm306_vm1, %v4754_v62, 0.0 }
 0x138   :  { %v297_v4 = vpop.f32.mrf.mxu0  ;;  %v333_v10 = vadd.f32 %v332_v5, %v331_v7 }
 0x139   :  { %v4761_v6 = vadd.f32 %v297_v4, %v4688_v12 }
 0x13a   :  { %v299_v8 = vpop.f32.mrf.mxu0 }
 0x13b   :  { %v334_v9 = vsel %vm306_vm1, %v4761_v6, 0.0 }
 0x13c   :  { %v300_v11 = vpop.f32.mrf.mxu0  ;;  %v335_v14 = vadd.f32 %v334_v9, %v333_v10 }
 0x13d   :  { %v301_v13 = vadd.f32 %v300_v11, %v4688_v12 }
 0x13e   :  { %v302_v15 = vpop.f32.mrf.mxu0 }
 0x13f   :  { %v336_v17 = vsel %vm306_vm1, %v301_v13, 0.0 }
 0x140   :  { %v337_v20 = vadd.f32 %v336_v17, %v335_v14 }
 0x142   :  { %v338_v21 = vrot.slane %v337_v20, 4 }
 0x144   :  { %v339_v23 = vadd.f32 %v338_v21, %v337_v20 }
 0x146   :  { %v340_v24 = vrot.slane %v339_v23, 2 }
 0x148   :  { %v341_v25 = vadd.f32 %v340_v24, %v339_v23 }
 0x14a   :  { %v342_v27 = vrot.slane %v341_v25, 1 }
 0x14c   :  { %v343_v28 = vadd.f32 %v342_v27, %v341_v25 }
 0x14e   :  { %v345_v29 = vmul.f32 0.0078125, %v343_v28 }
 0x150   :  { %v4768_v31 = vsub.f32 %v4694_v18, %v345_v29  ;;  %v4771_v32 = vsub.f32 %v4691_v16, %v345_v29  ;;  %v4774_v12 = vsub.f32 %v4697_v19, %v345_v29  ;;  %v4777_v33 = vsub.f32 %v4702_v22, %v345_v29 }
 0x151   :  { %v4784_v37 = vsub.f32 %v4709_v26, %v345_v29  ;;  %v4789_v16 = vsub.f32 %v4714_v30, %v345_v29  ;;  %v4796_v41 = vsub.f32 %v4719_v34, %v345_v29  ;;  %v4802_v30 = vsub.f32 %v4724_v38, %v345_v29 }
 0x152   :  { %v362_v35 = vmul.f32 %v4768_v31, %v4768_v31  ;;  %v363_v36 = vmul.f32 %v4771_v32, %v4771_v32  ;;  %v364_v18 = vmul.f32 %v4774_v12, %v4774_v12  ;;  %v365_v19 = vmul.f32 %v4777_v33, %v4777_v33 }
 0x153   :  { %v366_v26 = vmul.f32 %v4784_v37, %v4784_v37  ;;  %v367_v45 = vmul.f32 %v4789_v16, %v4789_v16  ;;  %v4808_v49 = vsub.f32 %v4729_v42, %v345_v29  ;;  %v368_v34 = vmul.f32 %v4796_v41, %v4796_v41 }
 0x154   :  { %v378_v22 = vsel %vm306_vm1, %v362_v35, 0.0  ;;  %v379_v39 = vsel %vm306_vm1, %v363_v36, 0.0  ;;  %v381_v43 = vsel %vm306_vm1, %v364_v18, 0.0  ;;  %v383_v47 = vsel %vm306_vm1, %v365_v19, 0.0 }
 0x155   :  { %v380_v40 = vadd.f32 %v379_v39, %v378_v22  ;;  %v385_v51 = vsel %vm306_vm1, %v366_v26, 0.0  ;;  %v4814_v53 = vsub.f32 %v4734_v46, %v345_v29  ;;  %v369_v38 = vmul.f32 %v4802_v30, %v4802_v30 }
 0x156   :  { %v387_v55 = vsel %vm306_vm1, %v367_v45, 0.0  ;;  %v356_v57 = vsub.f32 %v4739_v50, %v345_v29  ;;  %v370_v42 = vmul.f32 %v4808_v49, %v4808_v49  ;;  %v389_v59 = vsel %vm306_vm1, %v368_v34, 0.0 }
 0x157   :  { %v382_v44 = vadd.f32 %v381_v43, %v380_v40  ;;  %v357_v61 = vsub.f32 %v4744_v54, %v345_v29  ;;  %v371_v46 = vmul.f32 %v4814_v53, %v4814_v53  ;;  %v391_v63 = vsel %vm306_vm1, %v369_v38, 0.0 }
 0x158   :  { %v358_v2 = vsub.f32 %v4749_v58, %v345_v29  ;;  %v372_v3 = vmul.f32 %v356_v57, %v356_v57  ;;  %v393_v4 = vsel %vm306_vm1, %v370_v42, 0.0  ;;  %v359_v5 = vsub.f32 %v4754_v62, %v345_v29 }
 0x159   :  { %v384_v48 = vadd.f32 %v383_v47, %v382_v44  ;;  %v373_v7 = vmul.f32 %v357_v61, %v357_v61  ;;  %v395_v8 = vsel %vm306_vm1, %v371_v46, 0.0  ;;  %v360_v54 = vsub.f32 %v4761_v6, %v345_v29  ;;  %v304_v44 = vld [vmem:[%s6515_s2 + $0x1] ss:$0 sm:$0xff] }
 0x15a   :  { %v374_v10 = vmul.f32 %v358_v2, %v358_v2  ;;  %v397_v11 = vsel %vm306_vm1, %v372_v3, 0.0  ;;  %v361_v15 = vsub.f32 %v301_v13, %v345_v29  ;;  %v375_v17 = vmul.f32 %v359_v5, %v359_v5 }
 0x15b   :  { %v386_v52 = vadd.f32 %v385_v51, %v384_v48  ;;  %v399_v58 = vsel %vm306_vm1, %v373_v7, 0.0  ;;  %v376_v21 = vmul.f32 %v360_v54, %v360_v54  ;;  %v305_v51 = vld [vmem:[%s6515_s2 + $0x2] ss:$0 sm:$0xff] }
 0x15c   :  { %v401_v23 = vsel %vm306_vm1, %v374_v10, 0.0  ;;  %v377_v62 = vmul.f32 %v361_v15, %v361_v15  ;;  %v403_v25 = vsel %vm306_vm1, %v375_v17, 0.0 }
 0x15d   :  { %v388_v56 = vadd.f32 %v387_v55, %v386_v52  ;;  %v405_v28 = vsel %vm306_vm1, %v376_v21, 0.0 }
 0x15e   :  { %v407_v35 = vsel %vm306_vm1, %v377_v62, 0.0 }
 0x15f   :  { %v390_v60 = vadd.f32 %v389_v59, %v388_v56 }
 0x161   :  { %v392_v1 = vadd.f32 %v391_v63, %v390_v60 }
 0x163   :  { %v394_v50 = vadd.f32 %v393_v4, %v392_v1 }
 0x165   :  { %v396_v9 = vadd.f32 %v395_v8, %v394_v50 }
 0x167   :  { %v398_v14 = vadd.f32 %v397_v11, %v396_v9 }
 0x169   :  { %v400_v20 = vadd.f32 %v399_v58, %v398_v14 }
 0x16b   :  { %v402_v24 = vadd.f32 %v401_v23, %v400_v20 }
 0x16d   :  { %v404_v27 = vadd.f32 %v403_v25, %v402_v24 }
 0x16f   :  { %v406_v6 = vadd.f32 %v405_v28, %v404_v27 }
 0x171   :  { %v408_v36 = vadd.f32 %v407_v35, %v406_v6 }
 0x173   :  { %v409_v18 = vrot.slane %v408_v36, 4 }
 0x175   :  { %v410_v13 = vadd.f32 %v409_v18, %v408_v36 }
 0x177   :  { %v411_v29 = vrot.slane %v410_v13, 2 }
 0x179   :  { %v412_v19 = vadd.f32 %v411_v29, %v410_v13 }
 0x17b   :  { %v413_v22 = vrot.slane %v412_v19, 1 }
 0x17d   :  { %v414_v39 = vadd.f32 %v413_v22, %v412_v19 }
 0x17f   :  { %v415_v40 = vmul.f32 0.0078125, %v414_v39 }
 0x181   :  { %v416_v26 = vadd.f32 1e-05, %v415_v40 }
 0x183   :  { %4304 = vrsqrt.f32 %v416_v26 }
 0x190   :  { %v4305_v43 = vpop.eup %4304 }
 0x191   :  { %v428_v45 = vmul.f32 %v4305_v43, %v356_v57  ;;  %v429_v47 = vmul.f32 %v4305_v43, %v357_v61  ;;  %v431_v48 = vmul.f32 %v4305_v43, %v359_v5  ;;  %v432_v34 = vmul.f32 %v4305_v43, %v360_v54 }
 0x192   :  { %v433_v52 = vmul.f32 %v4305_v43, %v361_v15  ;;  %v418_v38 = vmul.f32 %v4305_v43, %v4768_v31  ;;  %v419_v55 = vmul.f32 %v4305_v43, %v4771_v32  ;;  %v430_v56 = vmul.f32 %v4305_v43, %v358_v2 }
 0x193   :  { %v448_v42 = vmul.f32 %v432_v34, %v304_v44  ;;  %v447_v59 = vmul.f32 %v431_v48, %v304_v44  ;;  %v420_v60 = vmul.f32 %v4305_v43, %v4774_v12  ;;  %v421_v46 = vmul.f32 %v4305_v43, %v4777_v33 }
 0x194   :  { %v449_v57 = vmul.f32 %v433_v52, %v304_v44  ;;  %v434_v61 = vmul.f32 %v418_v38, %v304_v44  ;;  %v435_v63 = vmul.f32 %v419_v55, %v304_v44  ;;  %v446_v1 = vmul.f32 %v430_v56, %v304_v44 }
 0x195   :  { %v464_v3 = vadd.f32 %v448_v42, %v305_v51  ;;  %v463_v4 = vadd.f32 %v447_v59, %v305_v51  ;;  %v436_v50 = vmul.f32 %v420_v60, %v304_v44  ;;  %v437_v5 = vmul.f32 %v421_v46, %v304_v44  ;;  %v482_v46 = vld [vmem:[%s6515_s2 + $0x3] ss:$0 sm:$0xff] }
 0x196   :  { %v465_v7 = vadd.f32 %v449_v57, %v305_v51  ;;  %v450_v8 = vadd.f32 %v434_v61, %v305_v51  ;;  %v451_v31 = vadd.f32 %v435_v63, %v305_v51  ;;  %v462_v9 = vadd.f32 %v446_v1, %v305_v51  ;;  %v4290_v61 = vld [vmem:[#allocation3 + $0xe0] ss:$8 sps:$4 sm:$0xff]  }
 0x197   :  { %4306 = vtanh.f32 %v464_v3  ;;  %v452_v32 = vadd.f32 %v436_v50, %v305_v51  ;;  %v453_v2 = vadd.f32 %v437_v5, %v305_v51  ;;  %v422_v54 = vmul.f32 %v4305_v43, %v4784_v37  ;;  %4031 = vmatprep.subr.bf16.mxu1 %v4290_v61 }
 0x198   :  { %4308 = vtanh.f32 %v465_v7  ;;  %v423_v12 = vmul.f32 %v4305_v43, %v4789_v16  ;;  %v424_v33 = vmul.f32 %v4305_v43, %v4796_v41  ;;  %v425_v10 = vmul.f32 %v4305_v43, %v4802_v30 }
 0x199   :  { %4310 = vtanh.f32 %v450_v8  ;;  %v438_v11 = vmul.f32 %v422_v54, %v304_v44  ;;  %v426_v14 = vmul.f32 %v4305_v43, %v4808_v49  ;;  %v427_v15 = vmul.f32 %v4305_v43, %v4814_v53 }
 0x19a   :  { %4312 = vtanh.f32 %v451_v31  ;;  %v439_v17 = vmul.f32 %v423_v12, %v304_v44  ;;  %v440_v58 = vmul.f32 %v424_v33, %v304_v44  ;;  %v441_v20 = vmul.f32 %v425_v10, %v304_v44 }
 0x19b   :  { %4314 = vtanh.f32 %v462_v9  ;;  %v454_v21 = vadd.f32 %v438_v11, %v305_v51  ;;  %v442_v37 = vmul.f32 %v426_v14, %v304_v44  ;;  %v443_v16 = vmul.f32 %v427_v15, %v304_v44 }
 0x19c   :  { %4316 = vtanh.f32 %v463_v4  ;;  %v455_v23 = vadd.f32 %v439_v17, %v305_v51  ;;  %v456_v41 = vadd.f32 %v440_v58, %v305_v51  ;;  %v444_v24 = vmul.f32 %v428_v45, %v304_v44 }
 0x19d   :  { %4318 = vtanh.f32 %v452_v32  ;;  %v457_v30 = vadd.f32 %v441_v20, %v305_v51  ;;  %v445_v62 = vmul.f32 %v429_v47, %v304_v44  ;;  %v458_v49 = vadd.f32 %v442_v37, %v305_v51 }
 0x19e   :  { %4320 = vtanh.f32 %v453_v2  ;;  %v459_v53 = vadd.f32 %v443_v16, %v305_v51  ;;  %v460_v25 = vadd.f32 %v444_v24, %v305_v51 }
 0x19f   :  { %4322 = vtanh.f32 %v454_v21  ;;  %v461_v27 = vadd.f32 %v445_v62, %v305_v51 }
 0x1a0   :  { %4324 = vtanh.f32 %v455_v23 }
 0x1a1   :  { %4326 = vtanh.f32 %v456_v41 }
 0x1a2   :  { %4328 = vtanh.f32 %v457_v30 }
 0x1a3   :  { %4330 = vtanh.f32 %v458_v49 }
 0x1a4   :  { %v4307_v28 = vpop.eup %4306  ;;  %4332 = vtanh.f32 %v459_v53 }
 0x1a5   :  { %v4309_v6 = vpop.eup %4308  ;;  %4334 = vtanh.f32 %v460_v25 }
 0x1a6   :  { %v4311_v35 = vpop.eup %4310  ;;  %4336 = vtanh.f32 %v461_v27  ;;  %v490_v19 = vpack.c.bf16 %v4309_v6, %v4307_v28 }
 0x1a7   :  { %v4313_v36 = vpop.eup %4312 }
 0x1a8   :  { %v4315_v18 = vpop.eup %4314  ;;  %v483_v13 = vpack.c.bf16 %v4313_v36, %v4311_v35 }
 0x1a9   :  { %v4317_v29 = vpop.eup %4316 }
 0x1aa   :  { %v4319_v22 = vpop.eup %4318  ;;  %4015 = vmatprep.mubr.msk.bf16.mxu0 %vm306_vm1, %v483_v13  ;;  %v489_v39 = vpack.c.bf16 %v4317_v29, %v4315_v18 }
 0x1ab   :  { %v4321_v40 = vpop.eup %4320 }
 0x1ac   :  { %v4323_v26 = vpop.eup %4322  ;;  %4027 = vmatprep.mubr.msk.bf16.mxu1 %vm306_vm1, %v489_v39  ;;  %v484_v43 = vpack.c.bf16 %v4321_v40, %v4319_v22 }
 0x1ad   :  { %v4325_v44 = vpop.eup %4324  ;;  %4028 = vmatmul.mubr.msk.bf16.vlgmr.msra.gmra.mxu1 %vm306_vm1, %v490_v19 }
 0x1ae   :  { %v4327_v45 = vpop.eup %4326  ;;  %4016 = vmatmul.mubr.msk.bf16.vlgmr.msra.gmra.mxu0 %vm306_vm1, %v484_v43  ;;  %v485_v47 = vpack.c.bf16 %v4325_v44, %v4323_v26  ;;  %4032 = vmatpush3.bf16.msra.mxu1 %v4290_v61 }
 0x1af   :  { %v4329_v48 = vpop.eup %4328 }
 0x1b0   :  { %v4331_v34 = vpop.eup %4330  ;;  %4019 = vmatprep.mubr.msk.bf16.mxu0 %vm306_vm1, %v485_v47  ;;  %v486_v55 = vpack.c.bf16 %v4329_v48, %v4327_v45 }
 0x1b1   :  { %v4333_v51 = vpop.eup %4332 }
 0x1b2   :  { %v4335_v52 = vpop.eup %4334  ;;  %v487_v42 = vpack.c.bf16 %v4333_v51, %v4331_v34 }
 0x1b3   :  { %v4337_v38 = vpop.eup %4336 }
 0x1b4   :  { %v488_v56 = vpack.c.bf16 %v4337_v38, %v4335_v52 }
 0x1b6   :  { %4020 = vmatmul.mubr.msk.bf16.gmra.mxu0 %vm306_vm1, %v486_v55 }
 0x1b7   :  { %4023 = vmatprep.mubr.msk.bf16.mxu0 %vm306_vm1, %v487_v42 }
 0x1be   :  { %4024 = vmatmul.mubr.msk.bf16.gmra.mxu0 %vm306_vm1, %v488_v56 }
 0x26d   :  { %v4029_v10 = vpop.f32.mrf.mxu1 }
 0x26e   :  { %v4017_v59 = vpop.f32.mrf.mxu0  ;;  %v622_v48 = vadd.f32 %v4029_v10, %v482_v46 }
 0x26f   :  { %v4867_v3 = vadd.f32 %v4017_v59, %v482_v46  ;;  %v613_v16 = vpop.f32.mrf.mxu1 }
 0x270   :  { %v565_v60 = vpop.f32.mrf.mxu0  ;;  %v614_v40 = vadd.f32 %v613_v16, %v482_v46  ;;  %v658_v56 = vsel %vm630_vm2, %v622_v48, 0.0 }
 0x271   :  { %v4865_v63 = vadd.f32 %v565_v60, %v482_v46  ;;  %v634_v32 = vsel %vm630_vm2, %v4867_v3, 0.0  ;;  %v4030_v27 = vpop.f32.mrf.mxu1 }
 0x272   :  { %v4018_v57 = vpop.f32.mrf.mxu0  ;;  %v654_v34 = vsel %vm630_vm2, %v614_v40, 0.0  ;;  %v4890_v52 = vadd.f32 %v4030_v27, %v482_v46 }
 0x273   :  { %v631_v5 = vsel %vm630_vm2, %v4865_v63, 0.0  ;;  %v4873_v7 = vadd.f32 %v4018_v57, %v482_v46  ;;  %v616_v22 = vpop.f32.mrf.mxu1 }
 0x274   :  { %v568_v1 = vpop.f32.mrf.mxu0  ;;  %v617_v44 = vadd.f32 %v616_v22, %v482_v46  ;;  %v660_v59 = vsel %vm630_vm2, %v4890_v52, 0.0 }
 0x275   :  { %v4869_v4 = vadd.f32 %v568_v1, %v482_v46  ;;  %v636_v33 = vsel %vm630_vm2, %v4873_v7, 0.0 }
 0x276   :  { %v4021_v50 = vpop.f32.mrf.mxu0  ;;  %v656_v38 = vsel %vm630_vm2, %v617_v44, 0.0 }
 0x277   :  { %v632_v8 = vsel %vm630_vm2, %v4869_v4, 0.0  ;;  %v590_v15 = vadd.f32 %v4021_v50, %v482_v46 }
 0x278   :  { %v633_v31 = vadd.f32 %v632_v8, %v631_v5  ;;  %v581_v9 = vpop.f32.mrf.mxu0 }
 0x279   :  { %v582_v2 = vadd.f32 %v581_v9, %v482_v46  ;;  %v642_v30 = vsel %vm630_vm2, %v590_v15, 0.0 }
 0x27a   :  { %v635_v54 = vadd.f32 %v634_v32, %v633_v31  ;;  %v4022_v12 = vpop.f32.mrf.mxu0 }
 0x27b   :  { %v638_v17 = vsel %vm630_vm2, %v582_v2, 0.0  ;;  %v593_v37 = vadd.f32 %v4022_v12, %v482_v46 }
 0x27c   :  { %v637_v11 = vadd.f32 %v636_v33, %v635_v54  ;;  %v584_v14 = vpop.f32.mrf.mxu0 }
 0x27d   :  { %v585_v58 = vadd.f32 %v584_v14, %v482_v46  ;;  %v644_v25 = vsel %vm630_vm2, %v593_v37, 0.0 }
 0x27e   :  { %v639_v20 = vadd.f32 %v638_v17, %v637_v11  ;;  %v4025_v21 = vpop.f32.mrf.mxu0 }
 0x27f   :  { %v640_v23 = vsel %vm630_vm2, %v585_v58, 0.0  ;;  %v606_v35 = vadd.f32 %v4025_v21, %v482_v46 }
 0x280   :  { %v641_v41 = vadd.f32 %v640_v23, %v639_v20  ;;  %v597_v24 = vpop.f32.mrf.mxu0 }
 0x281   :  { %v598_v62 = vadd.f32 %v597_v24, %v482_v46  ;;  %v650_v26 = vsel %vm630_vm2, %v606_v35, 0.0 }
 0x282   :  { %v643_v49 = vadd.f32 %v642_v30, %v641_v41  ;;  %v4026_v53 = vpop.f32.mrf.mxu0 }
 0x283   :  { %v646_v36 = vsel %vm630_vm2, %v598_v62, 0.0  ;;  %v609_v29 = vadd.f32 %v4026_v53, %v482_v46 }
 0x284   :  { %v645_v28 = vadd.f32 %v644_v25, %v643_v49  ;;  %v600_v6 = vpop.f32.mrf.mxu0 }
 0x285   :  { %v601_v18 = vadd.f32 %v600_v6, %v482_v46  ;;  %v652_v45 = vsel %vm630_vm2, %v609_v29, 0.0 }
 0x286   :  { %v647_v13 = vadd.f32 %v646_v36, %v645_v28 }
 0x287   :  { %v648_v19 = vsel %vm630_vm2, %v601_v18, 0.0 }
 0x288   :  { %v649_v39 = vadd.f32 %v648_v19, %v647_v13 }
 0x28a   :  { %v651_v43 = vadd.f32 %v650_v26, %v649_v39 }
 0x28c   :  { %v653_v47 = vadd.f32 %v652_v45, %v651_v43 }
 0x28e   :  { %v655_v51 = vadd.f32 %v654_v34, %v653_v47 }
 0x290   :  { %v657_v55 = vadd.f32 %v656_v38, %v655_v51 }
 0x292   :  { %v659_v42 = vadd.f32 %v658_v56, %v657_v55 }
 0x294   :  { %v661_v60 = vadd.f32 %v660_v59, %v659_v42 }
 0x296   :  { %v662_v57 = vrot.slane %v661_v60, 4 }
 0x298   :  { %v663_v61 = vadd.f32 %v662_v57, %v661_v60 }
 0x29a   :  { %v664_v1 = vrot.slane %v663_v61, 2 }
 0x29c   :  { %v665_v50 = vadd.f32 %v664_v1, %v663_v61 }
 0x29e   :  { %v666_v5 = vrot.slane %v665_v50, 1 }
 0x2a0   :  { %v667_v8 = vadd.f32 %v666_v5, %v665_v50 }
 0x2a2   :  { %v668_v31 = vmul.f32 0.0078125, %v667_v8 }
 0x2a4   :  { %v4897_v46 = vsub.f32 %v4865_v63, %v668_v31  ;;  %v4900_v9 = vsub.f32 %v4869_v4, %v668_v31  ;;  %v4903_v32 = vsub.f32 %v4867_v3, %v668_v31  ;;  %v4906_v54 = vsub.f32 %v4873_v7, %v668_v31 }
 0x2a5   :  { %v4912_v10 = vsub.f32 %v582_v2, %v668_v31  ;;  %v4916_v11 = vsub.f32 %v585_v58, %v668_v31  ;;  %v4922_v17 = vsub.f32 %v590_v15, %v668_v31  ;;  %v4927_v23 = vsub.f32 %v593_v37, %v668_v31 }
 0x2a6   :  { %v685_v12 = vmul.f32 %v4897_v46, %v4897_v46  ;;  %v686_v33 = vmul.f32 %v4900_v9, %v4900_v9  ;;  %v687_v63 = vmul.f32 %v4903_v32, %v4903_v32  ;;  %v688_v3 = vmul.f32 %v4906_v54, %v4906_v54 }
 0x2a7   :  { %v689_v20 = vmul.f32 %v4912_v10, %v4912_v10  ;;  %v690_v58 = vmul.f32 %v4916_v11, %v4916_v11  ;;  %v677_v24 = vsub.f32 %v598_v62, %v668_v31  ;;  %v691_v30 = vmul.f32 %v4922_v17, %v4922_v17 }
 0x2a8   :  { %v701_v4 = vsel %vm630_vm2, %v685_v12, 0.0  ;;  %v702_v7 = vsel %vm630_vm2, %v686_v33, 0.0  ;;  %v704_v2 = vsel %vm630_vm2, %v687_v63, 0.0  ;;  %v706_v16 = vsel %vm630_vm2, %v688_v3, 0.0 }
 0x2a9   :  { %v703_v14 = vadd.f32 %v702_v7, %v701_v4  ;;  %v708_v15 = vsel %vm630_vm2, %v689_v20, 0.0  ;;  %v4935_v53 = vsub.f32 %v601_v18, %v668_v31  ;;  %v692_v25 = vmul.f32 %v4927_v23, %v4927_v23 }
 0x2aa   :  { %v710_v37 = vsel %vm630_vm2, %v690_v58, 0.0  ;;  %v4940_v28 = vsub.f32 %v606_v35, %v668_v31  ;;  %v693_v6 = vmul.f32 %v677_v24, %v677_v24  ;;  %v712_v36 = vsel %vm630_vm2, %v691_v30, 0.0  ;;  %v4981_v58 = vld [vmem:[%s6515_s2 + $0x4] ss:$0 sm:$0xff]  ;;  %v4988_v30 = vld [vmem:[%s6515_s2 + $0x5] ss:$0 sm:$0xff] }
 0x2ab   :  { %v705_v21 = vadd.f32 %v704_v2, %v703_v14  ;;  %v4943_v13 = vsub.f32 %v609_v29, %v668_v31  ;;  %v694_v19 = vmul.f32 %v4935_v53, %v4935_v53  ;;  %v714_v18 = vsel %vm630_vm2, %v692_v25, 0.0 }
 0x2ac   :  { %v4948_v39 = vsub.f32 %v614_v40, %v668_v31  ;;  %v695_v26 = vmul.f32 %v4940_v28, %v4940_v28  ;;  %v716_v35 = vsel %vm630_vm2, %v693_v6, 0.0  ;;  %v4953_v45 = vsub.f32 %v617_v44, %v668_v31 }
 0x2ad   :  { %v707_v41 = vadd.f32 %v706_v16, %v705_v21  ;;  %v696_v29 = vmul.f32 %v4943_v13, %v4943_v13  ;;  %v718_v47 = vsel %vm630_vm2, %v694_v19, 0.0  ;;  %v4958_v51 = vsub.f32 %v622_v48, %v668_v31 }
 0x2ae   :  { %v697_v40 = vmul.f32 %v4948_v39, %v4948_v39  ;;  %v720_v38 = vsel %vm630_vm2, %v695_v26, 0.0  ;;  %v4964_v56 = vsub.f32 %v4890_v52, %v668_v31  ;;  %v698_v44 = vmul.f32 %v4953_v45, %v4953_v45 }
 0x2af   :  { %v709_v49 = vadd.f32 %v708_v15, %v707_v41  ;;  %v722_v42 = vsel %vm630_vm2, %v696_v29, 0.0  ;;  %v699_v60 = vmul.f32 %v4958_v51, %v4958_v51 }
 0x2b0   :  { %v724_v48 = vsel %vm630_vm2, %v697_v40, 0.0  ;;  %v700_v61 = vmul.f32 %v4964_v56, %v4964_v56  ;;  %v726_v1 = vsel %vm630_vm2, %v698_v44, 0.0 }
 0x2b1   :  { %v711_v27 = vadd.f32 %v710_v37, %v709_v49  ;;  %v728_v52 = vsel %vm630_vm2, %v699_v60, 0.0 }
 0x2b2   :  { %v730_v8 = vsel %vm630_vm2, %v700_v61, 0.0 }
 0x2b3   :  { %v713_v62 = vadd.f32 %v712_v36, %v711_v27 }
 0x2b5   :  { %v715_v22 = vadd.f32 %v714_v18, %v713_v62 }
 0x2b7   :  { %v717_v43 = vadd.f32 %v716_v35, %v715_v22 }
 0x2b9   :  { %v719_v34 = vadd.f32 %v718_v47, %v717_v43 }
 0x2bb   :  { %v721_v55 = vadd.f32 %v720_v38, %v719_v34 }
 0x2bd   :  { %v723_v59 = vadd.f32 %v722_v42, %v721_v55 }
 0x2bf   :  { %v725_v57 = vadd.f32 %v724_v48, %v723_v59 }
 0x2c1   :  { %v727_v50 = vadd.f32 %v726_v1, %v725_v57 }
 0x2c3   :  { %v729_v5 = vadd.f32 %v728_v52, %v727_v50 }
 0x2c5   :  { %v731_v31 = vadd.f32 %v730_v8, %v729_v5 }
 0x2c7   :  { %v732_v12 = vrot.slane %v731_v31, 4 }
 0x2c9   :  { %v733_v33 = vadd.f32 %v732_v12, %v731_v31 }
 0x2cb   :  { %v734_v63 = vrot.slane %v733_v33, 2 }
 0x2cd   :  { %v735_v3 = vadd.f32 %v734_v63, %v733_v33 }
 0x2cf   :  { %v736_v4 = vrot.slane %v735_v3, 1 }
 0x2d1   :  { %v737_v7 = vadd.f32 %v736_v4, %v735_v3 }
 0x2d3   :  { %v738_v14 = vmul.f32 0.0078125, %v737_v7 }
 0x2d5   :  { %v739_v20 = vadd.f32 1e-05, %v738_v14 }
 0x2d7   :  { %4338 = vrsqrt.f32 %v739_v20 }
 0x2e4   :  { %v4339_v2 = vpop.eup %4338 }
 0x2e5   :  { %v743_v21 = vmul.f32 %v4339_v2, %v4903_v32  ;;  %v744_v16 = vmul.f32 %v4339_v2, %v4906_v54  ;;  %v745_v41 = vmul.f32 %v4339_v2, %v4912_v10  ;;  %v746_v15 = vmul.f32 %v4339_v2, %v4916_v11 }
 0x2e6   :  { %v749_v49 = vmul.f32 %v4339_v2, %v677_v24  ;;  %v741_v25 = vmul.f32 %v4339_v2, %v4897_v46  ;;  %v742_v32 = vmul.f32 %v4339_v2, %v4900_v9  ;;  %v747_v27 = vmul.f32 %v4339_v2, %v4922_v17 }
 0x2e7   :  { %v759_v37 = vmul.f32 %v743_v21, %v4981_v58  ;;  %v760_v54 = vmul.f32 %v744_v16, %v4981_v58  ;;  %v761_v10 = vmul.f32 %v745_v41, %v4981_v58  ;;  %v748_v6 = vmul.f32 %v4339_v2, %v4927_v23 }
 0x2e8   :  { %v757_v36 = vmul.f32 %v741_v25, %v4981_v58  ;;  %v758_v62 = vmul.f32 %v742_v32, %v4981_v58  ;;  %v750_v46 = vmul.f32 %v4339_v2, %v4935_v53  ;;  %v762_v9 = vmul.f32 %v746_v15, %v4981_v58 }
 0x2e9   :  { %v775_v11 = vadd.f32 %v759_v37, %v4988_v30  ;;  %v765_v24 = vmul.f32 %v749_v49, %v4981_v58  ;;  %v776_v18 = vadd.f32 %v760_v54, %v4988_v30  ;;  %v763_v23 = vmul.f32 %v747_v27, %v4981_v58  ;;  %v1128_v54 = vld [vmem:[#allocation3 + $0xf0] sm:$0xf] }
 0x2ea   :  { %v773_v17 = vadd.f32 %v757_v36, %v4988_v30  ;;  %v774_v19 = vadd.f32 %v758_v62, %v4988_v30  ;;  %v777_v22 = vadd.f32 %v761_v10, %v4988_v30  ;;  %v764_v26 = vmul.f32 %v748_v6, %v4981_v58  ;;  %4257 = vmatprep.subr.msk.bf16.mxu1 %vm1153_vm3, %v1128_v54  ;;  %v805_v62 = vld [vmem:[%s6515_s2 + $0x6] ss:$0 sm:$0xff] }
 0x2eb   :  { %4340 = vtanh.f32 %v775_v11  ;;  %v778_v53 = vadd.f32 %v762_v9, %v4988_v30  ;;  %v766_v35 = vmul.f32 %v750_v46, %v4981_v58  ;;  %v751_v43 = vmul.f32 %v4339_v2, %v4940_v28 }
 0x2ec   :  { %4342 = vtanh.f32 %v773_v17  ;;  %v781_v29 = vadd.f32 %v765_v24, %v4988_v30  ;;  %v752_v47 = vmul.f32 %v4339_v2, %v4943_v13  ;;  %v779_v34 = vadd.f32 %v763_v23, %v4988_v30 }
 0x2ed   :  { %4344 = vtanh.f32 %v774_v19  ;;  %v753_v40 = vmul.f32 %v4339_v2, %v4948_v39  ;;  %v780_v38 = vadd.f32 %v764_v26, %v4988_v30  ;;  %v754_v55 = vmul.f32 %v4339_v2, %v4953_v45 }
 0x2ee   :  { %4346 = vtanh.f32 %v776_v18  ;;  %v782_v44 = vadd.f32 %v766_v35, %v4988_v30  ;;  %v767_v42 = vmul.f32 %v751_v43, %v4981_v58  ;;  %v768_v28 = vmul.f32 %v752_v47, %v4981_v58 }
 0x2ef   :  { %4348 = vtanh.f32 %v777_v22  ;;  %v769_v13 = vmul.f32 %v753_v40, %v4981_v58  ;;  %v770_v59 = vmul.f32 %v754_v55, %v4981_v58  ;;  %v755_v60 = vmul.f32 %v4339_v2, %v4958_v51 }
 0x2f0   :  { %4350 = vtanh.f32 %v778_v53  ;;  %v783_v39 = vadd.f32 %v767_v42, %v4988_v30  ;;  %v784_v45 = vadd.f32 %v768_v28, %v4988_v30  ;;  %v756_v61 = vmul.f32 %v4339_v2, %v4964_v56 }
 0x2f1   :  { %4352 = vtanh.f32 %v781_v29  ;;  %v785_v57 = vadd.f32 %v769_v13, %v4988_v30  ;;  %v786_v50 = vadd.f32 %v770_v59, %v4988_v30  ;;  %v771_v31 = vmul.f32 %v755_v60, %v4981_v58 }
 0x2f2   :  { %4354 = vtanh.f32 %v779_v34  ;;  %v772_v51 = vmul.f32 %v756_v61, %v4981_v58  ;;  %v1155_v6 = vsel %vm1153_vm3, %v1128_v54, 0 }
 0x2f3   :  { %4356 = vtanh.f32 %v780_v38  ;;  %v787_v4 = vadd.f32 %v771_v31, %v4988_v30 }
 0x2f4   :  { %4358 = vtanh.f32 %v782_v44  ;;  %v788_v14 = vadd.f32 %v772_v51, %v4988_v30 }
 0x2f5   :  { %4360 = vtanh.f32 %v783_v39 }
 0x2f6   :  { %4362 = vtanh.f32 %v784_v45 }
 0x2f7   :  { %4364 = vtanh.f32 %v785_v57 }
 0x2f8   :  { %v4341_v48 = vpop.eup %4340  ;;  %4366 = vtanh.f32 %v786_v50 }
 0x2f9   :  { %v4343_v1 = vpop.eup %4342  ;;  %4368 = vtanh.f32 %v787_v4 }
 0x2fa   :  { %v4345_v52 = vpop.eup %4344  ;;  %4370 = vtanh.f32 %v788_v14 }
 0x2fb   :  { %v4347_v5 = vpop.eup %4346  ;;  %v806_v8 = vpack.c.bf16 %v4345_v52, %v4343_v1 }
 0x2fc   :  { %v4349_v12 = vpop.eup %4348  ;;  %v807_v33 = vpack.c.bf16 %v4347_v5, %v4341_v48 }
 0x2fd   :  { %v4351_v63 = vpop.eup %4350  ;;  %4033 = vmatprep.mubr.msk.bf16.mxu1 %vm630_vm2, %v806_v8 }
 0x2fe   :  { %4034 = vmatmul.mubr.msk.bf16.vlgmr.msra.gmra.mxu1 %vm630_vm2, %v807_v33  ;;  %v808_v56 = vpack.c.bf16 %v4351_v63, %v4349_v12  ;;  %v4353_v3 = vpop.eup %4352 }
 0x2ff   :  { %v4355_v7 = vpop.eup %4354  ;;  %4050 = vmatpush3.bf16.msra.mxu1 %v1155_v6 }
 0x300   :  { %4037 = vmatprep.mubr.msk.bf16.mxu1 %vm630_vm2, %v808_v56  ;;  %v4357_v20 = vpop.eup %4356 }
 0x301   :  { %v4359_v2 = vpop.eup %4358  ;;  %v809_v21 = vpack.c.bf16 %v4357_v20, %v4355_v7 }
 0x302   :  { %v810_v58 = vpack.c.bf16 %v4359_v2, %v4353_v3  ;;  %v4361_v16 = vpop.eup %4360 }
 0x303   :  { %v4363_v41 = vpop.eup %4362 }
 0x304   :  { %v4365_v15 = vpop.eup %4364  ;;  %v811_v25 = vpack.c.bf16 %v4363_v41, %v4361_v16  ;;  %v5091_v41 = vld [vmem:[#allocation3 + $0x110] ss:$8 sps:$4 sm:$0xff]  }
 0x305   :  { %v4367_v49 = vpop.eup %4366  ;;  %4067 = vmatprep.subr.bf16.mxu1 %v5091_v41 }
 0x306   :  { %4038 = vmatmul.mubr.msk.bf16.gmra.mxu1 %vm630_vm2, %v809_v21  ;;  %v812_v32 = vpack.c.bf16 %v4367_v49, %v4365_v15  ;;  %v4369_v30 = vpop.eup %4368 }
 0x307   :  { %4041 = vmatprep.mubr.msk.bf16.mxu1 %vm630_vm2, %v810_v58  ;;  %v4371_v37 = vpop.eup %4370 }
 0x308   :  { %v813_v27 = vpack.c.bf16 %v4371_v37, %v4369_v30 }
 0x30e   :  { %4042 = vmatmul.mubr.msk.bf16.gmra.mxu1 %vm630_vm2, %v811_v25 }
 0x30f   :  { %4045 = vmatprep.mubr.msk.bf16.mxu1 %vm630_vm2, %v812_v32 }
 0x316   :  { %4046 = vmatmul.mubr.msk.bf16.gmra.mxu1 %vm630_vm2, %v813_v27 }
 0x3be   :  { %v4035_v10 = vpop.f32.mrf.mxu1 }
 0x3bf   :  { %v5049_v24 = vadd.f32 %v4035_v10, %v805_v62 }
 0x3c0   :  { %v880_v36 = vpop.f32.mrf.mxu1 }
 0x3c1   :  { %v5047_v46 = vadd.f32 %v880_v36, %v805_v62  ;;  %v949_v35 = vsel %vm945_vm4, %v5049_v24, 0.0 }
 0x3c2   :  { %v4036_v11 = vpop.f32.mrf.mxu1 }
 0x3c3   :  { %v946_v18 = vsel %vm945_vm4, %v5047_v46, 0.0  ;;  %v5055_v23 = vadd.f32 %v4036_v11, %v805_v62 }
 0x3c4   :  { %v883_v9 = vpop.f32.mrf.mxu1 }
 0x3c5   :  { %v5051_v17 = vadd.f32 %v883_v9, %v805_v62  ;;  %v951_v34 = vsel %vm945_vm4, %v5055_v23, 0.0 }
 0x3c6   :  { %v4039_v19 = vpop.f32.mrf.mxu1 }
 0x3c7   :  { %v947_v22 = vsel %vm945_vm4, %v5051_v17, 0.0  ;;  %v5065_v55 = vadd.f32 %v4039_v19, %v805_v62 }
 0x3c8   :  { %v948_v26 = vadd.f32 %v947_v22, %v946_v18  ;;  %v896_v53 = vpop.f32.mrf.mxu1 }
 0x3c9   :  { %v5061_v43 = vadd.f32 %v896_v53, %v805_v62  ;;  %v957_v48 = vsel %vm945_vm4, %v5065_v55, 0.0 }
 0x3ca   :  { %v950_v29 = vadd.f32 %v949_v35, %v948_v26  ;;  %v4040_v47 = vpop.f32.mrf.mxu1 }
 0x3cb   :  { %v953_v44 = vsel %vm945_vm4, %v5061_v43, 0.0  ;;  %v5069_v59 = vadd.f32 %v4040_v47, %v805_v62 }
 0x3cc   :  { %v952_v40 = vadd.f32 %v951_v34, %v950_v29  ;;  %v899_v38 = vpop.f32.mrf.mxu1 }
 0x3cd   :  { %v900_v42 = vadd.f32 %v899_v38, %v805_v62  ;;  %v959_v50 = vsel %vm945_vm4, %v5069_v59, 0.0 }
 0x3ce   :  { %v954_v28 = vadd.f32 %v953_v44, %v952_v40  ;;  %v4043_v13 = vpop.f32.mrf.mxu1 }
 0x3cf   :  { %v955_v39 = vsel %vm945_vm4, %v900_v42, 0.0  ;;  %v5078_v8 = vadd.f32 %v4043_v13, %v805_v62 }
 0x3d0   :  { %v956_v60 = vadd.f32 %v955_v39, %v954_v28  ;;  %v912_v45 = vpop.f32.mrf.mxu1 }
 0x3d1   :  { %v5074_v57 = vadd.f32 %v912_v45, %v805_v62  ;;  %v965_v7 = vsel %vm945_vm4, %v5078_v8, 0.0 }
 0x3d2   :  { %v958_v61 = vadd.f32 %v957_v48, %v956_v60  ;;  %v4044_v1 = vpop.f32.mrf.mxu1 }
 0x3d3   :  { %v961_v31 = vsel %vm945_vm4, %v5074_v57, 0.0  ;;  %v5082_v63 = vadd.f32 %v4044_v1, %v805_v62 }
 0x3d4   :  { %v960_v52 = vadd.f32 %v959_v50, %v958_v61  ;;  %v915_v5 = vpop.f32.mrf.mxu1 }
 0x3d5   :  { %v916_v12 = vadd.f32 %v915_v5, %v805_v62  ;;  %v967_v21 = vsel %vm945_vm4, %v5082_v63, 0.0 }
 0x3d6   :  { %v962_v33 = vadd.f32 %v961_v31, %v960_v52  ;;  %v4047_v51 = vpop.f32.mrf.mxu1 }
 0x3d7   :  { %v963_v56 = vsel %vm945_vm4, %v916_v12, 0.0  ;;  %v5093_v15 = vadd.f32 %v4047_v51, %v805_v62 }
 0x3d8   :  { %v964_v3 = vadd.f32 %v963_v56, %v962_v33  ;;  %v928_v4 = vpop.f32.mrf.mxu1 }
 0x3d9   :  { %v5087_v14 = vadd.f32 %v928_v4, %v805_v62  ;;  %v973_v54 = vsel %vm945_vm4, %v5093_v15, 0.0 }
 0x3da   :  { %v966_v20 = vadd.f32 %v965_v7, %v964_v3  ;;  %v4048_v2 = vpop.f32.mrf.mxu1 }
 0x3db   :  { %v969_v49 = vsel %vm945_vm4, %v5087_v14, 0.0  ;;  %v5098_v30 = vadd.f32 %v4048_v2, %v805_v62 }
 0x3dc   :  { %v968_v58 = vadd.f32 %v967_v21, %v966_v20  ;;  %v931_v16 = vpop.f32.mrf.mxu1 }
 0x3dd   :  { %v932_v25 = vadd.f32 %v931_v16, %v805_v62  ;;  %v975_v6 = vsel %vm945_vm4, %v5098_v30, 0.0 }
 0x3de   :  { %v970_v32 = vadd.f32 %v969_v49, %v968_v58 }
 0x3df   :  { %v971_v37 = vsel %vm945_vm4, %v932_v25, 0.0 }
 0x3e0   :  { %v972_v27 = vadd.f32 %v971_v37, %v970_v32 }
 0x3e2   :  { %v974_v10 = vadd.f32 %v973_v54, %v972_v27 }
 0x3e4   :  { %v976_v36 = vadd.f32 %v975_v6, %v974_v10 }
 0x3e6   :  { %v977_v11 = vrot.slane %v976_v36, 4 }
 0x3e8   :  { %v978_v9 = vadd.f32 %v977_v11, %v976_v36 }
 0x3ea   :  { %v979_v19 = vrot.slane %v978_v9, 2 }
 0x3ec   :  { %v980_v18 = vadd.f32 %v979_v19, %v978_v9 }
 0x3ee   :  { %v981_v22 = vrot.slane %v980_v18, 1 }
 0x3f0   :  { %v982_v26 = vadd.f32 %v981_v22, %v980_v18 }
 0x3f2   :  { %v983_v53 = vmul.f32 0.0078125, %v982_v26 }
 0x3f4   :  { %v5106_v62 = vsub.f32 %v5047_v46, %v983_v53  ;;  %v5109_v35 = vsub.f32 %v5051_v17, %v983_v53  ;;  %v5112_v29 = vsub.f32 %v5049_v24, %v983_v53  ;;  %v5115_v47 = vsub.f32 %v5055_v23, %v983_v53 }
 0x3f5   :  { %v5122_v38 = vsub.f32 %v5061_v43, %v983_v53  ;;  %v5126_v17 = vsub.f32 %v900_v42, %v983_v53  ;;  %v5133_v13 = vsub.f32 %v5065_v55, %v983_v53  ;;  %v5139_v42 = vsub.f32 %v5069_v59, %v983_v53 }
 0x3f6   :  { %v1000_v34 = vmul.f32 %v5106_v62, %v5106_v62  ;;  %v1001_v40 = vmul.f32 %v5109_v35, %v5109_v35  ;;  %v1002_v46 = vmul.f32 %v5112_v29, %v5112_v29  ;;  %v1003_v24 = vmul.f32 %v5115_v47, %v5115_v47 }
 0x3f7   :  { %v1004_v43 = vmul.f32 %v5122_v38, %v5122_v38  ;;  %v1005_v45 = vmul.f32 %v5126_v17, %v5126_v17  ;;  %v5145_v1 = vsub.f32 %v5074_v57, %v983_v53  ;;  %v1006_v55 = vmul.f32 %v5133_v13, %v5133_v13 }
 0x3f8   :  { %v1016_v23 = vsel %vm945_vm4, %v1000_v34, 0.0  ;;  %v1017_v44 = vsel %vm945_vm4, %v1001_v40, 0.0  ;;  %v1019_v39 = vsel %vm945_vm4, %v1002_v46, 0.0  ;;  %v1021_v48 = vsel %vm945_vm4, %v1003_v24, 0.0 }
 0x3f9   :  { %v1018_v28 = vadd.f32 %v1017_v44, %v1016_v23  ;;  %v1023_v50 = vsel %vm945_vm4, %v1004_v43, 0.0  ;;  %v5150_v5 = vsub.f32 %v916_v12, %v983_v53  ;;  %v1007_v59 = vmul.f32 %v5139_v42, %v5139_v42 }
 0x3fa   :  { %v1025_v31 = vsel %vm945_vm4, %v1005_v45, 0.0  ;;  %v5156_v51 = vsub.f32 %v5078_v8, %v983_v53  ;;  %v1008_v57 = vmul.f32 %v5145_v1, %v5145_v1  ;;  %v1027_v56 = vsel %vm945_vm4, %v1006_v55, 0.0  ;;  %v5199_v45 = vld [vmem:[%s6515_s2 + $0x7] ss:$0 sm:$0xff] }
 0x3fb   :  { %v1020_v60 = vadd.f32 %v1019_v39, %v1018_v28  ;;  %v5162_v4 = vsub.f32 %v5082_v63, %v983_v53  ;;  %v1009_v12 = vmul.f32 %v5150_v5, %v5150_v5  ;;  %v1029_v7 = vsel %vm945_vm4, %v1007_v59, 0.0 }
 0x3fc   :  { %v5168_v2 = vsub.f32 %v5087_v14, %v983_v53  ;;  %v1010_v8 = vmul.f32 %v5156_v51, %v5156_v51  ;;  %v1031_v21 = vsel %vm945_vm4, %v1008_v57, 0.0  ;;  %v997_v16 = vsub.f32 %v932_v25, %v983_v53 }
 0x3fd   :  { %v1022_v61 = vadd.f32 %v1021_v48, %v1020_v60  ;;  %v1011_v63 = vmul.f32 %v5162_v4, %v5162_v4  ;;  %v1033_v49 = vsel %vm945_vm4, %v1009_v12, 0.0  ;;  %v5177_v37 = vsub.f32 %v5093_v15, %v983_v53 }
 0x3fe   :  { %v1012_v14 = vmul.f32 %v5168_v2, %v5168_v2  ;;  %v1035_v27 = vsel %vm945_vm4, %v1010_v8, 0.0  ;;  %v5183_v10 = vsub.f32 %v5098_v30, %v983_v53  ;;  %v1013_v6 = vmul.f32 %v997_v16, %v997_v16 }
 0x3ff   :  { %v1024_v52 = vadd.f32 %v1023_v50, %v1022_v61  ;;  %v1037_v25 = vsel %vm945_vm4, %v1011_v63, 0.0  ;;  %v1014_v11 = vmul.f32 %v5177_v37, %v5177_v37  ;;  %v5210_v50 = vld [vmem:[%s6515_s2 + $0x10] ss:$0 sm:$0xff] }
 0x400   :  { %v1039_v9 = vsel %vm945_vm4, %v1012_v14, 0.0  ;;  %v1015_v19 = vmul.f32 %v5183_v10, %v5183_v10  ;;  %v1041_v18 = vsel %vm945_vm4, %v1013_v6, 0.0 }
 0x401   :  { %v1026_v33 = vadd.f32 %v1025_v31, %v1024_v52  ;;  %v1043_v26 = vsel %vm945_vm4, %v1014_v11, 0.0 }
 0x402   :  { %v1045_v53 = vsel %vm945_vm4, %v1015_v19, 0.0 }
 0x403   :  { %v1028_v3 = vadd.f32 %v1027_v56, %v1026_v33 }
 0x405   :  { %v1030_v20 = vadd.f32 %v1029_v7, %v1028_v3 }
 0x407   :  { %v1032_v58 = vadd.f32 %v1031_v21, %v1030_v20 }
 0x409   :  { %v1034_v32 = vadd.f32 %v1033_v49, %v1032_v58 }
 0x40b   :  { %v1036_v54 = vadd.f32 %v1035_v27, %v1034_v32 }
 0x40d   :  { %v1038_v36 = vadd.f32 %v1037_v25, %v1036_v54 }
 0x40f   :  { %v1040_v15 = vadd.f32 %v1039_v9, %v1038_v36 }
 0x411   :  { %v1042_v22 = vadd.f32 %v1041_v18, %v1040_v15  ;;  %v4292_v18 = vld [vmem:[#allocation3 + $0x100] ss:$8 sps:$4 sm:$0xff]  }
 0x413   :  { %v1044_v30 = vadd.f32 %v1043_v26, %v1042_v22 }
 0x415   :  { %v1046_v34 = vadd.f32 %v1045_v53, %v1044_v30 }
 0x417   :  { %v1047_v40 = vrot.slane %v1046_v34, 4 }
 0x419   :  { %v1048_v46 = vadd.f32 %v1047_v40, %v1046_v34 }
 0x41b   :  { %v1049_v24 = vrot.slane %v1048_v46, 2 }
 0x41d   :  { %v1050_v23 = vadd.f32 %v1049_v24, %v1048_v46 }
 0x41f   :  { %v1051_v44 = vrot.slane %v1050_v23, 1 }
 0x421   :  { %v1052_v28 = vadd.f32 %v1051_v44, %v1050_v23 }
 0x423   :  { %v1053_v43 = vmul.f32 0.0078125, %v1052_v28 }
 0x425   :  { %v1054_v39 = vadd.f32 1e-05, %v1053_v43 }
 0x427   :  { %4372 = vrsqrt.f32 %v1054_v39 }
 0x434   :  { %v5194_v60 = vpop.eup %4372 }
 0x435   :  { %v1056_v48 = vmul.f32 %v5194_v60, %v5106_v62  ;;  %v1057_v61 = vmul.f32 %v5194_v60, %v5109_v35  ;;  %v1058_v55 = vmul.f32 %v5194_v60, %v5112_v29  ;;  %v1059_v52 = vmul.f32 %v5194_v60, %v5115_v47 }
 0x436   :  { %v1060_v59 = vmul.f32 %v5194_v60, %v5122_v38  ;;  %v1061_v62 = vmul.f32 %v5194_v60, %v5126_v17  ;;  %v1062_v35 = vmul.f32 %v5194_v60, %v5133_v13  ;;  %v1063_v38 = vmul.f32 %v5194_v60, %v5139_v42 }
 0x437   :  { %v1072_v31 = vmul.f32 %v1056_v48, %v5199_v45  ;;  %v1073_v29 = vmul.f32 %v1057_v61, %v5199_v45  ;;  %v1074_v33 = vmul.f32 %v1058_v55, %v5199_v45  ;;  %v1075_v57 = vmul.f32 %v1059_v52, %v5199_v45 }
 0x438   :  { %v1076_v56 = vmul.f32 %v1060_v59, %v5199_v45  ;;  %v1077_v47 = vmul.f32 %v1061_v62, %v5199_v45  ;;  %v1078_v42 = vmul.f32 %v1062_v35, %v5199_v45  ;;  %v1079_v63 = vmul.f32 %v1063_v38, %v5199_v45 }
 0x439   :  { %v5229_v17 = vadd.f32 %v1072_v31, %v5210_v50  ;;  %v5232_v13 = vadd.f32 %v1073_v29, %v5210_v50  ;;  %v5235_v3 = vadd.f32 %v1074_v33, %v5210_v50  ;;  %v5238_v12 = vadd.f32 %v1075_v57, %v5210_v50 }
 0x43a   :  { %v5241_v7 = vadd.f32 %v1076_v56, %v5210_v50  ;;  %v5244_v20 = vadd.f32 %v1077_v47, %v5210_v50  ;;  %v1069_v27 = vmul.f32 %v5194_v60, %v997_v16  ;;  %v1064_v6 = vmul.f32 %v5194_v60, %v5145_v1  ;;  %v1455_v56 = vld [vmem:[#allocation3 + $0x140] sm:$0xf] }
 0x43b   :  { %v1104_v8 = vmax.f32 %v5229_v17, 0.0  ;;  %v1105_v21 = vmax.f32 %v5232_v13, 0.0  ;;  %v1106_v58 = vmax.f32 %v5235_v3, 0.0  ;;  %v1107_v49 = vmax.f32 %v5238_v12, 0.0  ;;  %4258 = vmatprep.subr.msk.bf16.mxu0 %vm1153_vm3, %v1455_v56 }
 0x43c   :  { %v1108_v32 = vmax.f32 %v5241_v7, 0.0  ;;  %v1109_v14 = vmax.f32 %v5244_v20, 0.0  ;;  %v1065_v25 = vmul.f32 %v5194_v60, %v5150_v5  ;;  %v5260_v11 = vadd.f32 %v1078_v42, %v5210_v50 }
 0x43d   :  { %v1120_v54 = vpack.c.bf16 %v1105_v21, %v1104_v8  ;;  %v1121_v36 = vpack.c.bf16 %v1107_v49, %v1106_v58  ;;  %v5263_v9 = vadd.f32 %v1079_v63, %v5210_v50  ;;  %v1066_v15 = vmul.f32 %v5194_v60, %v5156_v51 }
 0x43e   :  { %v1122_v16 = vpack.c.bf16 %v1109_v14, %v1108_v32  ;;  %v1080_v19 = vmul.f32 %v1064_v6, %v5199_v45  ;;  %v1081_v1 = vmul.f32 %v1065_v25, %v5199_v45  ;;  %v1067_v5 = vmul.f32 %v5194_v60, %v5162_v4 }
 0x43f   :  { %4051 = vmatprep.mubr.msk.bf16.mxu1 %vm945_vm4, %v1120_v54  ;;  %v1068_v22 = vmul.f32 %v5194_v60, %v5168_v2  ;;  %v1110_v30 = vmax.f32 %v5260_v11, 0.0  ;;  %v1111_v53 = vmax.f32 %v5263_v9, 0.0  ;;  %v1082_v4 = vmul.f32 %v1066_v15, %v5199_v45 }
 0x440   :  { %4052 = vmatmul.mubr.msk.bf16.vlgmr.msra.gmra.mxu1 %vm945_vm4, %v1121_v36  ;;  %v5277_v51 = vadd.f32 %v1080_v19, %v5210_v50  ;;  %v5280_v26 = vadd.f32 %v1081_v1, %v5210_v50  ;;  %v1083_v34 = vmul.f32 %v1067_v5, %v5199_v45  ;;  %v1085_v2 = vmul.f32 %v1069_v27, %v5199_v45 }
 0x441   :  { %4055 = vmatprep.mubr.msk.bf16.mxu1 %vm945_vm4, %v1122_v16  ;;  %4068 = vmatpush3.bf16.msra.mxu1 %v5091_v41  ;;  %v1084_v24 = vmul.f32 %v1068_v22, %v5199_v45  ;;  %v1070_v23 = vmul.f32 %v5194_v60, %v5177_v37  ;;  %v1123_v44 = vpack.c.bf16 %v1111_v53, %v1110_v30  ;;  %v1482_v47 = vsel %vm1153_vm3, %v1455_v56, 0 }
 0x442   :  { %v1112_v40 = vmax.f32 %v5277_v51, 0.0  ;;  %v1113_v46 = vmax.f32 %v5280_v26, 0.0  ;;  %4069 = vmatprep.subr.bf16.mxu1 %v4292_v18  ;;  %v5294_v28 = vadd.f32 %v1082_v4, %v5210_v50  ;;  %v5297_v43 = vadd.f32 %v1083_v34, %v5210_v50  ;;  %4088 = vmatpush3.bf16.msra.mxu0 %v1482_v47 }
 0x443   :  { %v1071_v41 = vmul.f32 %v5194_v60, %v5183_v10  ;;  %v5302_v39 = vadd.f32 %v1085_v2, %v5210_v50  ;;  %v5305_v61 = vadd.f32 %v1084_v24, %v5210_v50  ;;  %v1086_v52 = vmul.f32 %v1070_v23, %v5199_v45 }
 0x444   :  { %v1124_v48 = vpack.c.bf16 %v1113_v46, %v1112_v40  ;;  %v1114_v37 = vmax.f32 %v5294_v28, 0.0  ;;  %v1115_v55 = vmax.f32 %v5297_v43, 0.0 }
 0x445   :  { %4070 = vmatpush3.bf16.msra.mxu1 %v4292_v18  ;;  %v1087_v10 = vmul.f32 %v1071_v41, %v5199_v45  ;;  %v1116_v60 = vmax.f32 %v5305_v61, 0.0  ;;  %v1117_v59 = vmax.f32 %v5302_v39, 0.0  ;;  %v5316_v35 = vadd.f32 %v1086_v52, %v5210_v50 }
 0x446   :  { %v1125_v62 = vpack.c.bf16 %v1115_v55, %v1114_v37 }
 0x447   :  { %v5319_v31 = vadd.f32 %v1087_v10, %v5210_v50  ;;  %v1126_v29 = vpack.c.bf16 %v1117_v59, %v1116_v60  ;;  %v1118_v33 = vmax.f32 %v5316_v35, 0.0 }
 0x448   :  { %4056 = vmatmul.mubr.msk.bf16.gmra.mxu1 %vm945_vm4, %v1123_v44 }
 0x449   :  { %4059 = vmatprep.mubr.msk.bf16.mxu1 %vm945_vm4, %v1124_v48  ;;  %v1119_v45 = vmax.f32 %v5319_v31, 0.0 }
 0x44b   :  { %v1127_v57 = vpack.c.bf16 %v1119_v45, %v1118_v33 }
 0x450   :  { %4060 = vmatmul.mubr.msk.bf16.gmra.mxu1 %vm945_vm4, %v1125_v62  ;;  %v1976_v62 = vld [vmem:[#allocation3 + $0x120] sm:$0xf] }
 0x451   :  { %4063 = vmatprep.mubr.msk.bf16.mxu1 %vm945_vm4, %v1126_v29  ;;  %4259 = vmatprep.subr.msk.bf16.mxu1 %vm1153_vm3, %v1976_v62  ;;  %v1979_v29 = vsel %vm1153_vm3, %v1976_v62, 0 }
 0x458   :  { %4064 = vmatmul.mubr.msk.bf16.gmra.mxu1 %vm945_vm4, %v1127_v57 }
 0x500   :  { %v4053_v50 = vpop.f32.mrf.mxu1 }
 0x501   :  { %v1256_v49 = vmax.f32 %v4053_v50, 0.0 }
 0x502   :  { %v1191_v38 = vpop.f32.mrf.mxu1 }
 0x503   :  { %v1254_v58 = vmax.f32 %v1191_v38, 0.0 }
 0x504   :  { %v4054_v42 = vpop.f32.mrf.mxu1 }
 0x505   :  { %v1257_v8 = vmax.f32 %v4054_v42, 0.0 }
 0x506   :  { %v1194_v21 = vpop.f32.mrf.mxu1 }
 0x507   :  { %v1255_v63 = vmax.f32 %v1194_v21, 0.0  ;;  %v1271_v27 = vpack.c.bf16 %v1257_v8, %v1256_v49 }
 0x508   :  { %v4057_v32 = vpop.f32.mrf.mxu1 }
 0x509   :  { %v1270_v14 = vpack.c.bf16 %v1255_v63, %v1254_v58  ;;  %v1260_v19 = vmax.f32 %v4057_v32, 0.0 }
 0x50a   :  { %v1207_v54 = vpop.f32.mrf.mxu1 }
 0x50b   :  { %4071 = vmatprep.mubr.msk.bf16.mxu1 %vm306_vm1, %v1270_v14  ;;  %v1258_v15 = vmax.f32 %v1207_v54, 0.0 }
 0x50c   :  { %v4058_v6 = vpop.f32.mrf.mxu1  ;;  %4072 = vmatmul.mubr.msk.bf16.vlgmr.msra.gmra.mxu1 %vm306_vm1, %v1271_v27 }
 0x50d   :  { %v1261_v25 = vmax.f32 %v4058_v6, 0.0  ;;  %4106 = vmatpush3.bf16.msra.mxu1 %v1979_v29 }
 0x50e   :  { %v1210_v36 = vpop.f32.mrf.mxu1 }
 0x50f   :  { %v1259_v16 = vmax.f32 %v1210_v36, 0.0  ;;  %v1273_v18 = vpack.c.bf16 %v1261_v25, %v1260_v19 }
 0x510   :  { %v4061_v1 = vpop.f32.mrf.mxu1 }
 0x511   :  { %v1272_v5 = vpack.c.bf16 %v1259_v16, %v1258_v15  ;;  %v1264_v40 = vmax.f32 %v4061_v1, 0.0 }
 0x512   :  { %v1223_v22 = vpop.f32.mrf.mxu1 }
 0x513   :  { %4075 = vmatprep.mubr.msk.bf16.mxu1 %vm306_vm1, %v1272_v5  ;;  %v1262_v34 = vmax.f32 %v1223_v22, 0.0 }
 0x514   :  { %v4062_v30 = vpop.f32.mrf.mxu1  ;;  %4076 = vmatmul.mubr.msk.bf16.gmra.mxu1 %vm306_vm1, %v1273_v18 }
 0x515   :  { %v1265_v53 = vmax.f32 %v4062_v30, 0.0 }
 0x516   :  { %v1226_v4 = vpop.f32.mrf.mxu1 }
 0x517   :  { %v1263_v2 = vmax.f32 %v1226_v4, 0.0  ;;  %v1275_v23 = vpack.c.bf16 %v1265_v53, %v1264_v40 }
 0x518   :  { %v4065_v46 = vpop.f32.mrf.mxu1 }
 0x519   :  { %v1274_v24 = vpack.c.bf16 %v1263_v2, %v1262_v34  ;;  %v1268_v10 = vmax.f32 %v4065_v46, 0.0 }
 0x51a   :  { %v1239_v44 = vpop.f32.mrf.mxu1 }
 0x51b   :  { %4079 = vmatprep.mubr.msk.bf16.mxu1 %vm306_vm1, %v1274_v24  ;;  %v1266_v55 = vmax.f32 %v1239_v44, 0.0 }
 0x51c   :  { %v4066_v41 = vpop.f32.mrf.mxu1  ;;  %4080 = vmatmul.mubr.msk.bf16.gmra.mxu1 %vm306_vm1, %v1275_v23 }
 0x51d   :  { %v1269_v48 = vmax.f32 %v4066_v41, 0.0 }
 0x51e   :  { %v1242_v37 = vpop.f32.mrf.mxu1 }
 0x51f   :  { %v1267_v52 = vmax.f32 %v1242_v37, 0.0  ;;  %v1277_v59 = vpack.c.bf16 %v1269_v48, %v1268_v10 }
 0x521   :  { %v1276_v60 = vpack.c.bf16 %v1267_v52, %v1266_v55 }
 0x523   :  { %4083 = vmatprep.mubr.msk.bf16.mxu1 %vm306_vm1, %v1276_v60 }
 0x524   :  { %4084 = vmatmul.mubr.msk.bf16.gmra.mxu1 %vm306_vm1, %v1277_v59 }
 0x5cc   :  { %v4073_v33 = vpop.f32.mrf.mxu1 }
 0x5cd   :  { %v1417_v50 = vadd.f32 %v4073_v33, %v5235_v3 }
 0x5ce   :  { %v1352_v45 = vpop.f32.mrf.mxu1 }
 0x5cf   :  { %v1415_v56 = vadd.f32 %v1352_v45, %v5229_v17  ;;  %v1433_v49 = vmax.f32 %v1417_v50, 0.0 }
 0x5d0   :  { %v4074_v57 = vpop.f32.mrf.mxu1 }
 0x5d1   :  { %v1418_v47 = vadd.f32 %v4074_v57, %v5238_v12  ;;  %v1431_v58 = vmax.f32 %v1415_v56, 0.0 }
 0x5d2   :  { %v1355_v38 = vpop.f32.mrf.mxu1 }
 0x5d3   :  { %v1416_v42 = vadd.f32 %v1355_v38, %v5232_v13  ;;  %v1434_v8 = vmax.f32 %v1418_v47, 0.0 }
 0x5d4   :  { %v4077_v21 = vpop.f32.mrf.mxu1 }
 0x5d5   :  { %v1432_v63 = vmax.f32 %v1416_v42, 0.0  ;;  %v1448_v27 = vpack.c.bf16 %v1434_v8, %v1433_v49  ;;  %v1421_v3 = vadd.f32 %v4077_v21, %v5260_v11 }
 0x5d6   :  { %v1368_v32 = vpop.f32.mrf.mxu1 }
 0x5d7   :  { %v1447_v14 = vpack.c.bf16 %v1432_v63, %v1431_v58  ;;  %v1419_v6 = vadd.f32 %v1368_v32, %v5241_v7  ;;  %v1437_v7 = vmax.f32 %v1421_v3, 0.0 }
 0x5d8   :  { %v4078_v54 = vpop.f32.mrf.mxu1 }
 0x5d9   :  { %v1422_v17 = vadd.f32 %v4078_v54, %v5263_v9  ;;  %4089 = vmatprep.mubr.msk.bf16.mxu0 %vm945_vm4, %v1447_v14  ;;  %4107 = vmatprep.mubr.msk.bf16.mxu1 %vm945_vm4, %v1447_v14  ;;  %v1435_v15 = vmax.f32 %v1419_v6, 0.0 }
 0x5da   :  { %v1371_v13 = vpop.f32.mrf.mxu1  ;;  %4090 = vmatmul.mubr.msk.bf16.vlgmr.msra.gmra.mxu0 %vm945_vm4, %v1448_v27  ;;  %4108 = vmatmul.mubr.msk.bf16.vlgmr.msra.gmra.mxu1 %vm945_vm4, %v1448_v27 }
 0x5db   :  { %v1420_v12 = vadd.f32 %v1371_v13, %v5244_v20  ;;  %v1438_v25 = vmax.f32 %v1422_v17, 0.0 }
 0x5dc   :  { %v4081_v36 = vpop.f32.mrf.mxu1 }
 0x5dd   :  { %v1436_v16 = vmax.f32 %v1420_v12, 0.0  ;;  %v1450_v1 = vpack.c.bf16 %v1438_v25, %v1437_v7  ;;  %v1425_v22 = vadd.f32 %v4081_v36, %v5294_v28 }
 0x5de   :  { %v1384_v19 = vpop.f32.mrf.mxu1 }
 0x5df   :  { %v1449_v9 = vpack.c.bf16 %v1436_v16, %v1435_v15  ;;  %v1423_v18 = vadd.f32 %v1384_v19, %v5277_v51  ;;  %v1441_v51 = vmax.f32 %v1425_v22, 0.0 }
 0x5e0   :  { %v4082_v5 = vpop.f32.mrf.mxu1 }
 0x5e1   :  { %v1426_v11 = vadd.f32 %v4082_v5, %v5297_v43  ;;  %4093 = vmatprep.mubr.msk.bf16.mxu0 %vm945_vm4, %v1449_v9  ;;  %4111 = vmatprep.mubr.msk.bf16.mxu1 %vm945_vm4, %v1449_v9  ;;  %v1439_v34 = vmax.f32 %v1423_v18, 0.0 }
 0x5e2   :  { %v1387_v20 = vpop.f32.mrf.mxu1  ;;  %4094 = vmatmul.mubr.msk.bf16.gmra.mxu0 %vm945_vm4, %v1450_v1  ;;  %4112 = vmatmul.mubr.msk.bf16.gmra.mxu1 %vm945_vm4, %v1450_v1 }
 0x5e3   :  { %v1424_v30 = vadd.f32 %v1387_v20, %v5280_v26  ;;  %v1442_v53 = vmax.f32 %v1426_v11, 0.0 }
 0x5e4   :  { %v4085_v4 = vpop.f32.mrf.mxu1 }
 0x5e5   :  { %v1440_v2 = vmax.f32 %v1424_v30, 0.0  ;;  %v1452_v46 = vpack.c.bf16 %v1442_v53, %v1441_v51  ;;  %v1429_v44 = vadd.f32 %v4085_v4, %v5316_v35  ;;  %v5373_v35 = vld [vmem:[%s6515_s2 + $0x13] ss:$0 sm:$0xff] }
 0x5e6   :  { %v1400_v40 = vpop.f32.mrf.mxu1 }
 0x5e7   :  { %v1451_v43 = vpack.c.bf16 %v1440_v2, %v1439_v34  ;;  %v1427_v23 = vadd.f32 %v1400_v40, %v5305_v61  ;;  %v1445_v52 = vmax.f32 %v1429_v44, 0.0 }
 0x5e8   :  { %v4086_v24 = vpop.f32.mrf.mxu1 }
 0x5e9   :  { %v1430_v28 = vadd.f32 %v4086_v24, %v5319_v31  ;;  %4097 = vmatprep.mubr.msk.bf16.mxu0 %vm945_vm4, %v1451_v43  ;;  %4115 = vmatprep.mubr.msk.bf16.mxu1 %vm945_vm4, %v1451_v43  ;;  %v1443_v37 = vmax.f32 %v1427_v23, 0.0  ;;  %v5378_v31 = vld [vmem:[%s6515_s2 + $0x12] ss:$0 sm:$0xff] }
 0x5ea   :  { %v1403_v26 = vpop.f32.mrf.mxu1  ;;  %4098 = vmatmul.mubr.msk.bf16.gmra.mxu0 %vm945_vm4, %v1452_v46  ;;  %4116 = vmatmul.mubr.msk.bf16.gmra.mxu1 %vm945_vm4, %v1452_v46 }
 0x5eb   :  { %v1428_v41 = vadd.f32 %v1403_v26, %v5302_v39  ;;  %v1446_v48 = vmax.f32 %v1430_v28, 0.0 }
 0x5ed   :  { %v1444_v55 = vmax.f32 %v1428_v41, 0.0  ;;  %v1454_v10 = vpack.c.bf16 %v1446_v48, %v1445_v52 }
 0x5ef   :  { %v1453_v61 = vpack.c.bf16 %v1444_v55, %v1443_v37 }
 0x5f1   :  { %4101 = vmatprep.mubr.msk.bf16.mxu0 %vm945_vm4, %v1453_v61  ;;  %4119 = vmatprep.mubr.msk.bf16.mxu1 %vm945_vm4, %v1453_v61 }
 0x5f2   :  { %4102 = vmatmul.mubr.msk.bf16.gmra.mxu0 %vm945_vm4, %v1454_v10  ;;  %4120 = vmatmul.mubr.msk.bf16.gmra.mxu1 %vm945_vm4, %v1454_v10 }
 0x69a   :  { %v4091_v39 = vpop.f32.mrf.mxu0 }
 0x69b   :  { %v1527_v60 = vadd.f32 %v4091_v39, %v5373_v35 }
 0x69c   :  { %v1518_v59 = vpop.f32.mrf.mxu0 }
 0x69d   :  { %v1519_v62 = vadd.f32 %v1518_v59, %v5373_v35  ;;  %v5383_v29 = vsub.f32 %v5378_v31, %v1527_v60  ;;  %v1598_v59 = vlaneseq }
 0x69e   :  { %v4092_v33 = vpop.f32.mrf.mxu0 }
 0x69f   :  { %v1530_v45 = vadd.f32 %v4092_v33, %v5373_v35  ;;  %v1606_v57 = vsel %vm630_vm2, %v5383_v29, inf  ;;  %v5389_v56 = vsub.f32 %v5378_v31, %v1519_v62  ;;  %v5477_v62 = vand.u32 127, %v1598_v59 }
 0x6a0   :  { %1607 = vmin.xlane.f32.xlu1 %v1606_v57  ;;  %v1521_v47 = vpop.f32.mrf.mxu0 }
 0x6a1   :  { %v1522_v50 = vadd.f32 %v1521_v47, %v5373_v35  ;;  %v1600_v38 = vsel %vm630_vm2, %v5389_v56, inf  ;;  %v5395_v42 = vsub.f32 %v5378_v31, %v1530_v45 }
 0x6a2   :  { %1601 = vmin.xlane.f32.xlu0 %v1600_v38  ;;  %v4095_v8 = vpop.f32.mrf.mxu0 }
 0x6a3   :  { %v1609_v21 = vsel %vm630_vm2, %v5395_v42, inf  ;;  %v5400_v58 = vsub.f32 %v5378_v31, %v1522_v50  ;;  %v1543_v63 = vadd.f32 %v4095_v8, %v5373_v35 }
 0x6a4   :  { %1610 = vmin.xlane.f32.xlu1 %v1609_v21  ;;  %v1534_v49 = vpop.f32.mrf.mxu0 }
 0x6a5   :  { %v1535_v32 = vadd.f32 %v1534_v49, %v5373_v35  ;;  %v1603_v14 = vsel %vm630_vm2, %v5400_v58, inf  ;;  %v5410_v17 = vsub.f32 %v5378_v31, %v1543_v63 }
 0x6a6   :  { %1604 = vmin.xlane.f32.xlu0 %v1603_v14  ;;  %v4096_v27 = vpop.f32.mrf.mxu0 }
 0x6a7   :  { %v5407_v54 = vsub.f32 %v5378_v31, %v1535_v32  ;;  %v1546_v3 = vadd.f32 %v4096_v27, %v5373_v35  ;;  %v1618_v16 = vsel %vm630_vm2, %v5410_v17, inf }
 0x6a8   :  { %v1537_v6 = vpop.f32.mrf.mxu0 }
 0x6a9   :  { %v1538_v13 = vadd.f32 %v1537_v6, %v5373_v35  ;;  %v1612_v12 = vsel %vm630_vm2, %v5407_v54, inf  ;;  %v5426_v1 = vsub.f32 %v5378_v31, %v1546_v3 }
 0x6aa   :  { %1613 = vmin.xlane.f32.xlu0 %v1612_v12  ;;  %v4099_v25 = vpop.f32.mrf.mxu0 }
 0x6ab   :  { %v5417_v36 = vsub.f32 %v5378_v31, %v1538_v13  ;;  %v1559_v7 = vadd.f32 %v4099_v25, %v5373_v35  ;;  %v1621_v30 = vsel %vm630_vm2, %v5426_v1, inf }
 0x6ac   :  { %v1550_v15 = vpop.f32.mrf.mxu0 }
 0x6ad   :  { %v1551_v19 = vadd.f32 %v1550_v15, %v5373_v35  ;;  %v1615_v9 = vsel %vm630_vm2, %v5417_v36, inf  ;;  %v5438_v4 = vsub.f32 %v5378_v31, %v1559_v7 }
 0x6ae   :  { %1616 = vmin.xlane.f32.xlu1 %v1615_v9  ;;  %1619 = vmin.xlane.f32.xlu0 %v1618_v16  ;;  %v4100_v5 = vpop.f32.mrf.mxu0 }
 0x6af   :  { %v5429_v18 = vsub.f32 %v5378_v31, %v1551_v19  ;;  %v1562_v11 = vadd.f32 %v4100_v5, %v5373_v35  ;;  %v1630_v23 = vsel %vm630_vm2, %v5438_v4, inf }
 0x6b0   :  { %v1553_v22 = vpop.f32.mrf.mxu0 }
 0x6b1   :  { %v1554_v20 = vadd.f32 %v1553_v22, %v5373_v35  ;;  %v1624_v53 = vsel %vm630_vm2, %v5429_v18, inf  ;;  %v5444_v40 = vsub.f32 %v5378_v31, %v1562_v11 }
 0x6b2   :  { %1622 = vmin.xlane.f32.xlu1 %v1621_v30  ;;  %1625 = vmin.xlane.f32.xlu0 %v1624_v53  ;;  %v4103_v34 = vpop.f32.mrf.mxu0 }
 0x6b3   :  { %v5441_v2 = vsub.f32 %v5378_v31, %v1554_v20  ;;  %v1575_v43 = vadd.f32 %v4103_v34, %v5373_v35  ;;  %v1633_v41 = vsel %vm630_vm2, %v5444_v40, inf }
 0x6b4   :  { %v1566_v51 = vpop.f32.mrf.mxu0 }
 0x6b5   :  { %v1567_v46 = vadd.f32 %v1566_v51, %v5373_v35  ;;  %v1627_v24 = vsel %vm630_vm2, %v5441_v2, inf  ;;  %v5462_v52 = vsub.f32 %v5378_v31, %v1575_v43 }
 0x6b6   :  { %1628 = vmin.xlane.f32.xlu1 %v1627_v24  ;;  %1631 = vmin.xlane.f32.xlu0 %v1630_v23  ;;  %v4104_v28 = vpop.f32.mrf.mxu0 }
 0x6b7   :  { %v5453_v44 = vsub.f32 %v5378_v31, %v1567_v46  ;;  %v1578_v48 = vadd.f32 %v4104_v28, %v5373_v35  ;;  %v1642_v39 = vsel %vm630_vm2, %v5462_v52, inf }
 0x6b8   :  { %v1569_v26 = vpop.f32.mrf.mxu0 }
 0x6b9   :  { %v1570_v37 = vadd.f32 %v1569_v26, %v5373_v35  ;;  %v1636_v55 = vsel %vm630_vm2, %v5453_v44, inf  ;;  %v5472_v60 = vsub.f32 %v5378_v31, %v1578_v48 }
 0x6ba   :  { %1634 = vmin.xlane.f32.xlu1 %v1633_v41  ;;  %1637 = vmin.xlane.f32.xlu0 %v1636_v55 }
 0x6bb   :  { %v5465_v61 = vsub.f32 %v5378_v31, %v1570_v37  ;;  %v1645_v35 = vsel %vm630_vm2, %v5472_v60, inf }
 0x6bd   :  { %v1639_v10 = vsel %vm630_vm2, %v5465_v61, inf }
 0x6be   :  { %1640 = vmin.xlane.f32.xlu1 %v1639_v10  ;;  %1643 = vmin.xlane.f32.xlu0 %v1642_v39 }
 0x6c2   :  { %1646 = vmin.xlane.f32.xlu1 %v1645_v35 }
 0x729   :  { %v1608_v33 = vpop.xlane.xlu1 %1607 }
 0x72a   :  { %vm1650_vm5 = vcmp.le.f32.partialorder %v5383_v29, %v1608_v33 }
 0x72b   :  { %v1666_v45 = vsel %vm1650_vm5, %v5477_v62, 16  ;;  %v1602_v57 = vpop.xlane.xlu0 %1601 }
 0x72c   :  { %vm1648_vm6 = vcmp.le.f32.partialorder %v5389_v56, %v1602_v57  ;;  %v5484_v50 = vsel %vm630_vm2, %v1666_v45, 2147483647 }
 0x72d   :  { %v1664_v31 = vsel %vm1648_vm6, %v5477_v62, 16  ;;  %v1611_v47 = vpop.xlane.xlu1 %1610  ;;  %v1712_v49 = vshra.s32 %v5484_v50, 16 }
 0x72e   :  { %v5487_v38 = vsel %vm630_vm2, %v1664_v31, 2147483647  ;;  %vm1651_vm7 = vcmp.le.f32.partialorder %v5395_v42, %v1611_v47 }
 0x72f   :  { %v1667_v8 = vsel %vm1651_vm7, %v5477_v62, 16  ;;  %v1605_v21 = vpop.xlane.xlu0 %1604  ;;  %v1682_v29 = vshra.s32 %v5487_v38, 16  ;;  %v5509_v3 = vcvt.s32.f32 %v1712_v49 }
 0x730   :  { %vm1649_vm8 = vcmp.le.f32.partialorder %v5400_v58, %v1605_v21  ;;  %v5498_v32 = vsel %vm630_vm2, %v1667_v8, 2147483647 }
 0x731   :  { %v1665_v56 = vsel %vm1649_vm8, %v5477_v62, 16  ;;  %v5494_v63 = vcvt.s32.f32 %v1682_v29  ;;  %v1727_v13 = vshra.s32 %v5498_v32, 16 }
 0x732   :  { %v5501_v14 = vsel %vm630_vm2, %v1665_v56, 2147483647 }
 0x733   :  { %v1614_v42 = vpop.xlane.xlu0 %1613  ;;  %1685 = vmin.xlane.f32.xlu0 %v5494_v63  ;;  %v1697_v27 = vshra.s32 %v5501_v14, 16  ;;  %v5522_v19 = vcvt.s32.f32 %v1727_v13 }
 0x734   :  { %vm1652_vm9 = vcmp.le.f32.partialorder %v5407_v54, %v1614_v42 }
 0x735   :  { %v1668_v58 = vsel %vm1652_vm9, %v5477_v62, 16  ;;  %v5507_v6 = vcvt.s32.f32 %v1697_v27 }
 0x736   :  { %v5513_v12 = vsel %vm630_vm2, %v1668_v58, 2147483647 }
 0x737   :  { %v1617_v25 = vpop.xlane.xlu1 %1616  ;;  %v1620_v15 = vpop.xlane.xlu0 %1619  ;;  %1700 = vmin.xlane.f32.xlu1 %v5507_v6  ;;  %1715 = vmin.xlane.f32.xlu0 %v5509_v3  ;;  %v1742_v16 = vshra.s32 %v5513_v12, 16 }
 0x738   :  { %vm1653_vm10 = vcmp.le.f32.partialorder %v5417_v36, %v1617_v25  ;;  %vm1654_vm11 = vcmp.le.f32.partialorder %v5410_v17, %v1620_v15 }
 0x739   :  { %v1669_v54 = vsel %vm1653_vm10, %v5477_v62, 16  ;;  %v1670_v7 = vsel %vm1654_vm11, %v5477_v62, 16  ;;  %v5524_v9 = vcvt.s32.f32 %v1742_v16 }
 0x73a   :  { %v5527_v5 = vsel %vm630_vm2, %v1669_v54, 2147483647  ;;  %v5530_v11 = vsel %vm630_vm2, %v1670_v7, 2147483647 }
 0x73b   :  { %v1623_v22 = vpop.xlane.xlu1 %1622  ;;  %v1626_v20 = vpop.xlane.xlu0 %1625  ;;  %1730 = vmin.xlane.f32.xlu1 %v5522_v19  ;;  %1745 = vmin.xlane.f32.xlu0 %v5524_v9  ;;  %v1757_v17 = vshra.s32 %v5527_v5, 16  ;;  %v1772_v36 = vshra.s32 %v5530_v11, 16 }
 0x73c   :  { %vm1655_vm12 = vcmp.le.f32.partialorder %v5426_v1, %v1623_v22  ;;  %vm1656_vm13 = vcmp.le.f32.partialorder %v5429_v18, %v1626_v20  ;;  %v1681_v20 = vand.u32 65535, %v5487_v38  ;;  %v1726_v38 = vand.u32 65535, %v5498_v32 }
 0x73d   :  { %v1671_v30 = vsel %vm1655_vm12, %v5477_v62, 16  ;;  %v1672_v53 = vsel %vm1656_vm13, %v5477_v62, 16  ;;  %v5540_v34 = vcvt.s32.f32 %v1757_v17  ;;  %v5542_v51 = vcvt.s32.f32 %v1772_v36 }
 0x73e   :  { %v5545_v43 = vsel %vm630_vm2, %v1671_v30, 2147483647  ;;  %v5548_v46 = vsel %vm630_vm2, %v1672_v53, 2147483647  ;;  %v1683_v36 = vcvt.s32.f32 %v1681_v20  ;;  %v1696_v30 = vand.u32 65535, %v5501_v14 }
 0x73f   :  { %v1629_v24 = vpop.xlane.xlu1 %1628  ;;  %v1632_v23 = vpop.xlane.xlu0 %1631  ;;  %1760 = vmin.xlane.f32.xlu1 %v5540_v34  ;;  %1775 = vmin.xlane.f32.xlu0 %v5542_v51  ;;  %v1787_v1 = vshra.s32 %v5545_v43, 16  ;;  %v1802_v18 = vshra.s32 %v5548_v46, 16  ;;  %v1711_v53 = vand.u32 65535, %v5484_v50  ;;  %v1756_v32 = vand.u32 65535, %v5527_v5 }
 0x740   :  { %vm1657_vm14 = vcmp.le.f32.partialorder %v5441_v2, %v1629_v24  ;;  %vm1658_vm15 = vcmp.le.f32.partialorder %v5438_v4, %v1632_v23  ;;  %v1786_v5 = vand.u32 65535, %v5545_v43 }
 0x741   :  { %v1673_v28 = vsel %vm1657_vm14, %v5477_v62, 16  ;;  %v1674_v26 = vsel %vm1658_vm15, %v5477_v62, 16  ;;  %v5558_v41 = vcvt.s32.f32 %v1787_v1  ;;  %v5560_v48 = vcvt.s32.f32 %v1802_v18 }
 0x742   :  { %v5563_v37 = vsel %vm630_vm2, %v1673_v28, 2147483647  ;;  %v5566_v55 = vsel %vm630_vm2, %v1674_v26, 2147483647  ;;  %v1698_v18 = vcvt.s32.f32 %v1696_v30  ;;  %v1713_v28 = vcvt.s32.f32 %v1711_v53 }
 0x743   :  { %v1635_v10 = vpop.xlane.xlu1 %1634  ;;  %1790 = vmin.xlane.f32.xlu1 %v5558_v41  ;;  %1805 = vmin.xlane.f32.xlu0 %v5560_v48  ;;  %v1638_v4 = vpop.xlane.xlu0 %1637  ;;  %v1817_v2 = vshra.s32 %v5563_v37, 16  ;;  %v1832_v39 = vshra.s32 %v5566_v55, 16  ;;  %v1741_v26 = vand.u32 65535, %v5513_v12  ;;  %v1771_v12 = vand.u32 65535, %v5530_v11 }
 0x744   :  { %vm1659_vm5 = vcmp.le.f32.partialorder %v5444_v40, %v1635_v10  ;;  %vm1660_vm6 = vcmp.le.f32.partialorder %v5453_v44, %v1638_v4  ;;  %v1728_v4 = vcvt.s32.f32 %v1726_v38  ;;  %v1801_v11 = vand.u32 65535, %v5548_v46 }
 0x745   :  { %v1675_v35 = vsel %vm1659_vm5, %v5477_v62, 16  ;;  %v1676_v33 = vsel %vm1660_vm6, %v5477_v62, 16  ;;  %v5576_v45 = vcvt.s32.f32 %v1817_v2  ;;  %v5578_v57 = vcvt.s32.f32 %v1832_v39 }
 0x746   :  { %v5581_v31 = vsel %vm630_vm2, %v1675_v35, 2147483647  ;;  %v5584_v47 = vsel %vm630_vm2, %v1676_v33, 2147483647  ;;  %v1743_v2 = vcvt.s32.f32 %v1741_v26  ;;  %v1758_v33 = vcvt.s32.f32 %v1756_v32 }
 0x747   :  { %1820 = vmin.xlane.f32.xlu1 %v5576_v45  ;;  %v1641_v8 = vpop.xlane.xlu1 %1640  ;;  %1835 = vmin.xlane.f32.xlu0 %v5578_v57  ;;  %v1644_v40 = vpop.xlane.xlu0 %1643  ;;  %v1847_v44 = vshra.s32 %v5581_v31, 16  ;;  %v1862_v21 = vshra.s32 %v5584_v47, 16  ;;  %v1816_v43 = vand.u32 65535, %v5563_v37  ;;  %v1831_v46 = vand.u32 65535, %v5566_v55 }
 0x748   :  { %vm1661_vm7 = vcmp.le.f32.partialorder %v5465_v61, %v1641_v8  ;;  %vm1662_vm8 = vcmp.le.f32.partialorder %v5462_v52, %v1644_v40  ;;  %v1773_v8 = vcvt.s32.f32 %v1771_v12  ;;  %v1846_v37 = vand.u32 65535, %v5581_v31 }
 0x749   :  { %v1677_v29 = vsel %vm1661_vm7, %v5477_v62, 16  ;;  %v1678_v56 = vsel %vm1662_vm8, %v5477_v62, 16  ;;  %v5594_v49 = vcvt.s32.f32 %v1847_v44  ;;  %v5596_v42 = vcvt.s32.f32 %v1862_v21 }
 0x74a   :  { %v5599_v27 = vsel %vm630_vm2, %v1677_v29, 2147483647  ;;  %v5602_v58 = vsel %vm630_vm2, %v1678_v56, 2147483647  ;;  %v1788_v21 = vcvt.s32.f32 %v1786_v5  ;;  %v1803_v29 = vcvt.s32.f32 %v1801_v11 }
 0x74b   :  { %1850 = vmin.xlane.f32.xlu1 %v5594_v49  ;;  %v1647_v13 = vpop.xlane.xlu1 %1646  ;;  %1865 = vmin.xlane.f32.xlu0 %v5596_v42  ;;  %v1877_v52 = vshra.s32 %v5599_v27, 16  ;;  %v1892_v61 = vshra.s32 %v5602_v58, 16  ;;  %v1861_v55 = vand.u32 65535, %v5584_v47  ;;  %v1876_v31 = vand.u32 65535, %v5599_v27 }
 0x74c   :  { %vm1663_vm9 = vcmp.le.f32.partialorder %v5472_v60, %v1647_v13  ;;  %v4293_v60 = vld [vmem:[#allocation3 + $0x150] ss:$8 sps:$4 sm:$0xff]   ;;  %v1891_v47 = vand.u32 65535, %v5602_v58 }
 0x74d   :  { %v1679_v25 = vsel %vm1663_vm9, %v5477_v62, 16  ;;  %v5610_v15 = vcvt.s32.f32 %v1877_v52  ;;  %v5612_v16 = vcvt.s32.f32 %v1892_v61  ;;  %4141 = vmatprep.subr.bf16.mxu1 %v4293_v60  ;;  %v1818_v52 = vcvt.s32.f32 %v1816_v43  ;;  %v4294_v58 = vld [vmem:[#allocation3 + $0x130] ss:$8 sps:$4 sm:$0xff]  }
 0x74e   :  { %v5615_v54 = vsel %vm630_vm2, %v1679_v25, 2147483647  ;;  %4142 = vmatpush3.bf16.msra.mxu1 %v4293_v60  ;;  %v1833_v61 = vcvt.s32.f32 %v1831_v46  ;;  %v1848_v60 = vcvt.s32.f32 %v1846_v37  ;;  %v1863_v20 = vcvt.s32.f32 %v1861_v55  ;;  %4123 = vmatprep.subr.bf16.mxu0 %v4294_v58 }
 0x74f   :  { %1880 = vmin.xlane.f32.xlu1 %v5610_v15  ;;  %1895 = vmin.xlane.f32.xlu0 %v5612_v16  ;;  %v1907_v7 = vshra.s32 %v5615_v54, 16  ;;  %v1878_v53 = vcvt.s32.f32 %v1876_v31  ;;  %v1906_v27 = vand.u32 65535, %v5615_v54  ;;  %v4532_v54 = vmov 0.0  }
 0x750   :  { %4124 = vmatpush3.bf16.msra.mxu0 %v4294_v58 }
 0x751   :  { %v5620_v22 = vcvt.s32.f32 %v1907_v7  ;;  %4159 = vmatprep.subr.bf16.mxu0 %v4532_v54 }
 0x753   :  { %1910 = vmin.xlane.f32.xlu1 %v5620_v22 }
 0x7bc   :  { %v5624_v17 = vpop.xlane.xlu0 %1685 }
 0x7bd   :  { %vm1687_vm10 = vcmp.eq.f32.partialorder %v5494_v63, %v5624_v17 }
 0x7be   :  { %v1688_v24 = vsel %vm1687_vm10, %v1683_v36, inf }
 0x7bf   :  { %1689 = vmin.xlane.f32.xlu0 %v1688_v24  ;;  %v1893_v24 = vcvt.s32.f32 %v1891_v47 }
 0x7c0   :  { %v5630_v23 = vpop.xlane.xlu1 %1700  ;;  %v5632_v1 = vpop.xlane.xlu0 %1715 }
 0x7c1   :  { %vm1702_vm11 = vcmp.eq.f32.partialorder %v5507_v6, %v5630_v23  ;;  %vm1717_vm12 = vcmp.eq.f32.partialorder %v5509_v3, %v5632_v1  ;;  %v1707_v26 = vcvt.f32.s32 %v5630_v23 }
 0x7c2   :  { %v1703_v50 = vsel %vm1702_vm11, %v1698_v18, inf  ;;  %v1718_v63 = vsel %vm1717_vm12, %v1713_v28, inf  ;;  %v1908_v28 = vcvt.s32.f32 %v1906_v27 }
 0x7c3   :  { %1704 = vmin.xlane.f32.xlu1 %v1703_v50  ;;  %1719 = vmin.xlane.f32.xlu0 %v1718_v63  ;;  %v1708_v32 = vshll.u32 %v1707_v26, 16 }
 0x7c4   :  { %v5640_v14 = vpop.xlane.xlu1 %1730  ;;  %v5642_v10 = vpop.xlane.xlu0 %1745 }
 0x7c5   :  { %vm1732_vm13 = vcmp.eq.f32.partialorder %v5522_v19, %v5640_v14  ;;  %vm1747_vm14 = vcmp.eq.f32.partialorder %v5524_v9, %v5642_v10  ;;  %v1737_v12 = vcvt.f32.s32 %v5640_v14 }
 0x7c6   :  { %v1733_v6 = vsel %vm1732_vm13, %v1728_v4, inf  ;;  %v1748_v3 = vsel %vm1747_vm14, %v1743_v2, inf  ;;  %v1722_v4 = vcvt.f32.s32 %v5632_v1 }
 0x7c7   :  { %1734 = vmin.xlane.f32.xlu1 %v1733_v6  ;;  %1749 = vmin.xlane.f32.xlu0 %v1748_v3 }
 0x7c8   :  { %v5650_v39 = vpop.xlane.xlu1 %1760  ;;  %v5652_v35 = vpop.xlane.xlu0 %1775 }
 0x7c9   :  { %vm1762_vm15 = vcmp.eq.f32.partialorder %v5540_v34, %v5650_v39  ;;  %vm1777_vm5 = vcmp.eq.f32.partialorder %v5542_v51, %v5652_v35  ;;  %v1782_v1 = vcvt.f32.s32 %v5652_v35 }
 0x7ca   :  { %v1763_v19 = vsel %vm1762_vm15, %v1758_v33, inf  ;;  %v1778_v9 = vsel %vm1777_vm5, %v1773_v8, inf  ;;  %v1723_v33 = vshll.u32 %v1722_v4, 16  ;;  %v1752_v8 = vcvt.f32.s32 %v5642_v10 }
 0x7cb   :  { %1764 = vmin.xlane.f32.xlu1 %v1763_v19  ;;  %1779 = vmin.xlane.f32.xlu0 %v1778_v9  ;;  %v1738_v19 = vshll.u32 %v1737_v12, 16  ;;  %v1767_v9 = vcvt.f32.s32 %v5650_v39  ;;  %v1783_v37 = vshll.u32 %v1782_v1, 16 }
 0x7cc   :  { %v5660_v40 = vpop.xlane.xlu1 %1790  ;;  %v5662_v44 = vpop.xlane.xlu0 %1805  ;;  %v1753_v43 = vshll.u32 %v1752_v8, 16 }
 0x7cd   :  { %vm1792_vm6 = vcmp.eq.f32.partialorder %v5558_v41, %v5660_v40  ;;  %vm1807_vm7 = vcmp.eq.f32.partialorder %v5560_v48, %v5662_v44  ;;  %v1768_v39 = vshll.u32 %v1767_v9, 16  ;;  %v1797_v35 = vcvt.f32.s32 %v5660_v40 }
 0x7ce   :  { %v1793_v34 = vsel %vm1792_vm6, %v1788_v21, inf  ;;  %v1808_v51 = vsel %vm1807_vm7, %v1803_v29, inf }
 0x7cf   :  { %1794 = vmin.xlane.f32.xlu1 %v1793_v34  ;;  %1809 = vmin.xlane.f32.xlu0 %v1808_v51 }
 0x7d0   :  { %v5670_v56 = vpop.xlane.xlu1 %1820  ;;  %v5672_v13 = vpop.xlane.xlu0 %1835 }
 0x7d1   :  { %vm1822_vm8 = vcmp.eq.f32.partialorder %v5576_v45, %v5670_v56  ;;  %vm1837_vm9 = vcmp.eq.f32.partialorder %v5578_v57, %v5672_v13  ;;  %v1842_v27 = vcvt.f32.s32 %v5672_v13 }
 0x7d2   :  { %v1823_v41 = vsel %vm1822_vm8, %v1818_v52, inf  ;;  %v1838_v48 = vsel %vm1837_vm9, %v1833_v61, inf }
 0x7d3   :  { %1824 = vmin.xlane.f32.xlu1 %v1823_v41  ;;  %1839 = vmin.xlane.f32.xlu0 %v1838_v48  ;;  %v1812_v48 = vcvt.f32.s32 %v5662_v44 }
 0x7d4   :  { %v5680_v25 = vpop.xlane.xlu1 %1850  ;;  %v5682_v7 = vpop.xlane.xlu0 %1865 }
 0x7d5   :  { %vm1852_vm10 = vcmp.eq.f32.partialorder %v5594_v49, %v5680_v25  ;;  %vm1867_vm11 = vcmp.eq.f32.partialorder %v5596_v42, %v5682_v7  ;;  %v1813_v58 = vshll.u32 %v1812_v48, 16  ;;  %v1857_v4 = vcvt.f32.s32 %v5680_v25 }
 0x7d6   :  { %v1853_v45 = vsel %vm1852_vm10, %v1848_v60, inf  ;;  %v1868_v57 = vsel %vm1867_vm11, %v1863_v20, inf }
 0x7d7   :  { %1854 = vmin.xlane.f32.xlu1 %v1853_v45  ;;  %1869 = vmin.xlane.f32.xlu0 %v1868_v57 }
 0x7d8   :  { %v5690_v36 = vpop.xlane.xlu1 %1880  ;;  %v5692_v30 = vpop.xlane.xlu0 %1895 }
 0x7d9   :  { %vm1882_vm12 = vcmp.eq.f32.partialorder %v5610_v15, %v5690_v36  ;;  %vm1897_vm13 = vcmp.eq.f32.partialorder %v5612_v16, %v5692_v30  ;;  %v2457_v15 = vld [vmem:[#allocation3 + $0x160] sm:$0xf]  ;;  %v1692_v16 = vcvt.f32.s32 %v5624_v17 }
 0x7da   :  { %v1883_v49 = vsel %vm1882_vm12, %v1878_v53, inf  ;;  %v1898_v42 = vsel %vm1897_vm13, %v1893_v24, inf  ;;  %4260 = vmatprep.subr.msk.bf16.mxu1 %vm1153_vm3, %v2457_v15  ;;  %v2483_v40 = vsel %vm1153_vm3, %v2457_v15, 0  ;;  %v1798_v53 = vshll.u32 %v1797_v35, 16 }
 0x7db   :  { %1884 = vmin.xlane.f32.xlu1 %v1883_v49  ;;  %1899 = vmin.xlane.f32.xlu0 %v1898_v42  ;;  %v1693_v63 = vshll.u32 %v1692_v16, 16  ;;  %v1827_v24 = vcvt.f32.s32 %v5670_v56 }
 0x7dc   :  { %v5699_v18 = vpop.xlane.xlu1 %1910 }
 0x7dd   :  { %vm1912_vm14 = vcmp.eq.f32.partialorder %v5620_v22, %v5699_v18 }
 0x7de   :  { %v1913_v38 = vsel %vm1912_vm14, %v1908_v28, inf }
 0x7df   :  { %1914 = vmin.xlane.f32.xlu1 %v1913_v38 }
 0x848   :  { %v1690_v50 = vpop.xlane.xlu0 %1689 }
 0x849   :  { %v1691_v2 = vcvt.f32.s32 %v1690_v50  ;;  %v1828_v50 = vshll.u32 %v1827_v24, 16 }
 0x84b   :  { %v1694_v22 = vadd.s32 %v1693_v63, %v1691_v2  ;;  %v1843_v63 = vshll.u32 %v1842_v27, 16 }
 0x84c   :  { %v1705_v6 = vpop.xlane.xlu1 %1704  ;;  %v1720_v3 = vpop.xlane.xlu0 %1719 }
 0x84d   :  { %v1706_v5 = vcvt.f32.s32 %v1705_v6  ;;  %v1721_v11 = vcvt.f32.s32 %v1720_v3  ;;  %vm1920_vm15 = vcmp.eq.s32.totalorder %v5477_v62, %v1694_v22 }
 0x84e   :  { %v3800_v10 = vsel %vm1920_vm15, 1.0, %v4532_v54 }
 0x84f   :  { %v1709_v17 = vadd.s32 %v1708_v32, %v1706_v5  ;;  %v1724_v23 = vadd.s32 %v1723_v33, %v1721_v11  ;;  %v1872_v32 = vcvt.f32.s32 %v5682_v7  ;;  %v1858_v5 = vshll.u32 %v1857_v4, 16 }
 0x850   :  { %v1735_v21 = vpop.xlane.xlu1 %1734  ;;  %v1750_v29 = vpop.xlane.xlu0 %1749  ;;  %v1887_v11 = vcvt.f32.s32 %v5690_v36 }
 0x851   :  { %vm1921_vm5 = vcmp.eq.s32.totalorder %v5477_v62, %v1709_v17  ;;  %v1736_v14 = vcvt.f32.s32 %v1735_v21  ;;  %v1751_v46 = vcvt.f32.s32 %v1750_v29  ;;  %vm1922_vm6 = vcmp.eq.s32.totalorder %v5477_v62, %v1724_v23 }
 0x852   :  { %v3801_v34 = vsel %vm1921_vm5, 1.0, %v4532_v54  ;;  %v3802_v31 = vsel %vm1922_vm6, 1.0, %v4532_v54  ;;  %v1902_v17 = vcvt.f32.s32 %v5692_v30  ;;  %v1873_v9 = vshll.u32 %v1872_v32, 16 }
 0x853   :  { %v5716_v51 = vpack.c.bf16 %v3801_v34, %v3800_v10  ;;  %v1739_v52 = vadd.s32 %v1738_v19, %v1736_v14  ;;  %v1754_v61 = vadd.s32 %v1753_v43, %v1751_v46  ;;  %v1888_v46 = vshll.u32 %v1887_v11, 16 }
 0x854   :  { %v1765_v55 = vpop.xlane.xlu1 %1764  ;;  %v1780_v41 = vpop.xlane.xlu0 %1779  ;;  %v1903_v10 = vshll.u32 %v1902_v17, 16 }
 0x855   :  { %vm1923_vm7 = vcmp.eq.s32.totalorder %v5477_v62, %v1739_v52  ;;  %v1766_v60 = vcvt.f32.s32 %v1765_v55  ;;  %v1781_v20 = vcvt.f32.s32 %v1780_v41  ;;  %4125 = vmatprep.mubr.msk.bf16.mxu0 %vm630_vm2, %v5716_v51  ;;  %4143 = vmatprep.mubr.msk.bf16.mxu1 %vm630_vm2, %v5716_v51  ;;  %vm1924_vm8 = vcmp.eq.s32.totalorder %v5477_v62, %v1754_v61 }
 0x856   :  { %v3803_v47 = vsel %vm1923_vm7, 1.0, %v4532_v54  ;;  %v3804_v15 = vsel %vm1924_vm8, 1.0, %v4532_v54  ;;  %v1917_v61 = vcvt.f32.s32 %v5699_v18 }
 0x857   :  { %v5729_v45 = vpack.c.bf16 %v3803_v47, %v3802_v31  ;;  %v1769_v44 = vadd.s32 %v1768_v39, %v1766_v60  ;;  %v1784_v57 = vadd.s32 %v1783_v37, %v1781_v20 }
 0x858   :  { %v1795_v49 = vpop.xlane.xlu1 %1794  ;;  %v1810_v42 = vpop.xlane.xlu0 %1809  ;;  %v1918_v31 = vshll.u32 %v1917_v61, 16 }
 0x859   :  { %vm1925_vm9 = vcmp.eq.s32.totalorder %v5477_v62, %v1769_v44  ;;  %v1796_v28 = vcvt.f32.s32 %v1795_v49  ;;  %v1811_v38 = vcvt.f32.s32 %v1810_v42  ;;  %4126 = vmatmul.mubr.msk.bf16.vlgmr.msra.gmra.mxu0 %vm630_vm2, %v5729_v45  ;;  %4144 = vmatmul.mubr.msk.bf16.vlgmr.msra.gmra.mxu1 %vm630_vm2, %v5729_v45  ;;  %vm1926_vm10 = vcmp.eq.s32.totalorder %v5477_v62, %v1784_v57 }
 0x85a   :  { %v3805_v16 = vsel %vm1925_vm9, 1.0, %v4532_v54  ;;  %4180 = vmatpush3.bf16.msra.mxu1 %v2483_v40  ;;  %v3806_v3 = vsel %vm1926_vm10, 1.0, %v4532_v54  ;;  %vm4533_vm9 = vmmov 0  }
 0x85b   :  { %v5741_v56 = vpack.c.bf16 %v3805_v16, %v3804_v15  ;;  %v1799_v13 = vadd.s32 %v1798_v53, %v1796_v28  ;;  %v1814_v26 = vadd.s32 %v1813_v58, %v1811_v38  ;;  %v2090_v16 = vsel %vm630_vm2, %v5729_v45, 0 }
 0x85c   :  { %v1825_v2 = vpop.xlane.xlu1 %1824  ;;  %v1840_v22 = vpop.xlane.xlu0 %1839 }
 0x85d   :  { %vm1927_vm11 = vcmp.eq.s32.totalorder %v5477_v62, %v1799_v13  ;;  %v1826_v12 = vcvt.f32.s32 %v1825_v2  ;;  %v1841_v6 = vcvt.f32.s32 %v1840_v22  ;;  %4129 = vmatprep.mubr.msk.bf16.mxu0 %vm630_vm2, %v5741_v56  ;;  %4147 = vmatprep.mubr.msk.bf16.mxu1 %vm630_vm2, %v5741_v56  ;;  %vm1928_vm12 = vcmp.eq.s32.totalorder %v5477_v62, %v1814_v26  ;;  %v4109_v26 = vpop.f32.mrf.mxu1 }
 0x85e   :  { %v3807_v33 = vsel %vm1927_vm11, 1.0, %v4532_v54  ;;  %v3808_v29 = vsel %vm1928_vm12, 1.0, %v4532_v54  ;;  %v2093_v15 = vsel %vm630_vm2, %v5741_v56, 0  ;;  %v2087_v13 = vsel %vm630_vm2, %v5716_v51, 0 }
 0x85f   :  { %v5753_v8 = vpack.c.bf16 %v3807_v33, %v3806_v3  ;;  %v1829_v25 = vadd.s32 %v1828_v50, %v1826_v12  ;;  %v1844_v7 = vadd.s32 %v1843_v63, %v1841_v6  ;;  %v2015_v50 = vpop.f32.mrf.mxu1 }
 0x860   :  { %v1855_v23 = vpop.xlane.xlu1 %1854  ;;  %v1870_v19 = vpop.xlane.xlu0 %1869 }
 0x861   :  { %vm1929_vm13 = vcmp.eq.s32.totalorder %v5477_v62, %v1829_v25  ;;  %v1856_v1 = vcvt.f32.s32 %v1855_v23  ;;  %v1871_v21 = vcvt.f32.s32 %v1870_v19  ;;  %4130 = vmatmul.mubr.msk.bf16.gmra.mxu0 %vm630_vm2, %v5753_v8  ;;  %4148 = vmatmul.mubr.msk.bf16.gmra.mxu1 %vm630_vm2, %v5753_v8  ;;  %vm1930_vm14 = vcmp.eq.s32.totalorder %v5477_v62, %v1844_v7  ;;  %v4110_v63 = vpop.f32.mrf.mxu1  ;;  %v5824_v7 = vld [vmem:[%s6515_s2 + $0x11] ss:$0 sm:$0xff] }
 0x862   :  { %v3809_v43 = vsel %vm1929_vm13, 1.0, %v4532_v54  ;;  %v3810_v35 = vsel %vm1930_vm14, 1.0, %v4532_v54  ;;  %v2096_v38 = vsel %vm630_vm2, %v5753_v8, 0  ;;  %v2016_v17 = vadd.f32 %v2015_v50, %v5824_v7 }
 0x863   :  { %v1972_v36 = vpack.c.bf16 %v3809_v43, %v3808_v29  ;;  %v1859_v30 = vadd.s32 %v1858_v5, %v1856_v1  ;;  %v1874_v14 = vadd.s32 %v1873_v9, %v1871_v21  ;;  %v2018_v4 = vpop.f32.mrf.mxu1  ;;  %v2024_v9 = vadd.f32 %v4109_v26, %v5824_v7  ;;  %v5831_v1 = vld [vmem:[%s6515_s2 + $0x14] ss:$0 sm:$0xff] }
 0x864   :  { %v1885_v34 = vpop.xlane.xlu1 %1884  ;;  %v1900_v52 = vpop.xlane.xlu0 %1899 }
 0x865   :  { %vm1931_vm15 = vcmp.eq.s32.totalorder %v5477_v62, %v1859_v30  ;;  %v1886_v39 = vcvt.f32.s32 %v1885_v34  ;;  %v1901_v37 = vcvt.f32.s32 %v1900_v52  ;;  %4133 = vmatprep.mubr.msk.bf16.mxu0 %vm630_vm2, %v1972_v36  ;;  %4151 = vmatprep.mubr.msk.bf16.mxu1 %vm630_vm2, %v1972_v36  ;;  %vm1932_vm5 = vcmp.eq.s32.totalorder %v5477_v62, %v1874_v14  ;;  %v4113_v2 = vpop.f32.mrf.mxu1 }
 0x866   :  { %v3811_v55 = vsel %vm1931_vm15, 1.0, %v4532_v54  ;;  %v3812_v47 = vsel %vm1932_vm5, 1.0, %v4532_v54  ;;  %v2099_v28 = vsel %vm630_vm2, %v1972_v36, 0  ;;  %v2027_v36 = vadd.f32 %v4110_v63, %v5824_v7 }
 0x867   :  { %v1973_v41 = vpack.c.bf16 %v3811_v55, %v3810_v35  ;;  %v1889_v48 = vadd.s32 %v1888_v46, %v1886_v39  ;;  %v1904_v60 = vadd.s32 %v1903_v10, %v1901_v37  ;;  %v2031_v22 = vpop.f32.mrf.mxu1  ;;  %v2019_v30 = vadd.f32 %v2018_v4, %v5824_v7 }
 0x868   :  { %v1915_v20 = vpop.xlane.xlu1 %1914 }
 0x869   :  { %vm1933_vm6 = vcmp.eq.s32.totalorder %v5477_v62, %v1889_v48  ;;  %v1916_v18 = vcvt.f32.s32 %v1915_v20  ;;  %4134 = vmatmul.mubr.msk.bf16.gmra.mxu0 %vm630_vm2, %v1973_v41  ;;  %4152 = vmatmul.mubr.msk.bf16.gmra.mxu1 %vm630_vm2, %v1973_v41  ;;  %vm1934_vm7 = vcmp.eq.s32.totalorder %v5477_v62, %v1904_v60  ;;  %v2102_v58 = vsel %vm630_vm2, %v1973_v41, 0  ;;  %v4114_v56 = vpop.f32.mrf.mxu1 }
 0x86a   :  { %v3813_v40 = vsel %vm1933_vm6, 1.0, %v4532_v54  ;;  %v3814_v53 = vsel %vm1934_vm7, 1.0, %v4532_v54  ;;  %v2032_v41 = vadd.f32 %v2031_v22, %v5824_v7 }
 0x86b   :  { %v1974_v44 = vpack.c.bf16 %v3813_v40, %v3812_v47  ;;  %v1919_v57 = vadd.s32 %v1918_v31, %v1916_v18  ;;  %v2034_v32 = vpop.f32.mrf.mxu1 }
 0x86d   :  { %vm1935_vm8 = vcmp.eq.s32.totalorder %v5477_v62, %v1919_v57  ;;  %4137 = vmatprep.mubr.msk.bf16.mxu0 %vm630_vm2, %v1974_v44  ;;  %4155 = vmatprep.mubr.msk.bf16.mxu1 %vm630_vm2, %v1974_v44  ;;  %v2105_v42 = vsel %vm630_vm2, %v1974_v44, 0  ;;  %v5805_v12 = vpop.f32.mrf.mxu1  ;;  %v2040_v44 = vadd.f32 %v4113_v2, %v5824_v7 }
 0x86e   :  { %v3815_v24 = vsel %vm1935_vm8, 1.0, %v4532_v54 }
 0x86f   :  { %v1975_v27 = vpack.c.bf16 %v3815_v24, %v3814_v53  ;;  %v5807_v6 = vpop.f32.mrf.mxu1 }
 0x871   :  { %4138 = vmatmul.mubr.msk.bf16.gmra.mxu0 %vm630_vm2, %v1975_v27  ;;  %4156 = vmatmul.mubr.msk.bf16.gmra.mxu1 %vm630_vm2, %v1975_v27  ;;  %v2108_v49 = vsel %vm630_vm2, %v1975_v27, 0  ;;  %v5809_v45 = vpop.f32.mrf.mxu1 }
 0x872   :  { %4160 = vmatpush3.bf16.xpose.msra.mxu0 %v2108_v49  ;;  %4175 = vmatprep.mubr.msk.bf16.mxu0 %vm4533_vm9, %v4532_v54 }
 0x873   :  { %4161 = vmatprep.subr.bf16.mxu0 %v4532_v54  ;;  %v5811_v3 = vpop.f32.mrf.mxu1 }
 0x875   :  { %v5813_v33 = vpop.f32.mrf.mxu1 }
 0x877   :  { %v5815_v51 = vpop.f32.mrf.mxu1 }
 0x879   :  { %v5817_v8 = vpop.f32.mrf.mxu1 }
 0x87a   :  { %4162 = vmatpush3.bf16.xpose.msra.mxu0 %v2105_v42 }
 0x87b   :  { %4163 = vmatprep.subr.bf16.mxu0 %v4532_v54  ;;  %v5819_v25 = vpop.f32.mrf.mxu1 }
 0x882   :  { %4164 = vmatpush3.bf16.xpose.msra.mxu0 %v2102_v58 }
 0x883   :  { %4165 = vmatprep.subr.bf16.mxu0 %v4532_v54 }
 0x88a   :  { %4166 = vmatpush3.bf16.xpose.msra.mxu0 %v2099_v28 }
 0x88b   :  { %4167 = vmatprep.subr.bf16.mxu0 %v4532_v54 }
 0x892   :  { %4168 = vmatpush3.bf16.xpose.msra.mxu0 %v2096_v38  ;;  %v2043_v38 = vadd.f32 %v4114_v56, %v5824_v7 }
 0x893   :  { %4169 = vmatprep.subr.bf16.mxu0 %v4532_v54 }
 0x89a   :  { %4170 = vmatpush3.bf16.xpose.msra.mxu0 %v2093_v15  ;;  %v2035_v15 = vadd.f32 %v2034_v32, %v5824_v7 }
 0x89b   :  { %4171 = vmatprep.subr.bf16.mxu0 %v4532_v54 }
 0x8a2   :  { %4172 = vmatpush3.bf16.xpose.msra.mxu0 %v2090_v16 }
 0x8a3   :  { %4173 = vmatprep.subr.bf16.mxu0 %v4532_v54 }
 0x8aa   :  { %4174 = vmatpush3.bf16.xpose.msra.mxu0 %v2087_v13 }
 0x919   :  { %v4127_v5 = vpop.f32.mrf.mxu0  ;;  %v4145_v11 = vpop.f32.mrf.mxu1 }
 0x91a   :  { %v2209_v14 = vsub.f32 %v4127_v5, %v2024_v9  ;;  %v5839_v10 = vadd.f32 %v4145_v11, %v5831_v1 }
 0x91b   :  { %v2144_v23 = vpop.f32.mrf.mxu0  ;;  %v2323_v19 = vpop.f32.mrf.mxu1 }
 0x91c   :  { %v2207_v21 = vsub.f32 %v2144_v23, %v2016_v17  ;;  %v5836_v46 = vadd.f32 %v2323_v19, %v5831_v1  ;;  %v2225_v31 = vmul.f32 %v2209_v14, %v2209_v14  ;;  %v2435_v57 = vmax.f32 %v5839_v10, 0.0 }
 0x91d   :  { %v4128_v29 = vpop.f32.mrf.mxu0  ;;  %v4146_v43 = vpop.f32.mrf.mxu1 }
 0x91e   :  { %v2223_v34 = vmul.f32 %v2207_v21, %v2207_v21  ;;  %v5842_v52 = vadd.f32 %v4146_v43, %v5831_v1  ;;  %v2210_v37 = vsub.f32 %v4128_v29, %v2027_v36  ;;  %v2433_v18 = vmax.f32 %v5836_v46, 0.0 }
 0x91f   :  { %v2147_v61 = vpop.f32.mrf.mxu0  ;;  %v2326_v39 = vpop.f32.mrf.mxu1  ;;  %v2242_v63 = vsel %vm630_vm2, %v2225_v31, 0.0  ;;  %v2056_v21 = vadd.f32 %v5805_v12, %v5824_v7  ;;  %v2048_v29 = vadd.f32 %v5807_v6, %v5824_v7 }
 0x920   :  { %v2208_v35 = vsub.f32 %v2147_v61, %v2019_v30  ;;  %v5845_v55 = vadd.f32 %v2326_v39, %v5831_v1  ;;  %v2436_v48 = vmax.f32 %v5842_v52, 0.0  ;;  %v2239_v53 = vsel %vm630_vm2, %v2223_v34, 0.0 }
 0x921   :  { %v4131_v60 = vpop.f32.mrf.mxu0  ;;  %v4149_v20 = vpop.f32.mrf.mxu1  ;;  %v2226_v49 = vmul.f32 %v2210_v37, %v2210_v37 }
 0x922   :  { %v2224_v47 = vmul.f32 %v2208_v35, %v2208_v35  ;;  %v2434_v40 = vmax.f32 %v5845_v55, 0.0  ;;  %v2450_v16 = vpack.c.bf16 %v2436_v48, %v2435_v57  ;;  %v2213_v4 = vsub.f32 %v4131_v60, %v2040_v44 }
 0x923   :  { %v2160_v24 = vpop.f32.mrf.mxu0  ;;  %v2339_v27 = vpop.f32.mrf.mxu1  ;;  %v2244_v32 = vsel %vm630_vm2, %v2226_v49, 0.0  ;;  %v5868_v23 = vadd.f32 %v4149_v20, %v5831_v1  ;;  %v2059_v35 = vadd.f32 %v5809_v45, %v5824_v7 }
 0x924   :  { %v2240_v42 = vsel %vm630_vm2, %v2224_v47, 0.0  ;;  %v2449_v58 = vpack.c.bf16 %v2434_v40, %v2433_v18  ;;  %v2211_v28 = vsub.f32 %v2160_v24, %v2032_v41  ;;  %v5863_v11 = vadd.f32 %v2339_v27, %v5831_v1 }
 0x925   :  { %v2241_v13 = vadd.f32 %v2240_v42, %v2239_v53  ;;  %v4132_v26 = vpop.f32.mrf.mxu0  ;;  %v4150_v50 = vpop.f32.mrf.mxu1  ;;  %v2229_v34 = vmul.f32 %v2213_v4, %v2213_v4  ;;  %v2439_v20 = vmax.f32 %v5868_v23, 0.0  ;;  %v2051_v27 = vadd.f32 %v5811_v3, %v5824_v7 }
 0x926   :  { %v2227_v2 = vmul.f32 %v2211_v28, %v2211_v28  ;;  %v5859_v22 = vadd.f32 %v4150_v50, %v5831_v1  ;;  %4181 = vmatprep.mubr.msk.bf16.mxu1 %vm945_vm4, %v2449_v58  ;;  %v2214_v19 = vsub.f32 %v4132_v26, %v2043_v38  ;;  %v2437_v12 = vmax.f32 %v5863_v11, 0.0 }
 0x927   :  { %v2243_v5 = vadd.f32 %v2242_v63, %v2241_v13  ;;  %v2163_v56 = vpop.f32.mrf.mxu0  ;;  %v2342_v17 = vpop.f32.mrf.mxu1  ;;  %4182 = vmatmul.mubr.msk.bf16.vlgmr.msra.gmra.mxu1 %vm945_vm4, %v2450_v16  ;;  %v2250_v49 = vsel %vm630_vm2, %v2229_v34, 0.0  ;;  %v2064_v4 = vadd.f32 %v5815_v51, %v5824_v7 }
 0x928   :  { %v2212_v9 = vsub.f32 %v2163_v56, %v2035_v15  ;;  %v5875_v36 = vadd.f32 %v2342_v17, %v5831_v1  ;;  %v2246_v61 = vsel %vm630_vm2, %v2227_v2, 0.0  ;;  %v2440_v39 = vmax.f32 %v5859_v22, 0.0 }
 0x929   :  { %v2245_v43 = vadd.f32 %v2244_v32, %v2243_v5  ;;  %v4135_v30 = vpop.f32.mrf.mxu0  ;;  %v4153_v14 = vpop.f32.mrf.mxu1  ;;  %v2230_v31 = vmul.f32 %v2214_v19, %v2214_v19 }
 0x92a   :  { %v2228_v37 = vmul.f32 %v2212_v9, %v2212_v9  ;;  %v2438_v6 = vmax.f32 %v5875_v36, 0.0  ;;  %v2217_v57 = vsub.f32 %v4135_v30, %v2056_v21  ;;  %v2452_v42 = vpack.c.bf16 %v2440_v39, %v2439_v20 }
 0x92b   :  { %v2247_v41 = vadd.f32 %v2246_v61, %v2245_v43  ;;  %v2176_v48 = vpop.f32.mrf.mxu0  ;;  %v2355_v60 = vpop.f32.mrf.mxu1  ;;  %v5892_v38 = vadd.f32 %v4153_v14, %v5831_v1  ;;  %v2252_v26 = vsel %vm630_vm2, %v2230_v31, 0.0  ;;  %v2072_v43 = vadd.f32 %v5813_v33, %v5824_v7 }
 0x92c   :  { %v2248_v18 = vsel %vm630_vm2, %v2228_v37, 0.0  ;;  %v2215_v47 = vsub.f32 %v2176_v48, %v2048_v29  ;;  %v2451_v44 = vpack.c.bf16 %v2438_v6, %v2437_v12  ;;  %v5886_v53 = vadd.f32 %v2355_v60, %v5831_v1 }
 0x92d   :  { %v2249_v40 = vadd.f32 %v2248_v18, %v2247_v41  ;;  %v4136_v45 = vpop.f32.mrf.mxu0  ;;  %v4154_v24 = vpop.f32.mrf.mxu1  ;;  %v2233_v2 = vmul.f32 %v2217_v57, %v2217_v57  ;;  %v2443_v30 = vmax.f32 %v5892_v38, 0.0  ;;  %v2075_v41 = vadd.f32 %v5817_v8, %v5824_v7 }
 0x92e   :  { %v2231_v58 = vmul.f32 %v2215_v47, %v2215_v47  ;;  %v5895_v15 = vadd.f32 %v4154_v24, %v5831_v1  ;;  %4185 = vmatprep.mubr.msk.bf16.mxu1 %vm945_vm4, %v2451_v44  ;;  %v2218_v50 = vsub.f32 %v4136_v45, %v2059_v35  ;;  %v2441_v56 = vmax.f32 %v5886_v53, 0.0 }
 0x92f   :  { %v2251_v28 = vadd.f32 %v2250_v49, %v2249_v40  ;;  %v2179_v16 = vpop.f32.mrf.mxu0  ;;  %v2358_v13 = vpop.f32.mrf.mxu1  ;;  %4186 = vmatmul.mubr.msk.bf16.gmra.mxu1 %vm945_vm4, %v2452_v42  ;;  %v2067_v12 = vadd.f32 %v5819_v25, %v5824_v7  ;;  %v2258_v6 = vsel %vm630_vm2, %v2233_v2, 0.0 }
 0x930   :  { %v2216_v63 = vsub.f32 %v2179_v16, %v2051_v27  ;;  %v5900_v3 = vadd.f32 %v2358_v13, %v5831_v1  ;;  %v2254_v19 = vsel %vm630_vm2, %v2231_v58, 0.0  ;;  %v2444_v9 = vmax.f32 %v5895_v15, 0.0 }
 0x931   :  { %v2253_v5 = vadd.f32 %v2252_v26, %v2251_v28  ;;  %v4139_v17 = vpop.f32.mrf.mxu0  ;;  %v4157_v32 = vpop.f32.mrf.mxu1  ;;  %v2234_v61 = vmul.f32 %v2218_v50, %v2218_v50 }
 0x932   :  { %v2232_v21 = vmul.f32 %v2216_v63, %v2216_v63  ;;  %v2442_v29 = vmax.f32 %v5900_v3, 0.0  ;;  %v2454_v20 = vpack.c.bf16 %v2444_v9, %v2443_v30  ;;  %v2221_v31 = vsub.f32 %v4139_v17, %v2072_v43  ;;  %v4295_v43 = vld [vmem:[#allocation3 + $0x180] ss:$8 sps:$4 sm:$0xff]   ;;  %v4296_v30 = vld [vmem:[#allocation3 + $0x170] ss:$8 sps:$4 sm:$0xff]  }
 0x933   :  { %v2255_v14 = vadd.f32 %v2254_v19, %v2253_v5  ;;  %v2192_v51 = vpop.f32.mrf.mxu0  ;;  %v2371_v34 = vpop.f32.mrf.mxu1  ;;  %v2260_v25 = vsel %vm630_vm2, %v2234_v61, 0.0  ;;  %v5927_v7 = vadd.f32 %v4157_v32, %v5831_v1  ;;  %4197 = vmatprep.subr.bf16.mxu0 %v4295_v43 }
 0x934   :  { %v2256_v39 = vsel %vm630_vm2, %v2232_v21, 0.0  ;;  %v2453_v37 = vpack.c.bf16 %v2442_v29, %v2441_v56  ;;  %v2219_v35 = vsub.f32 %v2192_v51, %v2064_v4  ;;  %v5923_v44 = vadd.f32 %v2371_v34, %v5831_v1 }
 0x935   :  { %v2257_v48 = vadd.f32 %v2256_v39, %v2255_v14  ;;  %v4140_v33 = vpop.f32.mrf.mxu0  ;;  %v4158_v60 = vpop.f32.mrf.mxu1  ;;  %v2237_v42 = vmul.f32 %v2221_v31, %v2221_v31  ;;  %v2447_v63 = vmax.f32 %v5927_v7, 0.0  ;;  %v2386_v21 = vcvt.s32.f32 %v5477_v62  ;;  %v2784_v14 = vld [vmem:[#allocation3 + $0x190] sm:$0xf] }
 0x936   :  { %v2235_v18 = vmul.f32 %v2219_v35, %v2219_v35  ;;  %v5919_v47 = vadd.f32 %v4158_v60, %v5831_v1  ;;  %4189 = vmatprep.mubr.msk.bf16.mxu1 %vm945_vm4, %v2453_v37  ;;  %v2222_v45 = vsub.f32 %v4140_v33, %v2075_v41  ;;  %v2445_v26 = vmax.f32 %v5923_v44, 0.0  ;;  %4261 = vmatprep.subr.msk.bf16.mxu1 %vm1153_vm3, %v2784_v14 }
 0x937   :  { %v2259_v40 = vadd.f32 %v2258_v6, %v2257_v48  ;;  %v2195_v8 = vpop.f32.mrf.mxu0  ;;  %v2374_v57 = vpop.f32.mrf.mxu1  ;;  %4190 = vmatmul.mubr.msk.bf16.gmra.mxu1 %vm945_vm4, %v2454_v20  ;;  %v2387_v29 = vpack.c.bf16 %v2386_v21, %v2386_v21  ;;  %v2810_v51 = vsel %vm1153_vm3, %v2784_v14, 0 }
 0x938   :  { %v2220_v24 = vsub.f32 %v2195_v8, %v2067_v12  ;;  %v5931_v49 = vadd.f32 %v2374_v57, %v5831_v1  ;;  %v2262_v58 = vsel %vm630_vm2, %v2235_v18, 0.0  ;;  %v2448_v28 = vmax.f32 %v5919_v47, 0.0  ;;  %4218 = vmatpush3.bf16.msra.mxu1 %v2810_v51 }
 0x939   :  { %v2261_v27 = vadd.f32 %v2260_v25, %v2259_v40  ;;  %v2238_v4 = vmul.f32 %v2222_v45, %v2222_v45  ;;  %v2266_v1 = vsel %vm630_vm2, %v2237_v42, 0.0  ;;  %4176 = vmatmul.mubr.msk.bf16.vlgmr.msra.gmra.mxu0 %vm630_vm2, %v2387_v29 }
 0x93a   :  { %v2236_v16 = vmul.f32 %v2220_v24, %v2220_v24  ;;  %v2446_v50 = vmax.f32 %v5931_v49, 0.0  ;;  %v2456_v17 = vpack.c.bf16 %v2448_v28, %v2447_v63  ;;  %4198 = vmatpush3.bf16.msra.mxu0 %v4295_v43 }
 0x93b   :  { %v2263_v13 = vadd.f32 %v2262_v58, %v2261_v27  ;;  %v2268_v19 = vsel %vm630_vm2, %v2238_v4, 0.0  ;;  %4199 = vmatprep.subr.bf16.mxu0 %v4296_v30 }
 0x93c   :  { %v2264_v2 = vsel %vm630_vm2, %v2236_v16, 0.0  ;;  %v2455_v56 = vpack.c.bf16 %v2446_v50, %v2445_v26 }
 0x93d   :  { %v2265_v5 = vadd.f32 %v2264_v2, %v2263_v13 }
 0x93e   :  { %4193 = vmatprep.mubr.msk.bf16.mxu1 %vm945_vm4, %v2455_v56  ;;  %4200 = vmatpush3.bf16.msra.mxu0 %v4296_v30 }
 0x93f   :  { %v2267_v32 = vadd.f32 %v2266_v1, %v2265_v5  ;;  %4194 = vmatmul.mubr.msk.bf16.gmra.mxu1 %vm945_vm4, %v2456_v17 }
 0x941   :  { %v2269_v9 = vadd.f32 %v2268_v19, %v2267_v32 }
 0x943   :  { %2270 = vadd.xlane.f32.xlu0 %v2269_v9 }
 0x9cc   :  { %v2271_v34 = vpop.xlane.xlu0 %2270 }
 0x9cd   :  { %v2272_v62 = vrot.slane %v2271_v34, 4 }
 0x9cf   :  { %v2273_v61 = vadd.f32 %v2272_v62, %v2271_v34 }
 0x9d1   :  { %v2274_v39 = vrot.slane %v2273_v61, 2 }
 0x9d3   :  { %v2275_v54 = vadd.f32 %v2274_v39, %v2273_v61 }
 0x9d5   :  { %v2276_v37 = vrot.slane %v2275_v54, 1 }
 0x9d7   :  { %v2277_v35 = vadd.f32 %v2276_v37, %v2275_v54 }
 0x9d9   :  { %4262 = vpush %v2277_v35 }
 0x9e7   :  { %v4183_v41 = vpop.f32.mrf.mxu1 }
 0x9e8   :  { %v2584_v31 = vmax.f32 %v4183_v41, 0.0 }
 0x9e9   :  { %v2519_v12 = vpop.f32.mrf.mxu1 }
 0x9ea   :  { %v2582_v60 = vmax.f32 %v2519_v12, 0.0 }
 0x9eb   :  { %v4184_v6 = vpop.f32.mrf.mxu1 }
 0x9ec   :  { %v2585_v48 = vmax.f32 %v4184_v6, 0.0 }
 0x9ed   :  { %v2522_v33 = vpop.f32.mrf.mxu1 }
 0x9ee   :  { %v2583_v20 = vmax.f32 %v2522_v33, 0.0  ;;  %v2599_v8 = vpack.c.bf16 %v2585_v48, %v2584_v31 }
 0x9ef   :  { %v4187_v40 = vpop.f32.mrf.mxu1 }
 0x9f0   :  { %v2598_v18 = vpack.c.bf16 %v2583_v20, %v2582_v60  ;;  %v2588_v58 = vmax.f32 %v4187_v40, 0.0 }
 0x9f1   :  { %v2535_v57 = vpop.f32.mrf.mxu1 }
 0x9f2   :  { %4201 = vmatprep.mubr.msk.bf16.mxu0 %vm306_vm1, %v2598_v18  ;;  %v2586_v27 = vmax.f32 %v2535_v57, 0.0 }
 0x9f3   :  { %4202 = vmatmul.mubr.msk.bf16.vlgmr.msra.gmra.mxu0 %vm306_vm1, %v2599_v8  ;;  %v4188_v25 = vpop.f32.mrf.mxu1 }
 0x9f4   :  { %v2589_v45 = vmax.f32 %v4188_v25, 0.0 }
 0x9f5   :  { %v2538_v24 = vpop.f32.mrf.mxu1 }
 0x9f6   :  { %v2587_v42 = vmax.f32 %v2538_v24, 0.0  ;;  %v2601_v13 = vpack.c.bf16 %v2589_v45, %v2588_v58 }
 0x9f7   :  { %v4191_v28 = vpop.f32.mrf.mxu1 }
 0x9f8   :  { %v2600_v16 = vpack.c.bf16 %v2587_v42, %v2586_v27  ;;  %v2592_v56 = vmax.f32 %v4191_v28, 0.0 }
 0x9f9   :  { %v2551_v26 = vpop.f32.mrf.mxu1  ;;  %v2425_v62 = vpop.f32.mrf.mxu0 }
 0x9fa   :  { %4205 = vmatprep.mubr.msk.bf16.mxu0 %vm306_vm1, %v2600_v16  ;;  %v2590_v2 = vmax.f32 %v2551_v26, 0.0  ;;  %v4264_v61 = vtrunc.f32 %v2425_v62 }
 0x9fb   :  { %v4192_v50 = vpop.f32.mrf.mxu1  ;;  %4206 = vmatmul.mubr.msk.bf16.gmra.mxu0 %vm306_vm1, %v2601_v13  ;;  %v4177_v39 = vpop.f32.mrf.mxu0 }
 0x9fc   :  { %v2593_v63 = vmax.f32 %v4192_v50, 0.0  ;;  %v4265_v54 = vcvt.f32.s32 %v4264_v61 }
 0x9fd   :  { %v2554_v4 = vpop.f32.mrf.mxu1  ;;  %v2428_v37 = vpop.f32.mrf.mxu0 }
 0x9fe   :  { %v2591_v5 = vmax.f32 %v2554_v4, 0.0  ;;  %v2603_v32 = vpack.c.bf16 %v2593_v63, %v2592_v56  ;;  %2432 = vst [vmem:[#allocation7] sm:$0x1] %v4265_v54 }
 0x9ff   :  { %v4195_v1 = vpop.f32.mrf.mxu1  ;;  %v4178_v35 = vpop.f32.mrf.mxu0 }
 0xa00   :  { %v2602_v17 = vpack.c.bf16 %v2591_v5, %v2590_v2  ;;  %v2596_v14 = vmax.f32 %v4195_v1, 0.0  ;;  %v4297_v35 = vld [vmem:[#allocation3 + $0x1a0] ss:$8 sps:$4 sm:$0xff]  }
 0xa01   :  { %v2567_v19 = vpop.f32.mrf.mxu1  ;;  %4235 = vmatprep.subr.bf16.mxu0 %v4297_v35 }
 0xa02   :  { %4209 = vmatprep.mubr.msk.bf16.mxu0 %vm306_vm1, %v2602_v17  ;;  %v2594_v43 = vmax.f32 %v2567_v19, 0.0  ;;  %4236 = vmatpush3.bf16.msra.mxu0 %v4297_v35 }
 0xa03   :  { %v4196_v9 = vpop.f32.mrf.mxu1  ;;  %4210 = vmatmul.mubr.msk.bf16.gmra.mxu0 %vm306_vm1, %v2603_v32 }
 0xa04   :  { %v2597_v21 = vmax.f32 %v4196_v9, 0.0 }
 0xa05   :  { %v2570_v29 = vpop.f32.mrf.mxu1 }
 0xa06   :  { %v2595_v30 = vmax.f32 %v2570_v29, 0.0  ;;  %v2605_v34 = vpack.c.bf16 %v2597_v21, %v2596_v14 }
 0xa08   :  { %v2604_v51 = vpack.c.bf16 %v2595_v30, %v2594_v43 }
 0xa0a   :  { %4213 = vmatprep.mubr.msk.bf16.mxu0 %vm306_vm1, %v2604_v51 }
 0xa0b   :  { %4214 = vmatmul.mubr.msk.bf16.gmra.mxu0 %vm306_vm1, %v2605_v34 }
 0xab3   :  { %v4203_v41 = vpop.f32.mrf.mxu0 }
 0xab4   :  { %v2745_v60 = vadd.f32 %v4203_v41, %v5839_v10 }
 0xab5   :  { %v2680_v12 = vpop.f32.mrf.mxu0 }
 0xab6   :  { %v2743_v48 = vadd.f32 %v2680_v12, %v5836_v46  ;;  %v2761_v25 = vmax.f32 %v2745_v60, 0.0 }
 0xab7   :  { %v4204_v6 = vpop.f32.mrf.mxu0 }
 0xab8   :  { %v2746_v33 = vadd.f32 %v4204_v6, %v5842_v52  ;;  %v2759_v40 = vmax.f32 %v2743_v48, 0.0 }
 0xab9   :  { %v2683_v20 = vpop.f32.mrf.mxu0 }
 0xaba   :  { %v2744_v31 = vadd.f32 %v2683_v20, %v5845_v55  ;;  %v2762_v18 = vmax.f32 %v2746_v33, 0.0 }
 0xabb   :  { %v4207_v57 = vpop.f32.mrf.mxu0 }
 0xabc   :  { %v2760_v8 = vmax.f32 %v2744_v31, 0.0  ;;  %v2777_v27 = vpack.c.bf16 %v2762_v18, %v2761_v25  ;;  %v2749_v10 = vadd.f32 %v4207_v57, %v5868_v23 }
 0xabd   :  { %v2696_v24 = vpop.f32.mrf.mxu0 }
 0xabe   :  { %v2776_v45 = vpack.c.bf16 %v2760_v8, %v2759_v40  ;;  %v2747_v46 = vadd.f32 %v2696_v24, %v5863_v11  ;;  %v2765_v50 = vmax.f32 %v2749_v10, 0.0 }
 0xabf   :  { %v4208_v42 = vpop.f32.mrf.mxu0 }
 0xac0   :  { %4219 = vmatprep.mubr.msk.bf16.mxu1 %vm945_vm4, %v2776_v45  ;;  %v2750_v52 = vadd.f32 %v4208_v42, %v5859_v22  ;;  %v2763_v13 = vmax.f32 %v2747_v46, 0.0 }
 0xac1   :  { %4220 = vmatmul.mubr.msk.bf16.vlgmr.msra.gmra.mxu1 %vm945_vm4, %v2777_v27  ;;  %v2699_v55 = vpop.f32.mrf.mxu0 }
 0xac2   :  { %v2748_v58 = vadd.f32 %v2699_v55, %v5875_v36  ;;  %v2766_v28 = vmax.f32 %v2750_v52, 0.0 }
 0xac3   :  { %v4211_v16 = vpop.f32.mrf.mxu0 }
 0xac4   :  { %v2764_v26 = vmax.f32 %v2748_v58, 0.0  ;;  %v2779_v2 = vpack.c.bf16 %v2766_v28, %v2765_v50  ;;  %v2753_v23 = vadd.f32 %v4211_v16, %v5892_v38 }
 0xac5   :  { %v2712_v63 = vpop.f32.mrf.mxu0 }
 0xac6   :  { %v2778_v4 = vpack.c.bf16 %v2764_v26, %v2763_v13  ;;  %v2751_v11 = vadd.f32 %v2712_v63, %v5886_v53  ;;  %v2769_v9 = vmax.f32 %v2753_v23, 0.0 }
 0xac7   :  { %v4212_v5 = vpop.f32.mrf.mxu0 }
 0xac8   :  { %v2754_v22 = vadd.f32 %v4212_v5, %v5895_v15  ;;  %4223 = vmatprep.mubr.msk.bf16.mxu1 %vm945_vm4, %v2778_v4  ;;  %v2767_v32 = vmax.f32 %v2751_v11, 0.0 }
 0xac9   :  { %v2715_v56 = vpop.f32.mrf.mxu0  ;;  %4224 = vmatmul.mubr.msk.bf16.gmra.mxu1 %vm945_vm4, %v2779_v2 }
 0xaca   :  { %v2752_v36 = vadd.f32 %v2715_v56, %v5900_v3  ;;  %v2770_v1 = vmax.f32 %v2754_v22, 0.0 }
 0xacb   :  { %v4215_v17 = vpop.f32.mrf.mxu0 }
 0xacc   :  { %v2768_v19 = vmax.f32 %v2752_v36, 0.0  ;;  %v2781_v43 = vpack.c.bf16 %v2770_v1, %v2769_v9  ;;  %v2757_v38 = vadd.f32 %v4215_v17, %v5927_v7  ;;  %v2775_v7 = vld [vmem:[%s6515_s2 + $0x15] ss:$0 sm:$0xff] }
 0xacd   :  { %v2728_v21 = vpop.f32.mrf.mxu0 }
 0xace   :  { %v2780_v29 = vpack.c.bf16 %v2768_v19, %v2767_v32  ;;  %v2755_v15 = vadd.f32 %v2728_v21, %v5923_v44  ;;  %v2773_v61 = vmax.f32 %v2757_v38, 0.0 }
 0xacf   :  { %v4216_v53 = vpop.f32.mrf.mxu0 }
 0xad0   :  { %v2758_v30 = vadd.f32 %v4216_v53, %v5919_v47  ;;  %4227 = vmatprep.mubr.msk.bf16.mxu1 %vm945_vm4, %v2780_v29  ;;  %v2771_v34 = vmax.f32 %v2755_v15, 0.0 }
 0xad1   :  { %v2731_v14 = vpop.f32.mrf.mxu0  ;;  %4228 = vmatmul.mubr.msk.bf16.gmra.mxu1 %vm945_vm4, %v2781_v43 }
 0xad2   :  { %v2756_v3 = vadd.f32 %v2731_v14, %v5931_v49  ;;  %v2774_v51 = vmax.f32 %v2758_v30, 0.0 }
 0xad4   :  { %v2772_v62 = vmax.f32 %v2756_v3, 0.0  ;;  %v2783_v54 = vpack.c.bf16 %v2774_v51, %v2773_v61 }
 0xad6   :  { %v2782_v39 = vpack.c.bf16 %v2772_v62, %v2771_v34 }
 0xad8   :  { %4231 = vmatprep.mubr.msk.bf16.mxu1 %vm945_vm4, %v2782_v39 }
 0xad9   :  { %4232 = vmatmul.mubr.msk.bf16.gmra.mxu1 %vm945_vm4, %v2783_v54 }
 0xada   :  { %3500 = vmatprep.mubr.bf16.mxu1 %v4531_v0 }
 0xb81   :  { %v4221_v47 = vpop.f32.mrf.mxu1 }
 0xb82   :  { %v5986_v12 = vadd.f32 %v4221_v47, %v2775_v7 }
 0xb83   :  { %v2846_v44 = vpop.f32.mrf.mxu1 }
 0xb84   :  { %v5984_v49 = vadd.f32 %v2846_v44, %v2775_v7  ;;  %v2914_v18 = vsel %vm630_vm2, %v5986_v12, 0.0 }
 0xb85   :  { %v4222_v37 = vpop.f32.mrf.mxu1 }
 0xb86   :  { %v2911_v48 = vsel %vm630_vm2, %v5984_v49, 0.0  ;;  %v5992_v33 = vadd.f32 %v4222_v37, %v2775_v7 }
 0xb87   :  { %v2849_v41 = vpop.f32.mrf.mxu1 }
 0xb88   :  { %v5988_v6 = vadd.f32 %v2849_v41, %v2775_v7  ;;  %v2916_v25 = vsel %vm630_vm2, %v5992_v33, 0.0 }
 0xb89   :  { %v4225_v20 = vpop.f32.mrf.mxu1 }
 0xb8a   :  { %v2912_v60 = vsel %vm630_vm2, %v5988_v6, 0.0  ;;  %v2871_v46 = vadd.f32 %v4225_v20, %v2775_v7 }
 0xb8b   :  { %v2913_v31 = vadd.f32 %v2912_v60, %v2911_v48  ;;  %v2862_v40 = vpop.f32.mrf.mxu1 }
 0xb8c   :  { %v2863_v57 = vadd.f32 %v2862_v40, %v2775_v7  ;;  %v2922_v26 = vsel %vm630_vm2, %v2871_v46, 0.0 }
 0xb8d   :  { %v2915_v8 = vadd.f32 %v2914_v18, %v2913_v31  ;;  %v4226_v45 = vpop.f32.mrf.mxu1 }
 0xb8e   :  { %v2918_v27 = vsel %vm630_vm2, %v2863_v57, 0.0  ;;  %v2874_v58 = vadd.f32 %v4226_v45, %v2775_v7 }
 0xb8f   :  { %v2917_v24 = vadd.f32 %v2916_v25, %v2915_v8  ;;  %v2865_v42 = vpop.f32.mrf.mxu1 }
 0xb90   :  { %v2866_v10 = vadd.f32 %v2865_v42, %v2775_v7  ;;  %v2924_v2 = vsel %vm630_vm2, %v2874_v58, 0.0 }
 0xb91   :  { %v2919_v52 = vadd.f32 %v2918_v27, %v2917_v24  ;;  %v4229_v55 = vpop.f32.mrf.mxu1 }
 0xb92   :  { %v2920_v28 = vsel %vm630_vm2, %v2866_v10, 0.0  ;;  %v6004_v22 = vadd.f32 %v4229_v55, %v2775_v7 }
 0xb93   :  { %v2921_v16 = vadd.f32 %v2920_v28, %v2919_v52  ;;  %v2878_v13 = vpop.f32.mrf.mxu1 }
 0xb94   :  { %v2879_v50 = vadd.f32 %v2878_v13, %v2775_v7  ;;  %v2930_v21 = vsel %vm630_vm2, %v6004_v22, 0.0 }
 0xb95   :  { %v2923_v63 = vadd.f32 %v2922_v26, %v2921_v16  ;;  %v4230_v4 = vpop.f32.mrf.mxu1 }
 0xb96   :  { %v2926_v23 = vsel %vm630_vm2, %v2879_v50, 0.0  ;;  %v2890_v17 = vadd.f32 %v4230_v4, %v2775_v7 }
 0xb97   :  { %v2925_v5 = vadd.f32 %v2924_v2, %v2923_v63  ;;  %v2881_v11 = vpop.f32.mrf.mxu1 }
 0xb98   :  { %v2882_v56 = vadd.f32 %v2881_v11, %v2775_v7  ;;  %v2932_v15 = vsel %vm630_vm2, %v2890_v17, 0.0 }
 0xb99   :  { %v2927_v36 = vadd.f32 %v2926_v23, %v2925_v5  ;;  %v4233_v1 = vpop.f32.mrf.mxu1 }
 0xb9a   :  { %v2928_v32 = vsel %vm630_vm2, %v2882_v56, 0.0  ;;  %v6011_v14 = vadd.f32 %v4233_v1, %v2775_v7 }
 0xb9b   :  { %v2929_v19 = vadd.f32 %v2928_v32, %v2927_v36  ;;  %v2894_v9 = vpop.f32.mrf.mxu1 }
 0xb9c   :  { %v2895_v29 = vadd.f32 %v2894_v9, %v2775_v7  ;;  %v2938_v54 = vsel %vm630_vm2, %v6011_v14, 0.0 }
 0xb9d   :  { %v2931_v43 = vadd.f32 %v2930_v21, %v2929_v19  ;;  %v4234_v53 = vpop.f32.mrf.mxu1 }
 0xb9e   :  { %v2934_v3 = vsel %vm630_vm2, %v2895_v29, 0.0  ;;  %v6014_v62 = vadd.f32 %v4234_v53, %v2775_v7 }
 0xb9f   :  { %v2933_v30 = vadd.f32 %v2932_v15, %v2931_v43  ;;  %v2897_v38 = vpop.f32.mrf.mxu1 }
 0xba0   :  { %v2898_v51 = vadd.f32 %v2897_v38, %v2775_v7  ;;  %v2940_v44 = vsel %vm630_vm2, %v6014_v62, 0.0 }
 0xba1   :  { %v2935_v34 = vadd.f32 %v2934_v3, %v2933_v30 }
 0xba2   :  { %v2936_v61 = vsel %vm630_vm2, %v2898_v51, 0.0 }
 0xba3   :  { %v2937_v39 = vadd.f32 %v2936_v61, %v2935_v34 }
 0xba5   :  { %v2939_v47 = vadd.f32 %v2938_v54, %v2937_v39 }
 0xba7   :  { %v2941_v37 = vadd.f32 %v2940_v44, %v2939_v47 }
 0xba9   :  { %v2942_v35 = vrot.slane %v2941_v37, 4 }
 0xbab   :  { %v2943_v41 = vadd.f32 %v2942_v35, %v2941_v37 }
 0xbad   :  { %v2944_v48 = vrot.slane %v2943_v41, 2 }
 0xbaf   :  { %v2945_v60 = vadd.f32 %v2944_v48, %v2943_v41 }
 0xbb1   :  { %v2946_v20 = vrot.slane %v2945_v60, 1 }
 0xbb3   :  { %v2947_v31 = vadd.f32 %v2946_v20, %v2945_v60 }
 0xbb5   :  { %v2948_v18 = vmul.f32 0.0078125, %v2947_v31 }
 0xbb7   :  { %v6022_v7 = vsub.f32 %v5984_v49, %v2948_v18  ;;  %v6025_v40 = vsub.f32 %v5988_v6, %v2948_v18  ;;  %v6028_v8 = vsub.f32 %v5986_v12, %v2948_v18  ;;  %v6031_v25 = vsub.f32 %v5992_v33, %v2948_v18 }
 0xbb8   :  { %v6037_v27 = vsub.f32 %v2863_v57, %v2948_v18  ;;  %v6041_v42 = vsub.f32 %v2866_v10, %v2948_v18  ;;  %v6047_v55 = vsub.f32 %v2871_v46, %v2948_v18  ;;  %v6052_v13 = vsub.f32 %v2874_v58, %v2948_v18 }
 0xbb9   :  { %v2965_v45 = vmul.f32 %v6022_v7, %v6022_v7  ;;  %v2966_v24 = vmul.f32 %v6025_v40, %v6025_v40  ;;  %v2967_v49 = vmul.f32 %v6028_v8, %v6028_v8  ;;  %v2968_v12 = vmul.f32 %v6031_v25, %v6031_v25 }
 0xbba   :  { %v2969_v28 = vmul.f32 %v6037_v27, %v6037_v27  ;;  %v2970_v10 = vmul.f32 %v6041_v42, %v6041_v42  ;;  %v6057_v4 = vsub.f32 %v2879_v50, %v2948_v18  ;;  %v2971_v46 = vmul.f32 %v6047_v55, %v6047_v55 }
 0xbbb   :  { %v2981_v6 = vsel %vm630_vm2, %v2965_v45, 0.0  ;;  %v2982_v33 = vsel %vm630_vm2, %v2966_v24, 0.0  ;;  %v2984_v57 = vsel %vm630_vm2, %v2967_v49, 0.0  ;;  %v2986_v26 = vsel %vm630_vm2, %v2968_v12, 0.0 }
 0xbbc   :  { %v2983_v52 = vadd.f32 %v2982_v33, %v2981_v6  ;;  %v2988_v2 = vsel %vm630_vm2, %v2969_v28, 0.0  ;;  %v6062_v11 = vsub.f32 %v2882_v56, %v2948_v18  ;;  %v2972_v58 = vmul.f32 %v6052_v13, %v6052_v13 }
 0xbbd   :  { %v2990_v23 = vsel %vm630_vm2, %v2970_v10, 0.0  ;;  %v6068_v1 = vsub.f32 %v6004_v22, %v2948_v18  ;;  %v2973_v50 = vmul.f32 %v6057_v4, %v6057_v4  ;;  %v2992_v32 = vsel %vm630_vm2, %v2971_v46, 0.0  ;;  %v6111_v10 = vld [vmem:[%s6515_s2 + $0x16] ss:$0 sm:$0xff] }
 0xbbe   :  { %v2985_v16 = vadd.f32 %v2984_v57, %v2983_v52  ;;  %v6073_v9 = vsub.f32 %v2890_v17, %v2948_v18  ;;  %v2974_v56 = vmul.f32 %v6062_v11, %v6062_v11  ;;  %v2994_v21 = vsel %vm630_vm2, %v2972_v58, 0.0 }
 0xbbf   :  { %v6078_v53 = vsub.f32 %v2895_v29, %v2948_v18  ;;  %v2975_v22 = vmul.f32 %v6068_v1, %v6068_v1  ;;  %v2996_v15 = vsel %vm630_vm2, %v2973_v50, 0.0  ;;  %v6083_v38 = vsub.f32 %v2898_v51, %v2948_v18 }
 0xbc0   :  { %v2987_v63 = vadd.f32 %v2986_v26, %v2985_v16  ;;  %v2976_v17 = vmul.f32 %v6073_v9, %v6073_v9  ;;  %v2998_v3 = vsel %vm630_vm2, %v2974_v56, 0.0  ;;  %v6089_v61 = vsub.f32 %v6011_v14, %v2948_v18 }
 0xbc1   :  { %v2977_v29 = vmul.f32 %v6078_v53, %v6078_v53  ;;  %v3000_v39 = vsel %vm630_vm2, %v2975_v22, 0.0  ;;  %v6095_v47 = vsub.f32 %v6014_v62, %v2948_v18  ;;  %v2978_v51 = vmul.f32 %v6083_v38, %v6083_v38 }
 0xbc2   :  { %v2989_v5 = vadd.f32 %v2988_v2, %v2987_v63  ;;  %v3002_v44 = vsel %vm630_vm2, %v2976_v17, 0.0  ;;  %v2979_v35 = vmul.f32 %v6089_v61, %v6089_v61  ;;  %v6119_v2 = vld [vmem:[%s6515_s2 + $0x17] ss:$0 sm:$0xff] }
 0xbc3   :  { %v3004_v14 = vsel %vm630_vm2, %v2977_v29, 0.0  ;;  %v2980_v48 = vmul.f32 %v6095_v47, %v6095_v47  ;;  %v3006_v60 = vsel %vm630_vm2, %v2978_v51, 0.0 }
 0xbc4   :  { %v2991_v36 = vadd.f32 %v2990_v23, %v2989_v5  ;;  %v3008_v62 = vsel %vm630_vm2, %v2979_v35, 0.0 }
 0xbc5   :  { %v3010_v18 = vsel %vm630_vm2, %v2980_v48, 0.0 }
 0xbc6   :  { %v2993_v19 = vadd.f32 %v2992_v32, %v2991_v36 }
 0xbc8   :  { %v2995_v43 = vadd.f32 %v2994_v21, %v2993_v19 }
 0xbca   :  { %v2997_v30 = vadd.f32 %v2996_v15, %v2995_v43 }
 0xbcc   :  { %v2999_v34 = vadd.f32 %v2998_v3, %v2997_v30 }
 0xbce   :  { %v3001_v54 = vadd.f32 %v3000_v39, %v2999_v34 }
 0xbd0   :  { %v3003_v37 = vadd.f32 %v3002_v44, %v3001_v54 }
 0xbd2   :  { %v3005_v41 = vadd.f32 %v3004_v14, %v3003_v37 }
 0xbd4   :  { %v3007_v20 = vadd.f32 %v3006_v60, %v3005_v41 }
 0xbd6   :  { %v3009_v31 = vadd.f32 %v3008_v62, %v3007_v20 }
 0xbd8   :  { %v3011_v45 = vadd.f32 %v3010_v18, %v3009_v31 }
 0xbda   :  { %v3012_v24 = vrot.slane %v3011_v45, 4 }
 0xbdc   :  { %v3013_v49 = vadd.f32 %v3012_v24, %v3011_v45 }
 0xbde   :  { %v3014_v12 = vrot.slane %v3013_v49, 2 }
 0xbe0   :  { %v3015_v6 = vadd.f32 %v3014_v12, %v3013_v49 }
 0xbe2   :  { %v3016_v33 = vrot.slane %v3015_v6, 1 }
 0xbe4   :  { %v3017_v52 = vadd.f32 %v3016_v33, %v3015_v6 }
 0xbe6   :  { %v3018_v28 = vmul.f32 0.0078125, %v3017_v52 }
 0xbe8   :  { %v3019_v57 = vadd.f32 1e-05, %v3018_v28 }
 0xbea   :  { %4374 = vrsqrt.f32 %v3019_v57 }
 0xbf7   :  { %v4375_v16 = vpop.eup %4374 }
 0xbf8   :  { %v3024_v26 = vmul.f32 %v4375_v16, %v6031_v25  ;;  %v3021_v63 = vmul.f32 %v4375_v16, %v6022_v7  ;;  %v3022_v46 = vmul.f32 %v4375_v16, %v6025_v40  ;;  %v3023_v23 = vmul.f32 %v4375_v16, %v6028_v8 }
 0xbf9   :  { %v3025_v7 = vmul.f32 %v4375_v16, %v6037_v27  ;;  %v3029_v40 = vmul.f32 %v4375_v16, %v6057_v4  ;;  %v3026_v19 = vmul.f32 %v4375_v16, %v6041_v42  ;;  %v3027_v56 = vmul.f32 %v4375_v16, %v6047_v55 }
 0xbfa   :  { %v3037_v5 = vmul.f32 %v3021_v63, %v6111_v10  ;;  %v3038_v58 = vmul.f32 %v3022_v46, %v6111_v10  ;;  %v3040_v36 = vmul.f32 %v3024_v26, %v6111_v10  ;;  %v3039_v25 = vmul.f32 %v3023_v23, %v6111_v10 }
 0xbfb   :  { %v3030_v21 = vmul.f32 %v4375_v16, %v6062_v11  ;;  %v3041_v43 = vmul.f32 %v3025_v7, %v6111_v10  ;;  %v3028_v22 = vmul.f32 %v4375_v16, %v6052_v13  ;;  %v3042_v27 = vmul.f32 %v3026_v19, %v6111_v10  ;;  %v6177_v19 = vld [vmem:[%s6515_s2 + $0x20] ss:$0 sm:$0xff] }
 0xbfc   :  { %v3053_v50 = vadd.f32 %v3037_v5, %v6119_v2  ;;  %v3054_v32 = vadd.f32 %v3038_v58, %v6119_v2  ;;  %v3055_v8 = vadd.f32 %v3039_v25, %v6119_v2  ;;  %v3056_v15 = vadd.f32 %v3040_v36, %v6119_v2 }
 0xbfd   :  { %v3043_v4 = vmul.f32 %v3027_v56, %v6111_v10  ;;  %v3057_v30 = vadd.f32 %v3041_v43, %v6119_v2  ;;  %v3044_v42 = vmul.f32 %v3028_v22, %v6111_v10  ;;  %v3058_v55 = vadd.f32 %v3042_v27, %v6119_v2  ;;  %v4300_v27 = vld [vmem:[#allocation3 + $0x1c4] ss:$8 sps:$4 sm:$0xff]  }
 0xbfe   :  { %4376 = vtanh.f32 %v3053_v50  ;;  %v3045_v11 = vmul.f32 %v3029_v40, %v6111_v10  ;;  %v3046_v17 = vmul.f32 %v3030_v21, %v6111_v10  ;;  %v3033_v13 = vmul.f32 %v4375_v16, %v6078_v53  ;;  %3480 = vmatprep.subr.bf16.mxu1 %v4300_v27 }
 0xbff   :  { %4378 = vtanh.f32 %v3054_v32  ;;  %v3059_v3 = vadd.f32 %v3043_v4, %v6119_v2  ;;  %v3031_v34 = vmul.f32 %v4375_v16, %v6068_v1  ;;  %v3060_v29 = vadd.f32 %v3044_v42, %v6119_v2 }
 0xc00   :  { %4380 = vtanh.f32 %v3055_v8  ;;  %v3032_v39 = vmul.f32 %v4375_v16, %v6073_v9  ;;  %v3061_v54 = vadd.f32 %v3045_v11, %v6119_v2  ;;  %v3034_v51 = vmul.f32 %v4375_v16, %v6083_v38 }
 0xc01   :  { %4382 = vtanh.f32 %v3056_v15  ;;  %v3062_v44 = vadd.f32 %v3046_v17, %v6119_v2  ;;  %v3049_v37 = vmul.f32 %v3033_v13, %v6111_v10  ;;  %v3047_v53 = vmul.f32 %v3031_v34, %v6111_v10  ;;  %v4298_v15 = vld [vmem:[#allocation3 + $0x1c0] ss:$8 sps:$4 sm:$0xff]  }
 0xc02   :  { %4384 = vtanh.f32 %v3057_v30  ;;  %v3048_v1 = vmul.f32 %v3032_v39, %v6111_v10  ;;  %v3050_v35 = vmul.f32 %v3034_v51, %v6111_v10  ;;  %v3035_v14 = vmul.f32 %v4375_v16, %v6089_v61  ;;  %v4303_v30 = vld [vmem:[#allocation3 + $0x1b4] ss:$8 sps:$4 sm:$0xff]   ;;  %3481 = vmatpush1.bf16.msra.mxu1 %v4298_v15 }
 0xc03   :  { %4386 = vtanh.f32 %v3058_v55  ;;  %v3065_v9 = vadd.f32 %v3049_v37, %v6119_v2  ;;  %v3063_v38 = vadd.f32 %v3047_v53, %v6119_v2  ;;  %v3036_v48 = vmul.f32 %v4375_v16, %v6095_v47  ;;  %3482 = vmatprep.subr.bf16.mxu1 %v4303_v30 }
 0xc04   :  { %4388 = vtanh.f32 %v3059_v3  ;;  %v3064_v60 = vadd.f32 %v3048_v1, %v6119_v2  ;;  %v3066_v62 = vadd.f32 %v3050_v35, %v6119_v2  ;;  %v3051_v24 = vmul.f32 %v3035_v14, %v6111_v10  ;;  %v4301_v3 = vld [vmem:[#allocation3 + $0x1b0] ss:$8 sps:$4 sm:$0xff]  }
 0xc05   :  { %4390 = vtanh.f32 %v3060_v29  ;;  %v3052_v61 = vmul.f32 %v3036_v48, %v6111_v10 }
 0xc06   :  { %4392 = vtanh.f32 %v3061_v54  ;;  %v3067_v52 = vadd.f32 %v3051_v24, %v6119_v2  ;;  %3483 = vmatpush1.bf16.msra.mxu1 %v4301_v3 }
 0xc07   :  { %4394 = vtanh.f32 %v3062_v44  ;;  %v3068_v57 = vadd.f32 %v3052_v61, %v6119_v2 }
 0xc08   :  { %4396 = vtanh.f32 %v3065_v9 }
 0xc09   :  { %4398 = vtanh.f32 %v3063_v38 }
 0xc0a   :  { %4400 = vtanh.f32 %v3064_v60 }
 0xc0b   :  { %v4377_v41 = vpop.eup %4376  ;;  %4402 = vtanh.f32 %v3066_v62 }
 0xc0c   :  { %v4379_v20 = vpop.eup %4378  ;;  %4404 = vtanh.f32 %v3067_v52 }
 0xc0d   :  { %v4381_v31 = vpop.eup %4380  ;;  %v3086_v18 = vpack.c.bf16 %v4379_v20, %v4377_v41  ;;  %4406 = vtanh.f32 %v3068_v57 }
 0xc0e   :  { %v4383_v45 = vpop.eup %4382 }
 0xc0f   :  { %v4385_v49 = vpop.eup %4384  ;;  %4237 = vmatprep.mubr.msk.bf16.mxu0 %vm630_vm2, %v3086_v18  ;;  %v3087_v12 = vpack.c.bf16 %v4383_v45, %v4381_v31 }
 0xc10   :  { %v4387_v47 = vpop.eup %4386 }
 0xc11   :  { %4238 = vmatmul.mubr.msk.bf16.vlgmr.msra.gmra.mxu0 %vm630_vm2, %v3087_v12  ;;  %v3088_v6 = vpack.c.bf16 %v4387_v47, %v4385_v49  ;;  %v4389_v33 = vpop.eup %4388 }
 0xc12   :  { %v4391_v28 = vpop.eup %4390 }
 0xc13   :  { %4241 = vmatprep.mubr.msk.bf16.mxu0 %vm630_vm2, %v3088_v6  ;;  %v4393_v16 = vpop.eup %4392  ;;  %v3089_v10 = vpack.c.bf16 %v4391_v28, %v4389_v33 }
 0xc14   :  { %v4395_v26 = vpop.eup %4394 }
 0xc15   :  { %v3090_v63 = vpack.c.bf16 %v4395_v26, %v4393_v16  ;;  %v4397_v46 = vpop.eup %4396 }
 0xc16   :  { %v4399_v5 = vpop.eup %4398 }
 0xc17   :  { %v4401_v58 = vpop.eup %4400 }
 0xc18   :  { %v4403_v23 = vpop.eup %4402  ;;  %v3091_v36 = vpack.c.bf16 %v4401_v58, %v4399_v5 }
 0xc19   :  { %4242 = vmatmul.mubr.msk.bf16.gmra.mxu0 %vm630_vm2, %v3089_v10  ;;  %v3092_v50 = vpack.c.bf16 %v4403_v23, %v4397_v46  ;;  %v4405_v2 = vpop.eup %4404 }
 0xc1a   :  { %4245 = vmatprep.mubr.msk.bf16.mxu0 %vm630_vm2, %v3090_v63  ;;  %v4407_v25 = vpop.eup %4406 }
 0xc1b   :  { %v3093_v7 = vpack.c.bf16 %v4407_v25, %v4405_v2 }
 0xc21   :  { %4246 = vmatmul.mubr.msk.bf16.gmra.mxu0 %vm630_vm2, %v3091_v36 }
 0xc22   :  { %4249 = vmatprep.mubr.msk.bf16.mxu0 %vm630_vm2, %v3092_v50 }
 0xc29   :  { %4250 = vmatmul.mubr.msk.bf16.gmra.mxu0 %vm630_vm2, %v3093_v7 }
 0xcd1   :  { %v4239_v40 = vpop.f32.mrf.mxu0 }
 0xcd2   :  { %v6183_v43 = vadd.f32 %v4239_v40, %v6177_v19 }
 0xcd3   :  { %v3160_v32 = vpop.f32.mrf.mxu0 }
 0xcd4   :  { %v6180_v21 = vadd.f32 %v3160_v32, %v6177_v19  ;;  %v3228_v34 = vsel %vm306_vm1, %v6183_v43, 0.0 }
 0xcd5   :  { %v4240_v56 = vpop.f32.mrf.mxu0 }
 0xcd6   :  { %v3225_v42 = vsel %vm306_vm1, %v6180_v21, 0.0  ;;  %v6191_v55 = vadd.f32 %v4240_v56, %v6177_v19 }
 0xcd7   :  { %v3163_v8 = vpop.f32.mrf.mxu0 }
 0xcd8   :  { %v6186_v22 = vadd.f32 %v3163_v8, %v6177_v19  ;;  %v3230_v51 = vsel %vm306_vm1, %v6191_v55, 0.0 }
 0xcd9   :  { %v4243_v4 = vpop.f32.mrf.mxu0 }
 0xcda   :  { %v3226_v11 = vsel %vm306_vm1, %v6186_v22, 0.0  ;;  %v6203_v53 = vadd.f32 %v4243_v4, %v6177_v19 }
 0xcdb   :  { %v3227_v17 = vadd.f32 %v3226_v11, %v3225_v42  ;;  %v3176_v13 = vpop.f32.mrf.mxu0 }
 0xcdc   :  { %v6198_v29 = vadd.f32 %v3176_v13, %v6177_v19  ;;  %v3236_v20 = vsel %vm306_vm1, %v6203_v53, 0.0 }
 0xcdd   :  { %v3229_v39 = vadd.f32 %v3228_v34, %v3227_v17  ;;  %v4244_v54 = vpop.f32.mrf.mxu0 }
 0xcde   :  { %v3232_v1 = vsel %vm306_vm1, %v6198_v29, 0.0  ;;  %v3188_v38 = vadd.f32 %v4244_v54, %v6177_v19 }
 0xcdf   :  { %v3231_v44 = vadd.f32 %v3230_v51, %v3229_v39  ;;  %v3179_v37 = vpop.f32.mrf.mxu0 }
 0xce0   :  { %v3180_v35 = vadd.f32 %v3179_v37, %v6177_v19  ;;  %v3238_v45 = vsel %vm306_vm1, %v3188_v38, 0.0 }
 0xce1   :  { %v3233_v9 = vadd.f32 %v3232_v1, %v3231_v44  ;;  %v4247_v14 = vpop.f32.mrf.mxu0 }
 0xce2   :  { %v3234_v41 = vsel %vm306_vm1, %v3180_v35, 0.0  ;;  %v6215_v61 = vadd.f32 %v4247_v14, %v6177_v19 }
 0xce3   :  { %v3235_v48 = vadd.f32 %v3234_v41, %v3233_v9  ;;  %v3192_v60 = vpop.f32.mrf.mxu0 }
 0xce4   :  { %v3193_v62 = vadd.f32 %v3192_v60, %v6177_v19  ;;  %v3244_v26 = vsel %vm306_vm1, %v6215_v61, 0.0 }
 0xce5   :  { %v3237_v31 = vadd.f32 %v3236_v20, %v3235_v48  ;;  %v4248_v18 = vpop.f32.mrf.mxu0 }
 0xce6   :  { %v3240_v12 = vsel %vm306_vm1, %v3193_v62, 0.0  ;;  %v3204_v52 = vadd.f32 %v4248_v18, %v6177_v19 }
 0xce7   :  { %v3239_v24 = vadd.f32 %v3238_v45, %v3237_v31  ;;  %v3195_v49 = vpop.f32.mrf.mxu0 }
 0xce8   :  { %v3196_v47 = vadd.f32 %v3195_v49, %v6177_v19  ;;  %v3246_v5 = vsel %vm306_vm1, %v3204_v52, 0.0 }
 0xce9   :  { %v3241_v6 = vadd.f32 %v3240_v12, %v3239_v24  ;;  %v4251_v33 = vpop.f32.mrf.mxu0 }
 0xcea   :  { %v3242_v28 = vsel %vm306_vm1, %v3196_v47, 0.0  ;;  %v6226_v36 = vadd.f32 %v4251_v33, %v6177_v19 }
 0xceb   :  { %v3243_v57 = vadd.f32 %v3242_v28, %v3241_v6  ;;  %v3208_v16 = vpop.f32.mrf.mxu0 }
 0xcec   :  { %v3209_v10 = vadd.f32 %v3208_v16, %v6177_v19  ;;  %v3252_v56 = vsel %vm306_vm1, %v6226_v36, 0.0 }
 0xced   :  { %v3245_v63 = vadd.f32 %v3244_v26, %v3243_v57  ;;  %v4252_v46 = vpop.f32.mrf.mxu0 }
 0xcee   :  { %v3248_v50 = vsel %vm306_vm1, %v3209_v10, 0.0  ;;  %v6231_v7 = vadd.f32 %v4252_v46, %v6177_v19 }
 0xcef   :  { %v3247_v58 = vadd.f32 %v3246_v5, %v3245_v63  ;;  %v3211_v23 = vpop.f32.mrf.mxu0 }
 0xcf0   :  { %v3212_v2 = vadd.f32 %v3211_v23, %v6177_v19  ;;  %v3254_v15 = vsel %vm306_vm1, %v6231_v7, 0.0 }
 0xcf1   :  { %v3249_v25 = vadd.f32 %v3248_v50, %v3247_v58 }
 0xcf2   :  { %v3250_v40 = vsel %vm306_vm1, %v3212_v2, 0.0 }
 0xcf3   :  { %v3251_v32 = vadd.f32 %v3250_v40, %v3249_v25 }
 0xcf5   :  { %v3253_v8 = vadd.f32 %v3252_v56, %v3251_v32 }
 0xcf7   :  { %v3255_v27 = vadd.f32 %v3254_v15, %v3253_v8 }
 0xcf9   :  { %v3256_v4 = vrot.slane %v3255_v27, 4 }
 0xcfb   :  { %v3257_v30 = vadd.f32 %v3256_v4, %v3255_v27 }
 0xcfd   :  { %v3258_v42 = vrot.slane %v3257_v30, 2 }
 0xcff   :  { %v3259_v11 = vadd.f32 %v3258_v42, %v3257_v30 }
 0xd01   :  { %v3260_v17 = vrot.slane %v3259_v11, 1 }
 0xd03   :  { %v3261_v13 = vadd.f32 %v3260_v17, %v3259_v11 }
 0xd05   :  { %v3262_v3 = vmul.f32 0.0078125, %v3261_v13 }
 0xd07   :  { %v6239_v19 = vsub.f32 %v6180_v21, %v3262_v3  ;;  %v6242_v34 = vsub.f32 %v6186_v22, %v3262_v3  ;;  %v6245_v39 = vsub.f32 %v6183_v43, %v3262_v3  ;;  %v6248_v54 = vsub.f32 %v6191_v55, %v3262_v3 }
 0xd08   :  { %v6255_v37 = vsub.f32 %v6198_v29, %v3262_v3  ;;  %v6259_v22 = vsub.f32 %v3180_v35, %v3262_v3  ;;  %v6266_v14 = vsub.f32 %v6203_v53, %v3262_v3  ;;  %v6271_v60 = vsub.f32 %v3188_v38, %v3262_v3 }
 0xd09   :  { %v3279_v51 = vmul.f32 %v6239_v19, %v6239_v19  ;;  %v3280_v44 = vmul.f32 %v6242_v34, %v6242_v34  ;;  %v3281_v21 = vmul.f32 %v6245_v39, %v6245_v39  ;;  %v3282_v43 = vmul.f32 %v6248_v54, %v6248_v54 }
 0xd0a   :  { %v3283_v29 = vmul.f32 %v6255_v37, %v6255_v37  ;;  %v3284_v35 = vmul.f32 %v6259_v22, %v6259_v22  ;;  %v6276_v18 = vsub.f32 %v3193_v62, %v3262_v3  ;;  %v3285_v53 = vmul.f32 %v6266_v14, %v6266_v14 }
 0xd0b   :  { %v3295_v55 = vsel %vm306_vm1, %v3279_v51, 0.0  ;;  %v3296_v1 = vsel %vm306_vm1, %v3280_v44, 0.0  ;;  %v3298_v41 = vsel %vm306_vm1, %v3281_v21, 0.0  ;;  %v3300_v20 = vsel %vm306_vm1, %v3282_v43, 0.0 }
 0xd0c   :  { %v3297_v9 = vadd.f32 %v3296_v1, %v3295_v55  ;;  %v3302_v45 = vsel %vm306_vm1, %v3283_v29, 0.0  ;;  %v6281_v49 = vsub.f32 %v3196_v47, %v3262_v3  ;;  %v3286_v38 = vmul.f32 %v6271_v60, %v6271_v60 }
 0xd0d   :  { %v3304_v12 = vsel %vm306_vm1, %v3284_v35, 0.0  ;;  %v3273_v33 = vsub.f32 %v6215_v61, %v3262_v3  ;;  %v3287_v62 = vmul.f32 %v6276_v18, %v6276_v18  ;;  %v3306_v28 = vsel %vm306_vm1, %v3285_v53, 0.0  ;;  %v3223_v35 = vld [vmem:[%s6515_s2 + $0x21] ss:$0 sm:$0xff] }
 0xd0e   :  { %v3299_v48 = vadd.f32 %v3298_v41, %v3297_v9  ;;  %v3274_v16 = vsub.f32 %v3204_v52, %v3262_v3  ;;  %v3288_v26 = vmul.f32 %v6281_v49, %v6281_v49  ;;  %v3308_v47 = vsel %vm306_vm1, %v3286_v38, 0.0 }
 0xd0f   :  { %v3275_v46 = vsub.f32 %v3209_v10, %v3262_v3  ;;  %v3289_v5 = vmul.f32 %v3273_v33, %v3273_v33  ;;  %v3310_v58 = vsel %vm306_vm1, %v3287_v62, 0.0  ;;  %v3276_v50 = vsub.f32 %v3212_v2, %v3262_v3 }
 0xd10   :  { %v3301_v31 = vadd.f32 %v3300_v20, %v3299_v48  ;;  %v3290_v61 = vmul.f32 %v3274_v16, %v3274_v16  ;;  %v3312_v25 = vsel %vm306_vm1, %v3288_v26, 0.0  ;;  %v3277_v32 = vsub.f32 %v6226_v36, %v3262_v3 }
 0xd11   :  { %v3291_v56 = vmul.f32 %v3275_v46, %v3275_v46  ;;  %v3314_v52 = vsel %vm306_vm1, %v3289_v5, 0.0  ;;  %v3278_v15 = vsub.f32 %v6231_v7, %v3262_v3  ;;  %v3292_v27 = vmul.f32 %v3276_v50, %v3276_v50 }
 0xd12   :  { %v3303_v24 = vadd.f32 %v3302_v45, %v3301_v31  ;;  %v3316_v10 = vsel %vm306_vm1, %v3290_v61, 0.0  ;;  %v3293_v30 = vmul.f32 %v3277_v32, %v3277_v32 }
 0xd13   :  { %v3318_v42 = vsel %vm306_vm1, %v3291_v56, 0.0  ;;  %v3294_v11 = vmul.f32 %v3278_v15, %v3278_v15  ;;  %v3320_v17 = vsel %vm306_vm1, %v3292_v27, 0.0 }
 0xd14   :  { %v3305_v6 = vadd.f32 %v3304_v12, %v3303_v24  ;;  %v3322_v36 = vsel %vm306_vm1, %v3293_v30, 0.0  ;;  %v6311_v24 = vld [vmem:[%s6515_s2 + $0x22] ss:$0 sm:$0xff] }
 0xd15   :  { %v3324_v44 = vsel %vm306_vm1, %v3294_v11, 0.0 }
 0xd16   :  { %v3307_v57 = vadd.f32 %v3306_v28, %v3305_v6 }
 0xd18   :  { %v3309_v63 = vadd.f32 %v3308_v47, %v3307_v57 }
 0xd1a   :  { %v3311_v23 = vadd.f32 %v3310_v58, %v3309_v63 }
 0xd1c   :  { %v3313_v40 = vadd.f32 %v3312_v25, %v3311_v23 }
 0xd1e   :  { %v3315_v8 = vadd.f32 %v3314_v52, %v3313_v40 }
 0xd20   :  { %v3317_v4 = vadd.f32 %v3316_v10, %v3315_v8 }
 0xd22   :  { %v3319_v2 = vadd.f32 %v3318_v42, %v3317_v4 }
 0xd24   :  { %v3321_v13 = vadd.f32 %v3320_v17, %v3319_v2 }
 0xd26   :  { %v3323_v51 = vadd.f32 %v3322_v36, %v3321_v13 }
 0xd28   :  { %v3325_v21 = vadd.f32 %v3324_v44, %v3323_v51 }
 0xd2a   :  { %v3326_v43 = vrot.slane %v3325_v21, 4 }
 0xd2c   :  { %v3327_v7 = vadd.f32 %v3326_v43, %v3325_v21 }
 0xd2e   :  { %v3328_v3 = vrot.slane %v3327_v7, 2 }
 0xd30   :  { %v3329_v55 = vadd.f32 %v3328_v3, %v3327_v7 }
 0xd32   :  { %v3330_v1 = vrot.slane %v3329_v55, 1 }
 0xd34   :  { %v3331_v9 = vadd.f32 %v3330_v1, %v3329_v55 }
 0xd36   :  { %v3332_v29 = vmul.f32 0.0078125, %v3331_v9 }
 0xd38   :  { %v3333_v41 = vadd.f32 1e-05, %v3332_v29 }
 0xd3a   :  { %4408 = vrsqrt.f32 %v3333_v41 }
 0xd47   :  { %v4409_v48 = vpop.eup %4408 }
 0xd48   :  { %v3335_v20 = vmul.f32 %v4409_v48, %v6239_v19  ;;  %v3336_v31 = vmul.f32 %v4409_v48, %v6242_v34  ;;  %v3345_v53 = vmul.f32 %v4409_v48, %v3273_v33  ;;  %v3346_v45 = vmul.f32 %v4409_v48, %v3274_v16 }
 0xd49   :  { %v3347_v38 = vmul.f32 %v4409_v48, %v3275_v46  ;;  %v3348_v12 = vmul.f32 %v4409_v48, %v3276_v50  ;;  %v3349_v6 = vmul.f32 %v4409_v48, %v3277_v32  ;;  %v3350_v62 = vmul.f32 %v4409_v48, %v3278_v15 }
 0xd4a   :  { %v3361_v28 = vmul.f32 %v3345_v53, %v3223_v35  ;;  %v3362_v57 = vmul.f32 %v3346_v45, %v3223_v35  ;;  %v3351_v33 = vmul.f32 %v3335_v20, %v3223_v35  ;;  %v3352_v23 = vmul.f32 %v3336_v31, %v3223_v35 }
 0xd4b   :  { %v3363_v26 = vmul.f32 %v3347_v38, %v3223_v35  ;;  %v3364_v47 = vmul.f32 %v3348_v12, %v3223_v35  ;;  %v3365_v63 = vmul.f32 %v3349_v6, %v3223_v35  ;;  %v3366_v5 = vmul.f32 %v3350_v62, %v3223_v35 }
 0xd4c   :  { %v3377_v19 = vadd.f32 %v3361_v28, %v6311_v24  ;;  %v3378_v34 = vadd.f32 %v3362_v57, %v6311_v24  ;;  %v3341_v46 = vmul.f32 %v4409_v48, %v6266_v14  ;;  %v3337_v61 = vmul.f32 %v4409_v48, %v6245_v39 }
 0xd4d   :  { %v3379_v16 = vadd.f32 %v3363_v26, %v6311_v24  ;;  %v3380_v58 = vadd.f32 %v3364_v47, %v6311_v24  ;;  %v3381_v50 = vadd.f32 %v3365_v63, %v6311_v24  ;;  %v3342_v25 = vmul.f32 %v4409_v48, %v6271_v60  ;;  %v3878_v63 = vld [vmem:[%s6515_s2 + $0x23] ss:$8 sm:$0x3] }
 0xd4e   :  { %4410 = vtanh.f32 %v3377_v19  ;;  %v3382_v40 = vadd.f32 %v3366_v5, %v6311_v24  ;;  %v3338_v32 = vmul.f32 %v4409_v48, %v6248_v54  ;;  %v3343_v56 = vmul.f32 %v4409_v48, %v6276_v18 }
 0xd4f   :  { %4412 = vtanh.f32 %v3378_v34  ;;  %v3367_v52 = vadd.f32 %v3351_v33, %v6311_v24  ;;  %v3353_v8 = vmul.f32 %v3337_v61, %v3223_v35  ;;  %v3344_v14 = vmul.f32 %v4409_v48, %v6281_v49 }
 0xd50   :  { %4414 = vtanh.f32 %v3379_v16  ;;  %v3368_v15 = vadd.f32 %v3352_v23, %v6311_v24  ;;  %v3354_v27 = vmul.f32 %v3338_v32, %v3223_v35  ;;  %v3357_v39 = vmul.f32 %v3341_v46, %v3223_v35 }
 0xd51   :  { %4416 = vtanh.f32 %v3380_v58  ;;  %v3358_v60 = vmul.f32 %v3342_v25, %v3223_v35  ;;  %v3359_v10 = vmul.f32 %v3343_v56, %v3223_v35  ;;  %v3369_v54 = vadd.f32 %v3353_v8, %v6311_v24  ;;  %v4444_v56 = vld [vmem:[%s6513_s0 + $0x10] sm:$0xff] }
 0xd52   :  { %4418 = vtanh.f32 %v3381_v50  ;;  %v3360_v4 = vmul.f32 %v3344_v14, %v3223_v35  ;;  %v3370_v18 = vadd.f32 %v3354_v27, %v6311_v24  ;;  %v3339_v30 = vmul.f32 %v4409_v48, %v6255_v37  ;;  %v4443_v50 = vld [vmem:[%s6513_s0 + $0x8] sm:$0xff] }
 0xd53   :  { %4420 = vtanh.f32 %v3382_v40  ;;  %v3373_v49 = vadd.f32 %v3357_v39, %v6311_v24  ;;  %v3340_v42 = vmul.f32 %v4409_v48, %v6259_v22  ;;  %v3374_v2 = vadd.f32 %v3358_v60, %v6311_v24  ;;  %v4445_v60 = vld [vmem:[%s6513_s0 + $0x18] sm:$0xff] }
 0xd54   :  { %4422 = vtanh.f32 %v3367_v52  ;;  %v3375_v11 = vadd.f32 %v3359_v10, %v6311_v24  ;;  %v3376_v17 = vadd.f32 %v3360_v4, %v6311_v24  ;;  %v3355_v13 = vmul.f32 %v3339_v30, %v3223_v35 }
 0xd55   :  { %4424 = vtanh.f32 %v3368_v15  ;;  %v3356_v51 = vmul.f32 %v3340_v42, %v3223_v35  ;;  %v3415_v26 = vshrl.u32 %v1598_v59, 7  ;;  %v4442_v59 = vld [vmem:[%s6513_s0] sm:$0xff] }
 0xd56   :  { %4426 = vtanh.f32 %v3369_v54  ;;  %v3371_v22 = vadd.f32 %v3355_v13, %v6311_v24 }
 0xd57   :  { %4428 = vtanh.f32 %v3370_v18  ;;  %v3372_v3 = vadd.f32 %v3356_v51, %v6311_v24  ;;  %v3416_v47 = vsub.s32 0, %v3415_v26  ;;  %v3420_v5 = vsub.s32 1, %v3415_v26  ;;  %v4447_v51 = vld [vmem:[%s6513_s0 + $0x28] sm:$0xff] }
 0xd58   :  { %4430 = vtanh.f32 %v3373_v49  ;;  %v4446_v49 = vld [vmem:[%s6513_s0 + $0x20] sm:$0xff]  ;;  %v4451_v26 = vld [vmem:[%s6513_s0 + $0x48] sm:$0xff] }
 0xd59   :  { %4432 = vtanh.f32 %v3374_v2  ;;  %v6356_v19 = vrot.slane %v3878_v63, %v3416_v47  ;;  %v6358_v34 = vrot.slane %v3878_v63, %v3420_v5 }
 0xd5a   :  { %4434 = vtanh.f32 %v3375_v11 }
 0xd5b   :  { %v4411_v36 = vpop.eup %4410  ;;  %4436 = vtanh.f32 %v3376_v17 }
 0xd5c   :  { %v4413_v44 = vpop.eup %4412  ;;  %4438 = vtanh.f32 %v3371_v22 }
 0xd5d   :  { %v4415_v37 = vpop.eup %4414  ;;  %v3406_v21 = vpack.c.bf16 %v4413_v44, %v4411_v36  ;;  %4440 = vtanh.f32 %v3372_v3 }
 0xd5e   :  { %v4417_v43 = vpop.eup %4416 }
 0xd5f   :  { %v4419_v7 = vpop.eup %4418  ;;  %v3407_v55 = vpack.c.bf16 %v4417_v43, %v4415_v37 }
 0xd60   :  { %v4421_v1 = vpop.eup %4420 }
 0xd61   :  { %v4423_v9 = vpop.eup %4422  ;;  %v3408_v29 = vpack.c.bf16 %v4421_v1, %v4419_v7  ;;  %v4448_v7 = vld [vmem:[%s6513_s0 + $0x30] sm:$0xff] }
 0xd62   :  { %v4425_v41 = vpop.eup %4424 }
 0xd63   :  { %v3401_v48 = vpack.c.bf16 %v4425_v41, %v4423_v9  ;;  %v4427_v35 = vpop.eup %4426 }
 0xd64   :  { %v4429_v20 = vpop.eup %4428 }
 0xd65   :  { %3883 = vmatmul.mubr.msk.bf16.vlgmr.msra.gmra.mxu1 %vm306_vm1, %v3401_v48  ;;  %v4431_v31 = vpop.eup %4430  ;;  %v3402_v24 = vpack.c.bf16 %v4429_v20, %v4427_v35  ;;  %v4449_v48 = vld [vmem:[%s6513_s0 + $0x38] sm:$0xff] }
 0xd66   :  { %3510 = vmatprep.mubr.bf16.mxu1 %v4531_v0  ;;  %v4433_v53 = vpop.eup %4432 }
 0xd67   :  { %v4435_v45 = vpop.eup %4434  ;;  %v3404_v38 = vpack.c.bf16 %v4433_v53, %v4431_v31 }
 0xd68   :  { %v4437_v12 = vpop.eup %4436 }
 0xd69   :  { %v3405_v6 = vpack.c.bf16 %v4437_v12, %v4435_v45  ;;  %v4439_v62 = vpop.eup %4438 }
 0xd6a   :  { %v4441_v28 = vpop.eup %4440 }
 0xd6b   :  { %v3403_v57 = vpack.c.bf16 %v4441_v28, %v4439_v62 }
 0xd6d   :  { %3884 = vmatmul.mubr.msk.bf16.gmra.mxu1 %vm306_vm1, %v3402_v24 }
 0xd6e   :  { %3520 = vmatprep.mubr.bf16.mxu1 %v4531_v0 }
 0xd75   :  { %3885 = vmatmul.mubr.msk.bf16.gmra.mxu1 %vm306_vm1, %v3403_v57 }
 0xd76   :  { %3530 = vmatprep.mubr.bf16.mxu1 %v4531_v0 }
 0xd7d   :  { %3886 = vmatmul.mubr.msk.bf16.gmra.mxu1 %vm306_vm1, %v3404_v38  ;;  %v4450_v38 = vld [vmem:[%s6513_s0 + $0x40] sm:$0xff] }
 0xd7e   :  { %3540 = vmatprep.mubr.bf16.mxu1 %v4531_v0 }
 0xd85   :  { %3887 = vmatmul.mubr.msk.bf16.gmra.mxu1 %vm306_vm1, %v3405_v6 }
 0xd86   :  { %3550 = vmatprep.mubr.bf16.mxu1 %v4531_v0 }
 0xd8d   :  { %3888 = vmatmul.mubr.msk.bf16.gmra.mxu1 %vm306_vm1, %v3406_v21 }
 0xd8e   :  { %3560 = vmatprep.mubr.bf16.mxu1 %v4531_v0 }
 0xd95   :  { %3889 = vmatmul.mubr.msk.bf16.gmra.mxu1 %vm306_vm1, %v3407_v55 }
 0xd96   :  { %3570 = vmatprep.mubr.bf16.mxu1 %v4531_v0 }
 0xd9d   :  { %3890 = vmatmul.mubr.msk.bf16.gmra.mxu1 %vm306_vm1, %v3408_v29 }
 0xe25   :  { %v3502_v33 = vpop.f32.mrf.mxu1 }
 0xe26   :  { %v3503_v16 = vadd.f32 %v3502_v33, %v6356_v19 }
 0xe27   :  { %v3504_v58 = vpop.f32.mrf.mxu1 }
 0xe28   :  { %v3505_v0 = vadd.f32 %v3504_v58, %v6358_v34  ;;  %v3581_v23 = vsub.f32 %v3503_v16, %v4442_v59  ;;  %v4452_v58 = vld [vmem:[%s6513_s0 + $0x50] sm:$0xff] }
 0xe29   :  { %v3506_v46 = vpop.f32.mrf.mxu1 }
 0xe2a   :  { %v3582_v61 = vsub.f32 %v3505_v0, %v4443_v50  ;;  %v3507_v25 = vadd.f32 %v3506_v46, %v6356_v19  ;;  %v3613_v14 = vmul.f32 %v3581_v23, %v3581_v23 }
 0xe2b   :  { %v3508_v40 = vpop.f32.mrf.mxu1 }
 0xe2c   :  { %v3614_v32 = vmul.f32 %v3582_v61, %v3582_v61  ;;  %v3583_v52 = vsub.f32 %v3507_v25, %v4444_v56  ;;  %v3509_v8 = vadd.f32 %v3508_v40, %v6358_v34  ;;  %v4453_v25 = vld [vmem:[%s6513_s0 + $0x58] sm:$0xff] }
 0xe2d   :  { %v3512_v15 = vpop.f32.mrf.mxu1 }
 0xe2e   :  { %v3645_v27 = vsel %vm182_vm0, %v3614_v32, 0.0  ;;  %v3615_v39 = vmul.f32 %v3583_v52, %v3583_v52  ;;  %v3584_v10 = vsub.f32 %v3509_v8, %v4445_v60  ;;  %v3513_v54 = vadd.f32 %v3512_v15, %v6356_v19 }
 0xe2f   :  { %v3646_v4 = vadd.f32 %v3645_v27, %v3613_v14  ;;  %v3514_v18 = vpop.f32.mrf.mxu1  ;;  %v4454_v14 = vld [vmem:[%s6513_s0 + $0x60] sm:$0xff] }
 0xe30   :  { %v3616_v30 = vmul.f32 %v3584_v10, %v3584_v10  ;;  %v3585_v42 = vsub.f32 %v3513_v54, %v4446_v49  ;;  %v3515_v2 = vadd.f32 %v3514_v18, %v6358_v34 }
 0xe31   :  { %v3647_v11 = vadd.f32 %v3646_v4, %v3615_v39  ;;  %v3516_v17 = vpop.f32.mrf.mxu1  ;;  %v4455_v4 = vld [vmem:[%s6513_s0 + $0x68] sm:$0xff] }
 0xe32   :  { %v3648_v13 = vsel %vm182_vm0, %v3616_v30, 0.0  ;;  %v3617_v36 = vmul.f32 %v3585_v42, %v3585_v42  ;;  %v3586_v44 = vsub.f32 %v3515_v2, %v4447_v51  ;;  %v3517_v37 = vadd.f32 %v3516_v17, %v6356_v19 }
 0xe33   :  { %v3649_v21 = vadd.f32 %v3648_v13, %v3647_v11  ;;  %v3518_v43 = vpop.f32.mrf.mxu1  ;;  %v4456_v11 = vld [vmem:[%s6513_s0 + $0x70] sm:$0xff] }
 0xe34   :  { %v3618_v22 = vmul.f32 %v3586_v44, %v3586_v44  ;;  %v3587_v3 = vsub.f32 %v3517_v37, %v4448_v7  ;;  %v3519_v55 = vadd.f32 %v3518_v43, %v6358_v34 }
 0xe35   :  { %v3650_v1 = vadd.f32 %v3649_v21, %v3617_v36  ;;  %v3522_v9 = vpop.f32.mrf.mxu1  ;;  %v4457_v21 = vld [vmem:[%s6513_s0 + $0x78] sm:$0xff] }
 0xe36   :  { %v3651_v29 = vsel %vm182_vm0, %v3618_v22, 0.0  ;;  %v3619_v41 = vmul.f32 %v3587_v3, %v3587_v3  ;;  %v3588_v35 = vsub.f32 %v3519_v55, %v4449_v48  ;;  %v3523_v20 = vadd.f32 %v3522_v9, %v6356_v19 }
 0xe37   :  { %v3652_v31 = vadd.f32 %v3651_v29, %v3650_v1  ;;  %v3524_v53 = vpop.f32.mrf.mxu1  ;;  %v4458_v1 = vld [vmem:[%s6513_s0 + $0x80] sm:$0xff] }
 0xe38   :  { %v3620_v45 = vmul.f32 %v3588_v35, %v3588_v35  ;;  %v3589_v12 = vsub.f32 %v3523_v20, %v4450_v38  ;;  %v3525_v24 = vadd.f32 %v3524_v53, %v6358_v34 }
 0xe39   :  { %v3653_v6 = vadd.f32 %v3652_v31, %v3619_v41  ;;  %v3526_v62 = vpop.f32.mrf.mxu1  ;;  %v4459_v31 = vld [vmem:[%s6513_s0 + $0x88] sm:$0xff] }
 0xe3a   :  { %v3654_v28 = vsel %vm182_vm0, %v3620_v45, 0.0  ;;  %v3621_v57 = vmul.f32 %v3589_v12, %v3589_v12  ;;  %v3590_v47 = vsub.f32 %v3525_v24, %v4451_v26  ;;  %v3527_v63 = vadd.f32 %v3526_v62, %v6356_v19 }
 0xe3b   :  { %v3655_v5 = vadd.f32 %v3654_v28, %v3653_v6  ;;  %v3528_v33 = vpop.f32.mrf.mxu1  ;;  %v4460_v6 = vld [vmem:[%s6513_s0 + $0x90] sm:$0xff] }
 0xe3c   :  { %v3622_v16 = vmul.f32 %v3590_v47, %v3590_v47  ;;  %v3591_v0 = vsub.f32 %v3527_v63, %v4452_v58  ;;  %v3529_v59 = vadd.f32 %v3528_v33, %v6358_v34 }
 0xe3d   :  { %v3656_v23 = vadd.f32 %v3655_v5, %v3621_v57  ;;  %v3532_v46 = vpop.f32.mrf.mxu1  ;;  %v4461_v5 = vld [vmem:[%s6513_s0 + $0x98] sm:$0xff] }
 0xe3e   :  { %v3657_v50 = vsel %vm182_vm0, %v3622_v16, 0.0  ;;  %v3623_v61 = vmul.f32 %v3591_v0, %v3591_v0  ;;  %v3592_v40 = vsub.f32 %v3529_v59, %v4453_v25  ;;  %v3533_v32 = vadd.f32 %v3532_v46, %v6356_v19 }
 0xe3f   :  { %v3658_v56 = vadd.f32 %v3657_v50, %v3656_v23  ;;  %v3534_v52 = vpop.f32.mrf.mxu1  ;;  %v4462_v23 = vld [vmem:[%s6513_s0 + $0xa0] sm:$0xff] }
 0xe40   :  { %v3624_v8 = vmul.f32 %v3592_v40, %v3592_v40  ;;  %v3593_v15 = vsub.f32 %v3533_v32, %v4454_v14  ;;  %v3535_v27 = vadd.f32 %v3534_v52, %v6358_v34 }
 0xe41   :  { %v3659_v39 = vadd.f32 %v3658_v56, %v3623_v61  ;;  %v3536_v60 = vpop.f32.mrf.mxu1  ;;  %v4463_v56 = vld [vmem:[%s6513_s0 + $0xa8] sm:$0xff] }
 0xe42   :  { %v3660_v10 = vsel %vm182_vm0, %v3624_v8, 0.0  ;;  %v3625_v54 = vmul.f32 %v3593_v15, %v3593_v15  ;;  %v3594_v18 = vsub.f32 %v3535_v27, %v4455_v4  ;;  %v3537_v30 = vadd.f32 %v3536_v60, %v6356_v19 }
 0xe43   :  { %v3661_v49 = vadd.f32 %v3660_v10, %v3659_v39  ;;  %v3538_v42 = vpop.f32.mrf.mxu1  ;;  %v4464_v39 = vld [vmem:[%s6513_s0 + $0xb0] sm:$0xff] }
 0xe44   :  { %v3626_v2 = vmul.f32 %v3594_v18, %v3594_v18  ;;  %v3595_v17 = vsub.f32 %v3537_v30, %v4456_v11  ;;  %v3539_v13 = vadd.f32 %v3538_v42, %v6358_v34 }
 0xe45   :  { %v3662_v36 = vadd.f32 %v3661_v49, %v3625_v54  ;;  %v3542_v51 = vpop.f32.mrf.mxu1  ;;  %v4465_v49 = vld [vmem:[%s6513_s0 + $0xb8] sm:$0xff] }
 0xe46   :  { %v3663_v44 = vsel %vm182_vm0, %v3626_v2, 0.0  ;;  %v3627_v37 = vmul.f32 %v3595_v17, %v3595_v17  ;;  %v3596_v43 = vsub.f32 %v3539_v13, %v4457_v21  ;;  %v3543_v22 = vadd.f32 %v3542_v51, %v6356_v19 }
 0xe47   :  { %v3664_v7 = vadd.f32 %v3663_v44, %v3662_v36  ;;  %v3544_v3 = vpop.f32.mrf.mxu1  ;;  %v4466_v36 = vld [vmem:[%s6513_s0 + $0xc0] sm:$0xff] }
 0xe48   :  { %v3628_v55 = vmul.f32 %v3596_v43, %v3596_v43  ;;  %v3597_v9 = vsub.f32 %v3543_v22, %v4458_v1  ;;  %v3545_v29 = vadd.f32 %v3544_v3, %v6358_v34 }
 0xe49   :  { %v3665_v41 = vadd.f32 %v3664_v7, %v3627_v37  ;;  %v3546_v48 = vpop.f32.mrf.mxu1  ;;  %v4467_v7 = vld [vmem:[%s6513_s0 + $0xc8] sm:$0xff] }
 0xe4a   :  { %v3666_v35 = vsel %vm182_vm0, %v3628_v55, 0.0  ;;  %v3629_v20 = vmul.f32 %v3597_v9, %v3597_v9  ;;  %v3598_v53 = vsub.f32 %v3545_v29, %v4459_v31  ;;  %v3547_v45 = vadd.f32 %v3546_v48, %v6356_v19 }
 0xe4b   :  { %v3667_v38 = vadd.f32 %v3666_v35, %v3665_v41  ;;  %v3548_v12 = vpop.f32.mrf.mxu1  ;;  %v4468_v41 = vld [vmem:[%s6513_s0 + $0xd0] sm:$0xff] }
 0xe4c   :  { %v3630_v24 = vmul.f32 %v3598_v53, %v3598_v53  ;;  %v3599_v62 = vsub.f32 %v3547_v45, %v4460_v6  ;;  %v3549_v28 = vadd.f32 %v3548_v12, %v6358_v34 }
 0xe4d   :  { %v3668_v57 = vadd.f32 %v3667_v38, %v3629_v20  ;;  %v3552_v26 = vpop.f32.mrf.mxu1  ;;  %v4469_v38 = vld [vmem:[%s6513_s0 + $0xd8] sm:$0xff] }
 0xe4e   :  { %v3669_v47 = vsel %vm182_vm0, %v3630_v24, 0.0  ;;  %v3631_v63 = vmul.f32 %v3599_v62, %v3599_v62  ;;  %v3600_v33 = vsub.f32 %v3549_v28, %v4461_v5  ;;  %v3553_v16 = vadd.f32 %v3552_v26, %v6356_v19 }
 0xe4f   :  { %v3670_v58 = vadd.f32 %v3669_v47, %v3668_v57  ;;  %v3554_v0 = vpop.f32.mrf.mxu1  ;;  %v4470_v57 = vld [vmem:[%s6513_s0 + $0xe0] sm:$0xff] }
 0xe50   :  { %v3632_v59 = vmul.f32 %v3600_v33, %v3600_v33  ;;  %v3601_v46 = vsub.f32 %v3553_v16, %v4462_v23  ;;  %v3555_v50 = vadd.f32 %v3554_v0, %v6358_v34 }
 0xe51   :  { %v3671_v61 = vadd.f32 %v3670_v58, %v3631_v63  ;;  %v3556_v25 = vpop.f32.mrf.mxu1  ;;  %v4471_v58 = vld [vmem:[%s6513_s0 + $0xe8] sm:$0xff] }
 0xe52   :  { %v3672_v40 = vsel %vm182_vm0, %v3632_v59, 0.0  ;;  %v3633_v32 = vmul.f32 %v3601_v46, %v3601_v46  ;;  %v3602_v52 = vsub.f32 %v3555_v50, %v4463_v56  ;;  %v3557_v8 = vadd.f32 %v3556_v25, %v6356_v19 }
 0xe53   :  { %v3673_v14 = vadd.f32 %v3672_v40, %v3671_v61  ;;  %v3558_v15 = vpop.f32.mrf.mxu1  ;;  %v4472_v61 = vld [vmem:[%s6513_s0 + $0xf0] sm:$0xff] }
 0xe54   :  { %v3634_v27 = vmul.f32 %v3602_v52, %v3602_v52  ;;  %v3603_v60 = vsub.f32 %v3557_v8, %v4464_v39  ;;  %v3559_v10 = vadd.f32 %v3558_v15, %v6358_v34  ;;  %v4473_v8 = vld [vmem:[%s6513_s0 + $0xf8] sm:$0xff] }
 0xe55   :  { %v3674_v54 = vadd.f32 %v3673_v14, %v3633_v32  ;;  %v3562_v4 = vpop.f32.mrf.mxu1 }
 0xe56   :  { %v3675_v18 = vsel %vm182_vm0, %v3634_v27, 0.0  ;;  %v3635_v30 = vmul.f32 %v3603_v60, %v3603_v60  ;;  %v3604_v42 = vsub.f32 %v3559_v10, %v4465_v49  ;;  %v3563_v2 = vadd.f32 %v3562_v4, %v6356_v19 }
 0xe57   :  { %v3676_v11 = vadd.f32 %v3675_v18, %v3674_v54  ;;  %v3564_v17 = vpop.f32.mrf.mxu1 }
 0xe58   :  { %v3636_v13 = vmul.f32 %v3604_v42, %v3604_v42  ;;  %v3605_v51 = vsub.f32 %v3563_v2, %v4466_v36  ;;  %v3565_v44 = vadd.f32 %v3564_v17, %v6358_v34 }
 0xe59   :  { %v3677_v37 = vadd.f32 %v3676_v11, %v3635_v30  ;;  %v3566_v21 = vpop.f32.mrf.mxu1 }
 0xe5a   :  { %v3678_v43 = vsel %vm182_vm0, %v3636_v13, 0.0  ;;  %v3637_v22 = vmul.f32 %v3605_v51, %v3605_v51  ;;  %v3606_v3 = vsub.f32 %v3565_v44, %v4467_v7  ;;  %v3567_v55 = vadd.f32 %v3566_v21, %v6356_v19 }
 0xe5b   :  { %v3679_v1 = vadd.f32 %v3678_v43, %v3677_v37  ;;  %v3568_v9 = vpop.f32.mrf.mxu1 }
 0xe5c   :  { %v3638_v29 = vmul.f32 %v3606_v3, %v3606_v3  ;;  %v3607_v48 = vsub.f32 %v3567_v55, %v4468_v41  ;;  %v3569_v35 = vadd.f32 %v3568_v9, %v6358_v34 }
 0xe5d   :  { %v3680_v20 = vadd.f32 %v3679_v1, %v3637_v22  ;;  %v3572_v31 = vpop.f32.mrf.mxu1 }
 0xe5e   :  { %v3681_v53 = vsel %vm182_vm0, %v3638_v29, 0.0  ;;  %v3639_v45 = vmul.f32 %v3607_v48, %v3607_v48  ;;  %v3608_v12 = vsub.f32 %v3569_v35, %v4469_v38  ;;  %v3573_v24 = vadd.f32 %v3572_v31, %v6356_v19 }
 0xe5f   :  { %v3682_v6 = vadd.f32 %v3681_v53, %v3680_v20  ;;  %v3574_v62 = vpop.f32.mrf.mxu1 }
 0xe60   :  { %v3640_v28 = vmul.f32 %v3608_v12, %v3608_v12  ;;  %v3609_v26 = vsub.f32 %v3573_v24, %v4470_v57  ;;  %v3575_v47 = vadd.f32 %v3574_v62, %v6358_v34 }
 0xe61   :  { %v3683_v63 = vadd.f32 %v3682_v6, %v3639_v45  ;;  %v3576_v5 = vpop.f32.mrf.mxu1 }
 0xe62   :  { %v3684_v33 = vsel %vm182_vm0, %v3640_v28, 0.0  ;;  %v3641_v16 = vmul.f32 %v3609_v26, %v3609_v26  ;;  %v3610_v0 = vsub.f32 %v3575_v47, %v4471_v58  ;;  %v3577_v59 = vadd.f32 %v3576_v5, %v6356_v19 }
 0xe63   :  { %v3685_v23 = vadd.f32 %v3684_v33, %v3683_v63  ;;  %v3578_v46 = vpop.f32.mrf.mxu1 }
 0xe64   :  { %v3642_v50 = vmul.f32 %v3610_v0, %v3610_v0  ;;  %v3611_v25 = vsub.f32 %v3577_v59, %v4472_v61  ;;  %v3579_v40 = vadd.f32 %v3578_v46, %v6358_v34 }
 0xe65   :  { %v3686_v32 = vadd.f32 %v3685_v23, %v3641_v16 }
 0xe66   :  { %v3687_v56 = vsel %vm182_vm0, %v3642_v50, 0.0  ;;  %v3643_v52 = vmul.f32 %v3611_v25, %v3611_v25  ;;  %v3612_v14 = vsub.f32 %v3579_v40, %v4473_v8 }
 0xe67   :  { %v3688_v19 = vadd.f32 %v3687_v56, %v3686_v32 }
 0xe68   :  { %v3644_v15 = vmul.f32 %v3612_v14, %v3612_v14 }
 0xe69   :  { %v3689_v27 = vadd.f32 %v3688_v19, %v3643_v52 }
 0xe6a   :  { %v3690_v39 = vsel %vm182_vm0, %v3644_v15, 0.0 }
 0xe6b   :  { %v3691_v60 = vadd.f32 %v3690_v39, %v3689_v27 }
 0xe6d   :  { %3692 = vadd.xlane.f32.xlu1 %v3691_v60 }
 0xe6e   :  { %4505 = shalt.err (!%p4502_p9)
}
 0xe6f   :  { %3716 = dma.vmem_to_hbm [thread:$0]  %s3714_s9, 16, %s6517_s4, [#allocation5]  }
 0xe70   :  { %s4263_s13 = spop %4262  ;;  %s4535_s21 = smov [#allocation8]  }
 0xe71   :  { %s2279_s16 = smul.f32 0.00048828125, %s4263_s13 }
 0xef6   :  { %v3693_v34 = vpop.xlane.xlu1 %3692 }
 0xef7   :  { %v3694_v10 = vrot.slane %v3693_v34, 4 }
 0xef9   :  { %v3695_v54 = vadd.f32 %v3694_v10, %v3693_v34 }
 0xefb   :  { %v3696_v4 = vrot.slane %v3695_v54, 2 }
 0xefd   :  { %v3697_v18 = vadd.f32 %v3696_v4, %v3695_v54 }
 0xeff   :  { %v3698_v30 = vrot.slane %v3697_v18, 1 }
 0xf01   :  { %v3699_v49 = vadd.f32 %v3698_v30, %v3697_v18 }
 0xf03   :  { %4266 = vpush %v3699_v49 }
 0xf34   :  { %s4267_s14 = spop %4266 }
 0xf35   :  { %s3701_s15 = smul.f32 4.0690105e-05, %s4267_s14 }
 0xf37   :  { %s3703_s19 = sadd.f32 %s3701_s15, %s6516_s3 }
 0xf39   :  { %s3704_s20 = sadd.f32 %s3703_s19, %s2279_s16 }
 0xf3b   :  { %3706 = sst [smem:[#allocation8]] %s3704_s20 }
 0xf3c   :  { %3724 = dma.smem_to_hbm %s4535_s21, 16, %s6518_s5, [#allocation6]  }
 0xf3d   :  { %4524 = dma.done.wait [#allocation5], 16  }
 0xf3e   :  { %4525 = vsyncadd [#allocation5], 4294967280 }
 0xf3f   :  { %4526 = dma.done.wait [#allocation6], 16  }
 0xf40   :  { %4527 = vsyncadd [#allocation6], 4294967280 }
 0xf41   :  { %3731 = sfence }
 0xf42   :  { %3732 = vsyncpa [#allocation4], 1 }
 0xf43   :  { %3733 = vsyncpa [#allocation5], 1 }
 0xf44   :  { %3734 = vsyncpa [#allocation6], 1 }

</bundles_post_ra>
